<compile_context>
chip_gen: v7x
topology: tpu7x:2x2x1
jax: 0.10.0
libtpu: 0.0.40
codegen_flags: <defaults>
</compile_context>

<pallas_src>
import functools

import numpy as np
import jax
import jax.numpy as jnp
from jax.experimental import pallas as pl
from jax.experimental.pallas import tpu as pltpu


# ----------------------------- configuration -----------------------------
BATCH = 256                                        # batch many states per call (review #1)
N_HUMANS = 5
SELF_STATE_DIM = 6
HUMAN_STATE_DIM = 7
INPUT_DIM = SELF_STATE_DIM + HUMAN_STATE_DIM       # 13
MLP1_DIMS = [64, 32]                               # mlp1: Linear->ReLU->Linear
LSTM_HIDDEN = 32
MLP_DIMS = [64, 1]                                 # mlp : Linear->ReLU->Linear
TILE_B = 128                                       # batch tile (multiple of 8)
LANES = 128                                        # slab lane width (= 4*LSTM_HIDDEN)


def _round_up(x, m):
    return ((x + m - 1) // m) * m


def _slab_layout():
    """Row offsets of each parameter inside the packed (rows, 128) slab.

    Every piece starts at an 8-aligned row so in-kernel static slices never
    straddle a sublane tile boundary.
    """
    D, H1, H = INPUT_DIM, MLP1_DIMS[0], LSTM_HIDDEN
    S, M = SELF_STATE_DIM, MLP_DIMS[0]
    offs, off = {}, 0
    for name, rows in (("w10", D), ("w_in", H1), ("w_hh", H),
                       ("w20s", S), ("w20h", H), ("w21", M), ("bias", 4)):
        offs[name] = off
        off += _round_up(rows, 8)
    return offs, _round_up(off, 8)


# --------------------------------- Pallas kernel ---------------------------------
def value_network2_kernel(
    state_ref,        # (N, TB, D)   joint state, already transposed to seq-major
    slab_ref,         # (R, 128)     packed parameters (constant across grid)
    value_ref,        # (TB, O)      output
    *, self_state_dim, lstm_hidden, mlp1_hidden, mlp_hidden, out_dim, offs,
):
    N, TB, D = state_ref.shape
    S, H, H1, M, O = self_state_dim, lstm_hidden, mlp1_hidden, mlp_hidden, out_dim
    G = 4 * H

    # ---- static, 8-aligned slices of the parameter slab ----
    w10  = slab_ref[offs["w10"]:offs["w10"] + D, 0:H1]      # (D, H1)
    w_in = slab_ref[offs["w_in"]:offs["w_in"] + H1, 0:G]    # (H1, 4H)  mlp1-L1 folded + 0.5-scaled
    w_hh = slab_ref[offs["w_hh"]:offs["w_hh"] + H, 0:G]     # (H, 4H)   0.5-scaled on i|f|o cols
    w20s = slab_ref[offs["w20s"]:offs["w20s"] + S, 0:M]     # (S, M)
    w20h = slab_ref[offs["w20h"]:offs["w20h"] + H, 0:M]     # (H, M)
    w21  = slab_ref[offs["w21"]:offs["w21"] + M, 0:O]       # (M, O)
    rb = offs["bias"]
    b10  = slab_ref[rb + 0:rb + 1, 0:H1]                    # (1, H1)
    b_in = slab_ref[rb + 1:rb + 2, 0:G]                     # (1, 4H)
    b20  = slab_ref[rb + 2:rb + 3, 0:M]                     # (1, M)
    b21  = slab_ref[rb + 3:rb + 4, 0:O]                     # (1, O)

    state = state_ref[...]                                  # (N, TB, D)
    self_state = state[0, :, 0:S]                           # (TB, S) robot self state

    # ---- mlp1 layer 0 + fused (mlp1 layer 1 ∘ LSTM input projection), hoisted ----
    x = state.reshape(N * TB, D)
    h1 = jnp.maximum(jnp.dot(x, w10, preferred_element_type=jnp.float32) + b10, 0.0)
    x_proj = (jnp.dot(h1, w_in, preferred_element_type=jnp.float32) + b_in
              ).reshape(N, TB, G)                           # per-step gate inputs, seq-major

    # ---- LSTM recurrence: one matmul + one full-vreg tanh per step ----
    # Gate lane layout: i | f | o | g.  The i/f/o columns were pre-scaled by 0.5,
    # so sigmoid(x) == 0.5*(tanh(pre-scaled gate)+1): a single 128-lane EUP push.
    h_t = jnp.zeros((TB, H), jnp.float32)
    c_t = jnp.zeros((TB, H), jnp.float32)
    for t in range(N):                                      # N is static -> unrolled
        gates = x_proj[t] + jnp.dot(h_t, w_hh, preferred_element_type=jnp.float32)
        tg = jnp.tanh(gates)                                # whole (TB, 4H) vreg
        i_g = 0.5 * (tg[:, 0:H] + 1.0)
        f_g = 0.5 * (tg[:, H:2 * H] + 1.0)
        o_g = 0.5 * (tg[:, 2 * H:3 * H] + 1.0)
        g_g = tg[:, 3 * H:4 * H]
        c_t = f_g * c_t + i_g * g_g
        h_t = o_g * jnp.tanh(c_t)

    # ---- joint state -> value mlp (concat replaced by split-weight sum) ----
    y = jnp.maximum(
        jnp.dot(self_state, w20s, preferred_element_type=jnp.float32)
        + jnp.dot(h_t, w20h, preferred_element_type=jnp.float32)
        + b20, 0.0)
    value_ref[...] = (jnp.dot(y, w21, preferred_element_type=jnp.float32) + b21
                      ).astype(value_ref.dtype)


# ----------------------------------- wrapper -------------------------------------
def value_network2_forward(state, slab, *, tile_b=TILE_B):
    """state: (B, N, D) f32, slab: packed params -> value: (B, 1) f32."""
    B, N, D = state.shape
    O = MLP_DIMS[1]
    assert tile_b % 8 == 0

    # Seq-major layout so the per-step read in the kernel is a leading-axis offset.
    state_nbd = jnp.transpose(state, (1, 0, 2))             # (N, B, D)
    tb = min(tile_b, _round_up(B, 8))
    b_pad = _round_up(B, tb)
    if b_pad != B:
        state_nbd = jnp.pad(state_nbd, ((0, 0), (0, b_pad - B), (0, 0)))

    offs, slab_rows = _slab_layout()
    assert slab.shape == (slab_rows, LANES)

    kernel = functools.partial(
        value_network2_kernel,
        self_state_dim=SELF_STATE_DIM, lstm_hidden=LSTM_HIDDEN,
        mlp1_hidden=MLP1_DIMS[0], mlp_hidden=MLP_DIMS[0], out_dim=O, offs=offs)

    H, H1, M = LSTM_HIDDEN, MLP1_DIMS[0], MLP_DIMS[0]
    flops_per_row = 2 * (N * D * H1 + N * H1 * 4 * H + N * H * 4 * H
                         + (SELF_STATE_DIM + H) * M + M * O)
    cost = pl.CostEstimate(
        flops=flops_per_row * b_pad,
        transcendentals=b_pad * N * 5 * H,
        bytes_accessed=4 * (state_nbd.size + slab.size + b_pad * O))

    out = pl.pallas_call(
        kernel,
        out_shape=jax.ShapeDtypeStruct((b_pad, O), jnp.float32),
        grid=(b_pad // tb,),
        in_specs=[
            # state: tiled on the batch (sublane) axis, pipelined/double-buffered.
            pl.BlockSpec((N, tb, D), lambda b: (0, b, 0)),
            # parameter slab: constant index_map -> fetched once, VMEM-resident.
            pl.BlockSpec((slab_rows, LANES), lambda b: (0, 0)),
        ],
        out_specs=pl.BlockSpec((tb, O), lambda b: (b, 0)),
        compiler_params=pltpu.CompilerParams(
            dimension_semantics=("parallel",)),          # megacore split on v7x
        cost_estimate=cost,
    )(state_nbd, slab)
    return out[:B] if b_pad != B else out


# ------------------------- deterministic parameter init --------------------------
def make_params(key):
    """Parameters in (transposed-)PyTorch layout; LSTM gate order i, f, g, o."""
    def dense(k, shape, scale=0.1):
        return scale * jax.random.normal(k, shape, dtype=jnp.float32)

    keys = jax.random.split(key, 12)
    H_m = MLP1_DIMS[-1]
    return {
        "w10": dense(keys[0], (INPUT_DIM, MLP1_DIMS[0])),
        "b10": dense(keys[1], (1, MLP1_DIMS[0])),
        "w11": dense(keys[2], (MLP1_DIMS[0], MLP1_DIMS[1])),
        "b11": dense(keys[3], (1, MLP1_DIMS[1])),
        "w20": dense(keys[4], (SELF_STATE_DIM + LSTM_HIDDEN, MLP_DIMS[0])),
        "b20": dense(keys[5], (1, MLP_DIMS[0])),
        "w21": dense(keys[6], (MLP_DIMS[0], MLP_DIMS[1])),
        "b21": dense(keys[7], (1, MLP_DIMS[1])),
        "w_ih": dense(keys[8], (4 * LSTM_HIDDEN, H_m)),
        "w_hh": dense(keys[9], (4 * LSTM_HIDDEN, LSTM_HIDDEN)),
        "b_ih": dense(keys[10], (4 * LSTM_HIDDEN,)),
        "b_hh": dense(keys[11], (4 * LSTM_HIDDEN,)),
    }


def prepare_kernel_params(p):
    """One-time algebraic packing/fusion into a single (rows, 128) f32 slab."""
    H = LSTM_HIDDEN
    G = 4 * H
    H1, S, M, O = MLP1_DIMS[0], SELF_STATE_DIM, MLP_DIMS[0], MLP_DIMS[1]
    # static layout guards (review correctness concern)
    assert G <= LANES and H1 <= LANES and M <= LANES and O <= LANES and INPUT_DIM <= LANES

    # Gate reorder i,f,g,o -> i,f,o,g so sigmoid gates are one contiguous lane slice.
    perm = np.concatenate([np.arange(0, 2 * H), np.arange(3 * H, 4 * H),
                           np.arange(2 * H, 3 * H)])
    w_ih_c = np.asarray(p["w_ih"], np.float32).T[:, perm]            # (H_m, 4H)
    w_hh_c = np.asarray(p["w_hh"], np.float32).T[:, perm]            # (H,   4H)
    b_c = (np.asarray(p["b_ih"]) + np.asarray(p["b_hh"]))[perm].reshape(1, G)

    # Fold mlp1 layer 1 (linear, no nonlinearity after it) into the LSTM input proj.
    w_in_eff = np.asarray(p["w11"], np.float32) @ w_ih_c             # (H1, 4H)
    b_in_eff = np.asarray(p["b11"], np.float32) @ w_ih_c + b_c       # (1, 4H)

    # Pre-scale sigmoid-gate (i|f|o) columns by 0.5: sigmoid(x)=0.5*(tanh(x/2)+1),
    # letting the kernel use a single full-width tanh per step.
    scale = np.concatenate([np.full(3 * H, 0.5, np.float32),
                            np.ones(H, np.float32)])
    w_in_eff = w_in_eff * scale
    w_hh_s = w_hh_c * scale
    b_in_eff = b_in_eff * scale

    w20 = np.asarray(p["w20"], np.float32)
    w20s, w20h = w20[:S], w20[S:]

    offs, slab_rows = _slab_layout()
    slab = np.zeros((slab_rows, LANES), np.float32)

    def put(name, arr):
        arr = np.asarray(arr, np.float32)
        slab[offs[name]:offs[name] + arr.shape[0], :arr.shape[1]] = arr

    put("w10", p["w10"])
    put("w_in", w_in_eff)
    put("w_hh", w_hh_s)
    put("w20s", w20s)
    put("w20h", w20h)
    put("w21", p["w21"])
    rb = offs["bias"]
    slab[rb + 0, :H1] = np.asarray(p["b10"], np.float32).reshape(-1)
    slab[rb + 1, :G] = b_in_eff.reshape(-1)
    slab[rb + 2, :M] = np.asarray(p["b20"], np.float32).reshape(-1)
    slab[rb + 3, :O] = np.asarray(p["b21"], np.float32).reshape(-1)
    return jnp.asarray(slab)


# ------------------------------ pure-JAX reference --------------------------------
def reference_forward(state, p):
    """Unfused reference matching the PyTorch module exactly (gate order i,f,g,o)."""
    B, N, D = state.shape
    H = LSTM_HIDDEN
    self_state = state[:, 0, :SELF_STATE_DIM]
    x = state.reshape(B * N, D)
    h = jnp.maximum(x @ p["w10"] + p["b10"], 0.0)
    m1 = (h @ p["w11"] + p["b11"]).reshape(B, N, -1)

    w_ih_t = jnp.transpose(p["w_ih"])
    w_hh_t = jnp.transpose(p["w_hh"])
    b = (p["b_ih"] + p["b_hh"]).reshape(1, 4 * H)
    h_t = jnp.zeros((B, H), jnp.float32)
    c_t = jnp.zeros((B, H), jnp.float32)
    for t in range(N):
        gates = m1[:, t, :] @ w_ih_t + h_t @ w_hh_t + b
        i = jax.nn.sigmoid(gates[:, 0:H])
        f = jax.nn.sigmoid(gates[:, H:2 * H])
        g = jnp.tanh(gates[:, 2 * H:3 * H])
        o = jax.nn.sigmoid(gates[:, 3 * H:4 * H])
        c_t = f * c_t + i * g
        h_t = o * jnp.tanh(c_t)

    joint = jnp.concatenate([self_state, h_t], axis=1)
    y = jnp.maximum(joint @ p["w20"] + p["b20"], 0.0)
    return y @ p["w21"] + p["b21"]


if __name__ == "__main__":
    key = jax.random.PRNGKey(0)
    k_state, k_params = jax.random.split(key)
    state = jax.random.normal(k_state, (BATCH, N_HUMANS, INPUT_DIM), dtype=jnp.float32)
    params = make_params(k_params)
    slab = prepare_kernel_params(params)

    value = jax.block_until_ready(value_network2_forward(state, slab))
    ref = jax.block_until_ready(reference_forward(state, params))

    assert value.shape == (BATCH, MLP_DIMS[-1])
    assert jnp.allclose(value, ref, atol=1e-4, rtol=1e-4), (value[:4], ref[:4])
    print("KERNEL_OK")
</pallas_src>

<mosaic_0001>
module attributes {stable_mosaic.version = 11 : i64} {
  func.func @value_network2_kernel(%arg0: i32, %arg1: memref<5x128x13xf32, #tpu.memory_space<vmem>>, %arg2: memref<224x128xf32, #tpu.memory_space<vmem>>, %arg3: memref<128x1xf32, #tpu.memory_space<vmem>>) attributes {dimension_semantics = [#tpu.dimension_semantics<parallel>], iteration_bounds = array<i64: 2>, scalar_prefetch = 0 : i64, scratch_operands = 0 : i64, tpu.core_type = #tpu.core_type<tc>, window_params = [{transform_indices = @transform_0, window_bounds = array<i64: 5, 128, 13>}, {pipeline_mode = #tpu.pipeline_mode<synchronous>, transform_indices = @transform_1, window_bounds = array<i64: 224, 128>}, {transform_indices = @transform_2, window_bounds = array<i64: 128, 1>}]} {
    %c0 = arith.constant 0 : index
    %c0_0 = arith.constant 0 : index
    %0 = vector.load %arg2[%c0, %c0_0] : memref<224x128xf32, #tpu.memory_space<vmem>>, vector<13x64xf32>
    %c16 = arith.constant 16 : index
    %c0_1 = arith.constant 0 : index
    %1 = vector.load %arg2[%c16, %c0_1] : memref<224x128xf32, #tpu.memory_space<vmem>>, vector<64x128xf32>
    %c80 = arith.constant 80 : index
    %c0_2 = arith.constant 0 : index
    %2 = vector.load %arg2[%c80, %c0_2] : memref<224x128xf32, #tpu.memory_space<vmem>>, vector<32x128xf32>
    %c112 = arith.constant 112 : index
    %c0_3 = arith.constant 0 : index
    %3 = vector.load %arg2[%c112, %c0_3] : memref<224x128xf32, #tpu.memory_space<vmem>>, vector<6x64xf32>
    %c120 = arith.constant 120 : index
    %c0_4 = arith.constant 0 : index
    %4 = vector.load %arg2[%c120, %c0_4] : memref<224x128xf32, #tpu.memory_space<vmem>>, vector<32x64xf32>
    %c152 = arith.constant 152 : index
    %c0_5 = arith.constant 0 : index
    %5 = vector.load %arg2[%c152, %c0_5] : memref<224x128xf32, #tpu.memory_space<vmem>>, vector<64x1xf32>
    %c216 = arith.constant 216 : index
    %c0_6 = arith.constant 0 : index
    %6 = vector.load %arg2[%c216, %c0_6] : memref<224x128xf32, #tpu.memory_space<vmem>>, vector<1x64xf32>
    %c217 = arith.constant 217 : index
    %c0_7 = arith.constant 0 : index
    %7 = vector.load %arg2[%c217, %c0_7] : memref<224x128xf32, #tpu.memory_space<vmem>>, vector<1x128xf32>
    %c218 = arith.constant 218 : index
    %c0_8 = arith.constant 0 : index
    %8 = vector.load %arg2[%c218, %c0_8] : memref<224x128xf32, #tpu.memory_space<vmem>>, vector<1x64xf32>
    %c219 = arith.constant 219 : index
    %c0_9 = arith.constant 0 : index
    %9 = vector.load %arg2[%c219, %c0_9] : memref<224x128xf32, #tpu.memory_space<vmem>>, vector<1x1xf32>
    %c0_10 = arith.constant 0 : index
    %c0_11 = arith.constant 0 : index
    %c0_12 = arith.constant 0 : index
    %10 = vector.load %arg1[%c0_10, %c0_11, %c0_12] : memref<5x128x13xf32, #tpu.memory_space<vmem>>, vector<5x128x13xf32>
    %11 = vector.extract_strided_slice %10 {offsets = [0, 0, 0], sizes = [1, 128, 6], strides = [1, 1, 1]} : vector<5x128x13xf32> to vector<1x128x6xf32>
    %12 = vector.shape_cast %11 : vector<1x128x6xf32> to vector<128x6xf32>
    %13 = vector.shape_cast %10 : vector<5x128x13xf32> to vector<640x13xf32>
    %cst = arith.constant dense<0.000000e+00> : vector<640x64xf32>
    %14 = tpu.matmul %13, %0, %cst {dimension_numbers = #tpu.dot_dimension_numbers<[1], [0], [0], [1], [0, 0, 1, 1], [], []>} : vector<640x13xf32>, vector<13x64xf32>, vector<640x64xf32> -> vector<640x64xf32>
    %15 = vector.broadcast %6 : vector<1x64xf32> to vector<640x64xf32>
    %16 = arith.addf %14, %15 : vector<640x64xf32>
    %cst_13 = arith.constant 0.000000e+00 : f32
    %17 = vector.broadcast %cst_13 : f32 to vector<640x64xf32>
    %18 = arith.maximumf %16, %17 : vector<640x64xf32>
    %cst_14 = arith.constant dense<0.000000e+00> : vector<640x128xf32>
    %19 = tpu.matmul %18, %1, %cst_14 {dimension_numbers = #tpu.dot_dimension_numbers<[1], [0], [0], [1], [0, 0, 1, 1], [], []>} : vector<640x64xf32>, vector<64x128xf32>, vector<640x128xf32> -> vector<640x128xf32>
    %20 = vector.broadcast %7 : vector<1x128xf32> to vector<640x128xf32>
    %21 = arith.addf %19, %20 : vector<640x128xf32>
    %22 = vector.shape_cast %21 : vector<640x128xf32> to vector<5x128x128xf32>
    %cst_15 = arith.constant 0.000000e+00 : f32
    %23 = vector.broadcast %cst_15 : f32 to vector<128x32xf32>
    %cst_16 = arith.constant 0.000000e+00 : f32
    %24 = vector.broadcast %cst_16 : f32 to vector<128x32xf32>
    %25 = vector.extract_strided_slice %22 {offsets = [0, 0, 0], sizes = [1, 128, 128], strides = [1, 1, 1]} : vector<5x128x128xf32> to vector<1x128x128xf32>
    %26 = vector.shape_cast %25 : vector<1x128x128xf32> to vector<128x128xf32>
    %cst_17 = arith.constant dense<0.000000e+00> : vector<128x128xf32>
    %27 = tpu.matmul %23, %2, %cst_17 {dimension_numbers = #tpu.dot_dimension_numbers<[1], [0], [0], [1], [0, 0, 1, 1], [], []>} : vector<128x32xf32>, vector<32x128xf32>, vector<128x128xf32> -> vector<128x128xf32>
    %28 = arith.addf %26, %27 : vector<128x128xf32>
    %29 = math.tanh %28 : vector<128x128xf32>
    %30 = vector.extract_strided_slice %29 {offsets = [0, 0], sizes = [128, 32], strides = [1, 1]} : vector<128x128xf32> to vector<128x32xf32>
    %cst_18 = arith.constant 1.000000e+00 : f32
    %31 = vector.broadcast %cst_18 : f32 to vector<128x32xf32>
    %32 = arith.addf %30, %31 : vector<128x32xf32>
    %cst_19 = arith.constant 5.000000e-01 : f32
    %33 = vector.broadcast %cst_19 : f32 to vector<128x32xf32>
    %34 = arith.mulf %33, %32 : vector<128x32xf32>
    %35 = vector.extract_strided_slice %29 {offsets = [0, 32], sizes = [128, 32], strides = [1, 1]} : vector<128x128xf32> to vector<128x32xf32>
    %cst_20 = arith.constant 1.000000e+00 : f32
    %36 = vector.broadcast %cst_20 : f32 to vector<128x32xf32>
    %37 = arith.addf %35, %36 : vector<128x32xf32>
    %cst_21 = arith.constant 5.000000e-01 : f32
    %38 = vector.broadcast %cst_21 : f32 to vector<128x32xf32>
    %39 = arith.mulf %38, %37 : vector<128x32xf32>
    %40 = vector.extract_strided_slice %29 {offsets = [0, 64], sizes = [128, 32], strides = [1, 1]} : vector<128x128xf32> to vector<128x32xf32>
    %cst_22 = arith.constant 1.000000e+00 : f32
    %41 = vector.broadcast %cst_22 : f32 to vector<128x32xf32>
    %42 = arith.addf %40, %41 : vector<128x32xf32>
    %cst_23 = arith.constant 5.000000e-01 : f32
    %43 = vector.broadcast %cst_23 : f32 to vector<128x32xf32>
    %44 = arith.mulf %43, %42 : vector<128x32xf32>
    %45 = vector.extract_strided_slice %29 {offsets = [0, 96], sizes = [128, 32], strides = [1, 1]} : vector<128x128xf32> to vector<128x32xf32>
    %46 = arith.mulf %39, %24 : vector<128x32xf32>
    %47 = arith.mulf %34, %45 : vector<128x32xf32>
    %48 = arith.addf %46, %47 : vector<128x32xf32>
    %49 = math.tanh %48 : vector<128x32xf32>
    %50 = arith.mulf %44, %49 : vector<128x32xf32>
    %51 = vector.extract_strided_slice %22 {offsets = [1, 0, 0], sizes = [1, 128, 128], strides = [1, 1, 1]} : vector<5x128x128xf32> to vector<1x128x128xf32>
    %52 = vector.shape_cast %51 : vector<1x128x128xf32> to vector<128x128xf32>
    %cst_24 = arith.constant dense<0.000000e+00> : vector<128x128xf32>
    %53 = tpu.matmul %50, %2, %cst_24 {dimension_numbers = #tpu.dot_dimension_numbers<[1], [0], [0], [1], [0, 0, 1, 1], [], []>} : vector<128x32xf32>, vector<32x128xf32>, vector<128x128xf32> -> vector<128x128xf32>
    %54 = arith.addf %52, %53 : vector<128x128xf32>
    %55 = math.tanh %54 : vector<128x128xf32>
    %56 = vector.extract_strided_slice %55 {offsets = [0, 0], sizes = [128, 32], strides = [1, 1]} : vector<128x128xf32> to vector<128x32xf32>
    %cst_25 = arith.constant 1.000000e+00 : f32
    %57 = vector.broadcast %cst_25 : f32 to vector<128x32xf32>
    %58 = arith.addf %56, %57 : vector<128x32xf32>
    %cst_26 = arith.constant 5.000000e-01 : f32
    %59 = vector.broadcast %cst_26 : f32 to vector<128x32xf32>
    %60 = arith.mulf %59, %58 : vector<128x32xf32>
    %61 = vector.extract_strided_slice %55 {offsets = [0, 32], sizes = [128, 32], strides = [1, 1]} : vector<128x128xf32> to vector<128x32xf32>
    %cst_27 = arith.constant 1.000000e+00 : f32
    %62 = vector.broadcast %cst_27 : f32 to vector<128x32xf32>
    %63 = arith.addf %61, %62 : vector<128x32xf32>
    %cst_28 = arith.constant 5.000000e-01 : f32
    %64 = vector.broadcast %cst_28 : f32 to vector<128x32xf32>
    %65 = arith.mulf %64, %63 : vector<128x32xf32>
    %66 = vector.extract_strided_slice %55 {offsets = [0, 64], sizes = [128, 32], strides = [1, 1]} : vector<128x128xf32> to vector<128x32xf32>
    %cst_29 = arith.constant 1.000000e+00 : f32
    %67 = vector.broadcast %cst_29 : f32 to vector<128x32xf32>
    %68 = arith.addf %66, %67 : vector<128x32xf32>
    %cst_30 = arith.constant 5.000000e-01 : f32
    %69 = vector.broadcast %cst_30 : f32 to vector<128x32xf32>
    %70 = arith.mulf %69, %68 : vector<128x32xf32>
    %71 = vector.extract_strided_slice %55 {offsets = [0, 96], sizes = [128, 32], strides = [1, 1]} : vector<128x128xf32> to vector<128x32xf32>
    %72 = arith.mulf %65, %48 : vector<128x32xf32>
    %73 = arith.mulf %60, %71 : vector<128x32xf32>
    %74 = arith.addf %72, %73 : vector<128x32xf32>
    %75 = math.tanh %74 : vector<128x32xf32>
    %76 = arith.mulf %70, %75 : vector<128x32xf32>
    %77 = vector.extract_strided_slice %22 {offsets = [2, 0, 0], sizes = [1, 128, 128], strides = [1, 1, 1]} : vector<5x128x128xf32> to vector<1x128x128xf32>
    %78 = vector.shape_cast %77 : vector<1x128x128xf32> to vector<128x128xf32>
    %cst_31 = arith.constant dense<0.000000e+00> : vector<128x128xf32>
    %79 = tpu.matmul %76, %2, %cst_31 {dimension_numbers = #tpu.dot_dimension_numbers<[1], [0], [0], [1], [0, 0, 1, 1], [], []>} : vector<128x32xf32>, vector<32x128xf32>, vector<128x128xf32> -> vector<128x128xf32>
    %80 = arith.addf %78, %79 : vector<128x128xf32>
    %81 = math.tanh %80 : vector<128x128xf32>
    %82 = vector.extract_strided_slice %81 {offsets = [0, 0], sizes = [128, 32], strides = [1, 1]} : vector<128x128xf32> to vector<128x32xf32>
    %cst_32 = arith.constant 1.000000e+00 : f32
    %83 = vector.broadcast %cst_32 : f32 to vector<128x32xf32>
    %84 = arith.addf %82, %83 : vector<128x32xf32>
    %cst_33 = arith.constant 5.000000e-01 : f32
    %85 = vector.broadcast %cst_33 : f32 to vector<128x32xf32>
    %86 = arith.mulf %85, %84 : vector<128x32xf32>
    %87 = vector.extract_strided_slice %81 {offsets = [0, 32], sizes = [128, 32], strides = [1, 1]} : vector<128x128xf32> to vector<128x32xf32>
    %cst_34 = arith.constant 1.000000e+00 : f32
    %88 = vector.broadcast %cst_34 : f32 to vector<128x32xf32>
    %89 = arith.addf %87, %88 : vector<128x32xf32>
    %cst_35 = arith.constant 5.000000e-01 : f32
    %90 = vector.broadcast %cst_35 : f32 to vector<128x32xf32>
    %91 = arith.mulf %90, %89 : vector<128x32xf32>
    %92 = vector.extract_strided_slice %81 {offsets = [0, 64], sizes = [128, 32], strides = [1, 1]} : vector<128x128xf32> to vector<128x32xf32>
    %cst_36 = arith.constant 1.000000e+00 : f32
    %93 = vector.broadcast %cst_36 : f32 to vector<128x32xf32>
    %94 = arith.addf %92, %93 : vector<128x32xf32>
    %cst_37 = arith.constant 5.000000e-01 : f32
    %95 = vector.broadcast %cst_37 : f32 to vector<128x32xf32>
    %96 = arith.mulf %95, %94 : vector<128x32xf32>
    %97 = vector.extract_strided_slice %81 {offsets = [0, 96], sizes = [128, 32], strides = [1, 1]} : vector<128x128xf32> to vector<128x32xf32>
    %98 = arith.mulf %91, %74 : vector<128x32xf32>
    %99 = arith.mulf %86, %97 : vector<128x32xf32>
    %100 = arith.addf %98, %99 : vector<128x32xf32>
    %101 = math.tanh %100 : vector<128x32xf32>
    %102 = arith.mulf %96, %101 : vector<128x32xf32>
    %103 = vector.extract_strided_slice %22 {offsets = [3, 0, 0], sizes = [1, 128, 128], strides = [1, 1, 1]} : vector<5x128x128xf32> to vector<1x128x128xf32>
    %104 = vector.shape_cast %103 : vector<1x128x128xf32> to vector<128x128xf32>
    %cst_38 = arith.constant dense<0.000000e+00> : vector<128x128xf32>
    %105 = tpu.matmul %102, %2, %cst_38 {dimension_numbers = #tpu.dot_dimension_numbers<[1], [0], [0], [1], [0, 0, 1, 1], [], []>} : vector<128x32xf32>, vector<32x128xf32>, vector<128x128xf32> -> vector<128x128xf32>
    %106 = arith.addf %104, %105 : vector<128x128xf32>
    %107 = math.tanh %106 : vector<128x128xf32>
    %108 = vector.extract_strided_slice %107 {offsets = [0, 0], sizes = [128, 32], strides = [1, 1]} : vector<128x128xf32> to vector<128x32xf32>
    %cst_39 = arith.constant 1.000000e+00 : f32
    %109 = vector.broadcast %cst_39 : f32 to vector<128x32xf32>
    %110 = arith.addf %108, %109 : vector<128x32xf32>
    %cst_40 = arith.constant 5.000000e-01 : f32
    %111 = vector.broadcast %cst_40 : f32 to vector<128x32xf32>
    %112 = arith.mulf %111, %110 : vector<128x32xf32>
    %113 = vector.extract_strided_slice %107 {offsets = [0, 32], sizes = [128, 32], strides = [1, 1]} : vector<128x128xf32> to vector<128x32xf32>
    %cst_41 = arith.constant 1.000000e+00 : f32
    %114 = vector.broadcast %cst_41 : f32 to vector<128x32xf32>
    %115 = arith.addf %113, %114 : vector<128x32xf32>
    %cst_42 = arith.constant 5.000000e-01 : f32
    %116 = vector.broadcast %cst_42 : f32 to vector<128x32xf32>
    %117 = arith.mulf %116, %115 : vector<128x32xf32>
    %118 = vector.extract_strided_slice %107 {offsets = [0, 64], sizes = [128, 32], strides = [1, 1]} : vector<128x128xf32> to vector<128x32xf32>
    %cst_43 = arith.constant 1.000000e+00 : f32
    %119 = vector.broadcast %cst_43 : f32 to vector<128x32xf32>
    %120 = arith.addf %118, %119 : vector<128x32xf32>
    %cst_44 = arith.constant 5.000000e-01 : f32
    %121 = vector.broadcast %cst_44 : f32 to vector<128x32xf32>
    %122 = arith.mulf %121, %120 : vector<128x32xf32>
    %123 = vector.extract_strided_slice %107 {offsets = [0, 96], sizes = [128, 32], strides = [1, 1]} : vector<128x128xf32> to vector<128x32xf32>
    %124 = arith.mulf %117, %100 : vector<128x32xf32>
    %125 = arith.mulf %112, %123 : vector<128x32xf32>
    %126 = arith.addf %124, %125 : vector<128x32xf32>
    %127 = math.tanh %126 : vector<128x32xf32>
    %128 = arith.mulf %122, %127 : vector<128x32xf32>
    %129 = vector.extract_strided_slice %22 {offsets = [4, 0, 0], sizes = [1, 128, 128], strides = [1, 1, 1]} : vector<5x128x128xf32> to vector<1x128x128xf32>
    %130 = vector.shape_cast %129 : vector<1x128x128xf32> to vector<128x128xf32>
    %cst_45 = arith.constant dense<0.000000e+00> : vector<128x128xf32>
    %131 = tpu.matmul %128, %2, %cst_45 {dimension_numbers = #tpu.dot_dimension_numbers<[1], [0], [0], [1], [0, 0, 1, 1], [], []>} : vector<128x32xf32>, vector<32x128xf32>, vector<128x128xf32> -> vector<128x128xf32>
    %132 = arith.addf %130, %131 : vector<128x128xf32>
    %133 = math.tanh %132 : vector<128x128xf32>
    %134 = vector.extract_strided_slice %133 {offsets = [0, 0], sizes = [128, 32], strides = [1, 1]} : vector<128x128xf32> to vector<128x32xf32>
    %cst_46 = arith.constant 1.000000e+00 : f32
    %135 = vector.broadcast %cst_46 : f32 to vector<128x32xf32>
    %136 = arith.addf %134, %135 : vector<128x32xf32>
    %cst_47 = arith.constant 5.000000e-01 : f32
    %137 = vector.broadcast %cst_47 : f32 to vector<128x32xf32>
    %138 = arith.mulf %137, %136 : vector<128x32xf32>
    %139 = vector.extract_strided_slice %133 {offsets = [0, 32], sizes = [128, 32], strides = [1, 1]} : vector<128x128xf32> to vector<128x32xf32>
    %cst_48 = arith.constant 1.000000e+00 : f32
    %140 = vector.broadcast %cst_48 : f32 to vector<128x32xf32>
    %141 = arith.addf %139, %140 : vector<128x32xf32>
    %cst_49 = arith.constant 5.000000e-01 : f32
    %142 = vector.broadcast %cst_49 : f32 to vector<128x32xf32>
    %143 = arith.mulf %142, %141 : vector<128x32xf32>
    %144 = vector.extract_strided_slice %133 {offsets = [0, 64], sizes = [128, 32], strides = [1, 1]} : vector<128x128xf32> to vector<128x32xf32>
    %cst_50 = arith.constant 1.000000e+00 : f32
    %145 = vector.broadcast %cst_50 : f32 to vector<128x32xf32>
    %146 = arith.addf %144, %145 : vector<128x32xf32>
    %cst_51 = arith.constant 5.000000e-01 : f32
    %147 = vector.broadcast %cst_51 : f32 to vector<128x32xf32>
    %148 = arith.mulf %147, %146 : vector<128x32xf32>
    %149 = vector.extract_strided_slice %133 {offsets = [0, 96], sizes = [128, 32], strides = [1, 1]} : vector<128x128xf32> to vector<128x32xf32>
    %150 = arith.mulf %143, %126 : vector<128x32xf32>
    %151 = arith.mulf %138, %149 : vector<128x32xf32>
    %152 = arith.addf %150, %151 : vector<128x32xf32>
    %153 = math.tanh %152 : vector<128x32xf32>
    %154 = arith.mulf %148, %153 : vector<128x32xf32>
    %cst_52 = arith.constant dense<0.000000e+00> : vector<128x64xf32>
    %155 = tpu.matmul %12, %3, %cst_52 {dimension_numbers = #tpu.dot_dimension_numbers<[1], [0], [0], [1], [0, 0, 1, 1], [], []>} : vector<128x6xf32>, vector<6x64xf32>, vector<128x64xf32> -> vector<128x64xf32>
    %cst_53 = arith.constant dense<0.000000e+00> : vector<128x64xf32>
    %156 = tpu.matmul %154, %4, %cst_53 {dimension_numbers = #tpu.dot_dimension_numbers<[1], [0], [0], [1], [0, 0, 1, 1], [], []>} : vector<128x32xf32>, vector<32x64xf32>, vector<128x64xf32> -> vector<128x64xf32>
    %157 = arith.addf %155, %156 : vector<128x64xf32>
    %158 = vector.broadcast %8 : vector<1x64xf32> to vector<128x64xf32>
    %159 = arith.addf %157, %158 : vector<128x64xf32>
    %cst_54 = arith.constant 0.000000e+00 : f32
    %160 = vector.broadcast %cst_54 : f32 to vector<128x64xf32>
    %161 = arith.maximumf %159, %160 : vector<128x64xf32>
    %cst_55 = arith.constant dense<0.000000e+00> : vector<128x1xf32>
    %162 = tpu.matmul %161, %5, %cst_55 {dimension_numbers = #tpu.dot_dimension_numbers<[1], [0], [0], [1], [0, 0, 1, 1], [], []>} : vector<128x64xf32>, vector<64x1xf32>, vector<128x1xf32> -> vector<128x1xf32>
    %163 = vector.broadcast %9 : vector<1x1xf32> to vector<128x1xf32>
    %164 = arith.addf %162, %163 : vector<128x1xf32>
    %c0_56 = arith.constant 0 : index
    %c0_57 = arith.constant 0 : index
    %165 = vector.load %arg3[%c0_56, %c0_57] : memref<128x1xf32, #tpu.memory_space<vmem>>, vector<128x1xf32>
    tpu.vector_store %arg3[%c0_56, %c0_57], %164 {strides = array<i32>} : memref<128x1xf32, #tpu.memory_space<vmem>>, vector<128x1xf32>,
    return
  }
  func.func @transform_0(%arg0: i32) -> (i32, i32, i32) {
    %c0_i32 = arith.constant 0 : i32
    %c0_i32_0 = arith.constant 0 : i32
    %c0_i32_1 = arith.constant 0 : i32
    return %c0_i32, %arg0, %c0_i32_0 : i32, i32, i32
  }
  func.func @transform_1(%arg0: i32) -> (i32, i32) {
    %c0_i32 = arith.constant 0 : i32
    %c0_i32_0 = arith.constant 0 : i32
    %c0_i32_1 = arith.constant 0 : i32
    return %c0_i32, %c0_i32_0 : i32, i32
  }
  func.func @transform_2(%arg0: i32) -> (i32, i32) {
    %c0_i32 = arith.constant 0 : i32
    %c0_i32_0 = arith.constant 0 : i32
    return %arg0, %c0_i32 : i32, i32
  }
}

</mosaic_0001>

<bundles_post_ra>
// kernel: tpu_custom_call.1
= control target key start
LH: loop header
LB: loop body
LE: loop exit
PB: predicated region body
PF: predicated region fallthrough
CT: control target
= control target key end

     0   :  { %s7380_s9 = smov 0   ;;  %s7382_s10 = smov 0   ;;  %s9332_s0 = inlined_call_operand.vmem [shape: f32[5,256,13], index: 0, kind: input, shape index: {}]   ;;  %s9333_s1 = inlined_call_operand.vmem [shape: f32[224,128], index: 1, kind: input, shape index: {}]   ;;  %s9334_s2 = inlined_call_operand.vmem [shape: f32[256,1], index: 2, kind: output, shape index: {}]  }
   0x1   :  { %s7384_s11 = smov 0  }
   0x2 LB: > { %s5560_s12 = sadd.s32 4294967295, %s7359_s11   ;;  %s7397_s13 = sadd.s32 1, %s7359_s11   ;;  %s7359_s11 = sphi %s7384_s11, %s9337_s11   ;;  %s7355_s10 = sphi %s7382_s10, %s9336_s10   ;;  %s7351_s9 = sphi %s7380_s9, %s9335_s9  }
   0x3   : > { %s16_s14 = ssub.s32 %s7359_s11, %s7397_s13  ;;  %s19_s15 = sadd.s32 1, %s7355_s10 }
   0x4   : > { %p17_p0 = scmp.eq.s32.totalorder %s16_s14, 0  ;;  %p26_p1 = scmp.ne.s32.totalorder %s7355_s10, %s7351_s9 }
   0x5   : > { %p27_p2 = scmp.eq.s32.totalorder %s7359_s11, 0  ;;  %p5563_p4 = scmp.ge.s32.totalorder %s7359_s11, 2 }
   0x6   : > { %s7406_s16 = scalar_select %p17_p0, %s7355_s10, %s19_s15  }
   0x7   : > { %p28_p3 = por %p27_p2, %p26_p1  ;;  %102 = sbr.rel (%p5563_p4) target bundleno = 59 (0x3b), region = 20 }
   0xe   : > { %105 = sbr.rel (!%p28_p3) target bundleno = 59 (0x3b), region = 24  ;;  %s107_s17 = sand.u32 (%p28_p3), 1, %s7355_s10  }
   0xf   : > { %s5849_s18 = sshll.u32 (%p28_p3), %s7359_s11, 7  ;;  %s6969_s19 = smul.u32 (%p28_p3), 640, %s107_s17 }
  0x10   : > { %s7414_s22 = scalar_lea.vmem (%p28_p3), %s9332_s0, %s5849_s18 }
  0x11   : > { %v298_v0 = vld [vmem:[%s7414_s22] sm:$0xff] (%p28_p3)  ;;  %v300_v1 = vld [vmem:[%s7414_s22 + $0x8] sm:$0xff] (%p28_p3)  ;;  %v302_v2 = vld [vmem:[%s7414_s22 + $0x10] sm:$0xff] (%p28_p3)  ;;  %s7422_s23 = scalar_lea.vmem (%p28_p3), [#allocation2], %s6969_s19 }
  0x12   : > { %v304_v3 = vld [vmem:[%s7414_s22 + $0x18] sm:$0xff] (%p28_p3)  ;;  %v306_v4 = vld [vmem:[%s7414_s22 + $0x20] sm:$0xff] (%p28_p3)  ;;  %v308_v5 = vld [vmem:[%s7414_s22 + $0x28] sm:$0xff] (%p28_p3)  ;;  %299 = vst [vmem:[%s7422_s23] sm:$0xff] (%p28_p3), %v298_v0 }
  0x13   : > { %301 = vst [vmem:[%s7422_s23 + $0x8] sm:$0xff] (%p28_p3), %v300_v1  ;;  %303 = vst [vmem:[%s7422_s23 + $0x10] sm:$0xff] (%p28_p3), %v302_v2  ;;  %v310_v6 = vld [vmem:[%s7414_s22 + $0x30] sm:$0xff] (%p28_p3)  ;;  %v312_v7 = vld [vmem:[%s7414_s22 + $0x38] sm:$0xff] (%p28_p3) }
  0x14   : > { %305 = vst [vmem:[%s7422_s23 + $0x18] sm:$0xff] (%p28_p3), %v304_v3  ;;  %307 = vst [vmem:[%s7422_s23 + $0x20] sm:$0xff] (%p28_p3), %v306_v4  ;;  %v314_v8 = vld [vmem:[%s7414_s22 + $0x40] sm:$0xff] (%p28_p3)  ;;  %v316_v9 = vld [vmem:[%s7414_s22 + $0x48] sm:$0xff] (%p28_p3) }
  0x15   : > { %309 = vst [vmem:[%s7422_s23 + $0x28] sm:$0xff] %v308_v5  ;;  %311 = vst [vmem:[%s7422_s23 + $0x30] sm:$0xff] %v310_v6  ;;  %v318_v10 = vld [vmem:[%s7414_s22 + $0x50] sm:$0xff]  ;;  %v320_v11 = vld [vmem:[%s7414_s22 + $0x58] sm:$0xff] }
  0x16   : > { %313 = vst [vmem:[%s7422_s23 + $0x38] sm:$0xff] %v312_v7  ;;  %315 = vst [vmem:[%s7422_s23 + $0x40] sm:$0xff] %v314_v8  ;;  %v322_v12 = vld [vmem:[%s7414_s22 + $0x60] sm:$0xff]  ;;  %v324_v13 = vld [vmem:[%s7414_s22 + $0x68] sm:$0xff] }
  0x17   : > { %317 = vst [vmem:[%s7422_s23 + $0x48] sm:$0xff] %v316_v9  ;;  %319 = vst [vmem:[%s7422_s23 + $0x50] sm:$0xff] %v318_v10  ;;  %v326_v14 = vld [vmem:[%s7414_s22 + $0x70] sm:$0xff]  ;;  %v328_v15 = vld [vmem:[%s7414_s22 + $0x78] sm:$0xff] }
  0x18   : > { %321 = vst [vmem:[%s7422_s23 + $0x58] sm:$0xff] %v320_v11  ;;  %323 = vst [vmem:[%s7422_s23 + $0x60] sm:$0xff] %v322_v12  ;;  %v330_v16 = vld [vmem:[%s7414_s22 + $0x100] sm:$0xff]  ;;  %v332_v17 = vld [vmem:[%s7414_s22 + $0x108] sm:$0xff] }
  0x19   : > { %325 = vst [vmem:[%s7422_s23 + $0x68] sm:$0xff] %v324_v13  ;;  %327 = vst [vmem:[%s7422_s23 + $0x70] sm:$0xff] %v326_v14  ;;  %v334_v18 = vld [vmem:[%s7414_s22 + $0x110] sm:$0xff]  ;;  %v336_v19 = vld [vmem:[%s7414_s22 + $0x118] sm:$0xff] }
  0x1a   : > { %329 = vst [vmem:[%s7422_s23 + $0x78] sm:$0xff] %v328_v15  ;;  %331 = vst [vmem:[%s7422_s23 + $0x80] sm:$0xff] %v330_v16  ;;  %v338_v20 = vld [vmem:[%s7414_s22 + $0x120] sm:$0xff]  ;;  %v340_v21 = vld [vmem:[%s7414_s22 + $0x128] sm:$0xff] }
  0x1b   : > { %333 = vst [vmem:[%s7422_s23 + $0x88] sm:$0xff] %v332_v17  ;;  %335 = vst [vmem:[%s7422_s23 + $0x90] sm:$0xff] %v334_v18  ;;  %v342_v22 = vld [vmem:[%s7414_s22 + $0x130] sm:$0xff]  ;;  %v344_v23 = vld [vmem:[%s7414_s22 + $0x138] sm:$0xff] }
  0x1c   : > { %337 = vst [vmem:[%s7422_s23 + $0x98] sm:$0xff] %v336_v19  ;;  %339 = vst [vmem:[%s7422_s23 + $0xa0] sm:$0xff] %v338_v20  ;;  %v346_v24 = vld [vmem:[%s7414_s22 + $0x140] sm:$0xff]  ;;  %v348_v25 = vld [vmem:[%s7414_s22 + $0x148] sm:$0xff] }
  0x1d   : > { %341 = vst [vmem:[%s7422_s23 + $0xa8] sm:$0xff] %v340_v21  ;;  %343 = vst [vmem:[%s7422_s23 + $0xb0] sm:$0xff] %v342_v22  ;;  %v350_v26 = vld [vmem:[%s7414_s22 + $0x150] sm:$0xff]  ;;  %v352_v27 = vld [vmem:[%s7414_s22 + $0x158] sm:$0xff] }
  0x1e   : > { %345 = vst [vmem:[%s7422_s23 + $0xb8] sm:$0xff] %v344_v23  ;;  %347 = vst [vmem:[%s7422_s23 + $0xc0] sm:$0xff] %v346_v24  ;;  %v354_v28 = vld [vmem:[%s7414_s22 + $0x160] sm:$0xff]  ;;  %v356_v29 = vld [vmem:[%s7414_s22 + $0x168] sm:$0xff] }
  0x1f   : > { %349 = vst [vmem:[%s7422_s23 + $0xc8] sm:$0xff] %v348_v25  ;;  %351 = vst [vmem:[%s7422_s23 + $0xd0] sm:$0xff] %v350_v26  ;;  %v358_v30 = vld [vmem:[%s7414_s22 + $0x170] sm:$0xff]  ;;  %v360_v31 = vld [vmem:[%s7414_s22 + $0x178] sm:$0xff] }
  0x20   : > { %353 = vst [vmem:[%s7422_s23 + $0xd8] sm:$0xff] %v352_v27  ;;  %355 = vst [vmem:[%s7422_s23 + $0xe0] sm:$0xff] %v354_v28  ;;  %v362_v32 = vld [vmem:[%s7414_s22 + $0x200] sm:$0xff]  ;;  %v364_v33 = vld [vmem:[%s7414_s22 + $0x208] sm:$0xff] }
  0x21   : > { %357 = vst [vmem:[%s7422_s23 + $0xe8] sm:$0xff] %v356_v29  ;;  %359 = vst [vmem:[%s7422_s23 + $0xf0] sm:$0xff] %v358_v30  ;;  %v366_v34 = vld [vmem:[%s7414_s22 + $0x210] sm:$0xff]  ;;  %v368_v35 = vld [vmem:[%s7414_s22 + $0x218] sm:$0xff] }
  0x22   : > { %361 = vst [vmem:[%s7422_s23 + $0xf8] sm:$0xff] %v360_v31  ;;  %363 = vst [vmem:[%s7422_s23 + $0x100] sm:$0xff] %v362_v32  ;;  %v370_v36 = vld [vmem:[%s7414_s22 + $0x220] sm:$0xff]  ;;  %v372_v37 = vld [vmem:[%s7414_s22 + $0x228] sm:$0xff] }
  0x23   : > { %365 = vst [vmem:[%s7422_s23 + $0x108] sm:$0xff] %v364_v33  ;;  %367 = vst [vmem:[%s7422_s23 + $0x110] sm:$0xff] %v366_v34  ;;  %v374_v38 = vld [vmem:[%s7414_s22 + $0x230] sm:$0xff]  ;;  %v376_v39 = vld [vmem:[%s7414_s22 + $0x238] sm:$0xff] }
  0x24   : > { %369 = vst [vmem:[%s7422_s23 + $0x118] sm:$0xff] %v368_v35  ;;  %371 = vst [vmem:[%s7422_s23 + $0x120] sm:$0xff] %v370_v36  ;;  %v378_v40 = vld [vmem:[%s7414_s22 + $0x240] sm:$0xff]  ;;  %v380_v41 = vld [vmem:[%s7414_s22 + $0x248] sm:$0xff] }
  0x25   : > { %373 = vst [vmem:[%s7422_s23 + $0x128] sm:$0xff] %v372_v37  ;;  %375 = vst [vmem:[%s7422_s23 + $0x130] sm:$0xff] %v374_v38  ;;  %v382_v42 = vld [vmem:[%s7414_s22 + $0x250] sm:$0xff]  ;;  %v384_v43 = vld [vmem:[%s7414_s22 + $0x258] sm:$0xff] }
  0x26   : > { %377 = vst [vmem:[%s7422_s23 + $0x138] sm:$0xff] %v376_v39  ;;  %379 = vst [vmem:[%s7422_s23 + $0x140] sm:$0xff] %v378_v40  ;;  %v386_v44 = vld [vmem:[%s7414_s22 + $0x260] sm:$0xff]  ;;  %v388_v45 = vld [vmem:[%s7414_s22 + $0x268] sm:$0xff] }
  0x27   : > { %381 = vst [vmem:[%s7422_s23 + $0x148] sm:$0xff] %v380_v41  ;;  %383 = vst [vmem:[%s7422_s23 + $0x150] sm:$0xff] %v382_v42  ;;  %v390_v46 = vld [vmem:[%s7414_s22 + $0x270] sm:$0xff]  ;;  %v392_v47 = vld [vmem:[%s7414_s22 + $0x278] sm:$0xff] }
  0x28   : > { %385 = vst [vmem:[%s7422_s23 + $0x158] sm:$0xff] %v384_v43  ;;  %387 = vst [vmem:[%s7422_s23 + $0x160] sm:$0xff] %v386_v44  ;;  %v394_v48 = vld [vmem:[%s7414_s22 + $0x300] sm:$0xff]  ;;  %v396_v49 = vld [vmem:[%s7414_s22 + $0x308] sm:$0xff] }
  0x29   : > { %389 = vst [vmem:[%s7422_s23 + $0x168] sm:$0xff] %v388_v45  ;;  %391 = vst [vmem:[%s7422_s23 + $0x170] sm:$0xff] %v390_v46  ;;  %v398_v50 = vld [vmem:[%s7414_s22 + $0x310] sm:$0xff]  ;;  %v400_v51 = vld [vmem:[%s7414_s22 + $0x318] sm:$0xff] }
  0x2a   : > { %393 = vst [vmem:[%s7422_s23 + $0x178] sm:$0xff] %v392_v47  ;;  %395 = vst [vmem:[%s7422_s23 + $0x180] sm:$0xff] %v394_v48  ;;  %v402_v52 = vld [vmem:[%s7414_s22 + $0x320] sm:$0xff]  ;;  %v404_v53 = vld [vmem:[%s7414_s22 + $0x328] sm:$0xff] }
  0x2b   : > { %397 = vst [vmem:[%s7422_s23 + $0x188] sm:$0xff] %v396_v49  ;;  %399 = vst [vmem:[%s7422_s23 + $0x190] sm:$0xff] %v398_v50  ;;  %v406_v54 = vld [vmem:[%s7414_s22 + $0x330] sm:$0xff]  ;;  %v408_v55 = vld [vmem:[%s7414_s22 + $0x338] sm:$0xff] }
  0x2c   : > { %401 = vst [vmem:[%s7422_s23 + $0x198] sm:$0xff] %v400_v51  ;;  %403 = vst [vmem:[%s7422_s23 + $0x1a0] sm:$0xff] %v402_v52  ;;  %v410_v56 = vld [vmem:[%s7414_s22 + $0x340] sm:$0xff]  ;;  %v412_v57 = vld [vmem:[%s7414_s22 + $0x348] sm:$0xff] }
  0x2d   : > { %405 = vst [vmem:[%s7422_s23 + $0x1a8] sm:$0xff] %v404_v53  ;;  %407 = vst [vmem:[%s7422_s23 + $0x1b0] sm:$0xff] %v406_v54  ;;  %v414_v58 = vld [vmem:[%s7414_s22 + $0x350] sm:$0xff]  ;;  %v416_v59 = vld [vmem:[%s7414_s22 + $0x358] sm:$0xff] }
  0x2e   : > { %409 = vst [vmem:[%s7422_s23 + $0x1b8] sm:$0xff] %v408_v55  ;;  %411 = vst [vmem:[%s7422_s23 + $0x1c0] sm:$0xff] %v410_v56  ;;  %v418_v60 = vld [vmem:[%s7414_s22 + $0x360] sm:$0xff]  ;;  %v420_v61 = vld [vmem:[%s7414_s22 + $0x368] sm:$0xff] }
  0x2f   : > { %413 = vst [vmem:[%s7422_s23 + $0x1c8] sm:$0xff] %v412_v57  ;;  %415 = vst [vmem:[%s7422_s23 + $0x1d0] sm:$0xff] %v414_v58  ;;  %v422_v62 = vld [vmem:[%s7414_s22 + $0x370] sm:$0xff]  ;;  %v424_v63 = vld [vmem:[%s7414_s22 + $0x378] sm:$0xff] }
  0x30   : > { %417 = vst [vmem:[%s7422_s23 + $0x1d8] sm:$0xff] %v416_v59  ;;  %419 = vst [vmem:[%s7422_s23 + $0x1e0] sm:$0xff] %v418_v60  ;;  %v426_v0 = vld [vmem:[%s7414_s22 + $0x400] sm:$0xff]  ;;  %v428_v1 = vld [vmem:[%s7414_s22 + $0x408] sm:$0xff] }
  0x31   : > { %421 = vst [vmem:[%s7422_s23 + $0x1e8] sm:$0xff] %v420_v61  ;;  %423 = vst [vmem:[%s7422_s23 + $0x1f0] sm:$0xff] %v422_v62  ;;  %v430_v2 = vld [vmem:[%s7414_s22 + $0x410] sm:$0xff]  ;;  %v432_v3 = vld [vmem:[%s7414_s22 + $0x418] sm:$0xff] }
  0x32   : > { %425 = vst [vmem:[%s7422_s23 + $0x1f8] sm:$0xff] %v424_v63  ;;  %427 = vst [vmem:[%s7422_s23 + $0x200] sm:$0xff] %v426_v0  ;;  %v434_v4 = vld [vmem:[%s7414_s22 + $0x420] sm:$0xff]  ;;  %v436_v5 = vld [vmem:[%s7414_s22 + $0x428] sm:$0xff] }
  0x33   : > { %429 = vst [vmem:[%s7422_s23 + $0x208] sm:$0xff] %v428_v1  ;;  %431 = vst [vmem:[%s7422_s23 + $0x210] sm:$0xff] %v430_v2  ;;  %v438_v6 = vld [vmem:[%s7414_s22 + $0x430] sm:$0xff]  ;;  %v440_v7 = vld [vmem:[%s7414_s22 + $0x438] sm:$0xff] }
  0x34   : > { %433 = vst [vmem:[%s7422_s23 + $0x218] sm:$0xff] %v432_v3  ;;  %435 = vst [vmem:[%s7422_s23 + $0x220] sm:$0xff] %v434_v4  ;;  %v442_v8 = vld [vmem:[%s7414_s22 + $0x440] sm:$0xff]  ;;  %v444_v9 = vld [vmem:[%s7414_s22 + $0x448] sm:$0xff] }
  0x35   : > { %437 = vst [vmem:[%s7422_s23 + $0x228] sm:$0xff] %v436_v5  ;;  %439 = vst [vmem:[%s7422_s23 + $0x230] sm:$0xff] %v438_v6  ;;  %v446_v10 = vld [vmem:[%s7414_s22 + $0x450] sm:$0xff]  ;;  %v448_v11 = vld [vmem:[%s7414_s22 + $0x458] sm:$0xff] }
  0x36   : > { %441 = vst [vmem:[%s7422_s23 + $0x238] sm:$0xff] %v440_v7  ;;  %443 = vst [vmem:[%s7422_s23 + $0x240] sm:$0xff] %v442_v8  ;;  %v450_v12 = vld [vmem:[%s7414_s22 + $0x460] sm:$0xff]  ;;  %v452_v13 = vld [vmem:[%s7414_s22 + $0x468] sm:$0xff] }
  0x37   : > { %445 = vst [vmem:[%s7422_s23 + $0x248] sm:$0xff] %v444_v9  ;;  %447 = vst [vmem:[%s7422_s23 + $0x250] sm:$0xff] %v446_v10  ;;  %v454_v14 = vld [vmem:[%s7414_s22 + $0x470] sm:$0xff]  ;;  %v456_v15 = vld [vmem:[%s7414_s22 + $0x478] sm:$0xff] }
  0x38   : > { %449 = vst [vmem:[%s7422_s23 + $0x258] sm:$0xff] %v448_v11  ;;  %451 = vst [vmem:[%s7422_s23 + $0x260] sm:$0xff] %v450_v12 }
  0x39   : > { %453 = vst [vmem:[%s7422_s23 + $0x268] sm:$0xff] %v452_v13  ;;  %455 = vst [vmem:[%s7422_s23 + $0x270] sm:$0xff] %v454_v14 }
  0x3a   : > { %457 = vst [vmem:[%s7422_s23 + $0x278] sm:$0xff] %v456_v15 }
  0x3b PF: > { %p5566_p5 = scmp.ge.s32.totalorder %s7359_s11, 1  ;;  %p462_p6 = scmp.lt.s32.totalorder %s7359_s11, 3 }
  0x3d   : > { %p463_p7 = pnand %p5566_p5, %p462_p6 }
  0x3e   : > { %v497_v16 = vld [vmem:[%s9333_s1] sm:$0xff] (!%p463_p7)  ;;  %v498_v17 = vld [vmem:[%s9333_s1 + $0x8] sm:$0x1f] (!%p463_p7)  ;;  %vm853_vm0 = vcmask (!%p463_p7), 1044480   ;;  %s469_s28 = sand.u32 (!%p463_p7), 1, %s7351_s9   ;;  %vm7361_vm1 = vmmov (!%p463_p7), 1  }
  0x3f   : > { %466 = sbr.rel (%p463_p7) target bundleno = 4464 (0x1170), region = 62  ;;  %v6699_v18 = vpack.c.bf16 (!%p463_p7), %v498_v17, %v497_v16  ;;  %vm6700_vm2 = vmpackc.low (!%p463_p7), %vm853_vm0, %vm7361_vm1  ;;  %vm612_vm3 = vcmask (!%p463_p7), 105472   ;;  %v499_v36 = vld [vmem:[%s9333_s1 + $0x10] sm:$0xff] (!%p463_p7)  ;;  %v500_v37 = vld [vmem:[%s9333_s1 + $0x18] sm:$0xff] (!%p463_p7)  ;;  %vm1406_vm4 = vcmask (!%p463_p7), 523264   ;;  %s7363_s9 = smov (!%p463_p7), 32  }
  0x40   : > { %s6970_s29 = smul.u32 (!%p463_p7), 640, %s469_s28  ;;  %v501_v38 = vld [vmem:[%s9333_s1 + $0x20] sm:$0xff] (!%p463_p7)  ;;  %v6705_v40 = vpack.c.bf16 (!%p463_p7), %v500_v37, %v499_v36  ;;  %v502_v41 = vld [vmem:[%s9333_s1 + $0x28] sm:$0xff] (!%p463_p7)  ;;  %v503_v44 = vld [vmem:[%s9333_s1 + $0x30] sm:$0xff] (!%p463_p7)  ;;  %s7364_s14 = smov (!%p463_p7), 64   ;;  %vm2112_vm5 = vcmask (!%p463_p7), 261120  }
  0x41   : > { %6701 = vmatprep.subr.msk.bf16.mxu0 (!%p463_p7), %vm6700_vm2, %v6699_v18  ;;  %v6709_v43 = vpack.c.bf16 (!%p463_p7), %v502_v41, %v501_v38  ;;  %v504_v45 = vld [vmem:[%s9333_s1 + $0x38] sm:$0xff] (!%p463_p7)  ;;  %v505_v9 = vld [vmem:[%s9333_s1 + $0x40] sm:$0xff] (!%p463_p7)  ;;  %v506_v10 = vld [vmem:[%s9333_s1 + $0x48] sm:$0xff] (!%p463_p7)  ;;  %vm5099_vm6 = vcmask (!%p463_p7), 1045504   ;;  %vm5066_vm7 = vcmask (!%p463_p7), 48128   ;;  %vm5481_vm8 = vcmask (!%p463_p7), 7168  }
  0x42   : > { %6704 = vmatpush3.bf16.msk.msra.mxu0 (!%p463_p7), %vm6700_vm2, %v6699_v18  ;;  %s7587_s30 = scalar_lea.vmem (!%p463_p7), [#allocation2], %s6970_s29  ;;  %6785 = vmatprep.subr.bf16.mxu1 (!%p463_p7), %v6705_v40  ;;  %v6713_v48 = vpack.c.bf16 (!%p463_p7), %v504_v45, %v503_v44  ;;  %v6717_v11 = vpack.c.bf16 (!%p463_p7), %v506_v10, %v505_v9 }
  0x43   : > { %v528_v19 = vld [vmem:[%s7587_s30] sm:$0xff] (!%p463_p7)  ;;  %v529_v20 = vld [vmem:[%s7587_s30 + $0x8] sm:$0xff] (!%p463_p7)  ;;  %v530_v21 = vld [vmem:[%s7587_s30 + $0x10] sm:$0xff] (!%p463_p7)  ;;  %6706 = vmatprep.subr.bf16.mxu0 (!%p463_p7), %v6705_v40  ;;  %6789 = vmatpush3.bf16.msra.mxu1 (!%p463_p7), %v6705_v40 }
  0x44   : > { %6185 = vmatprep.mubr.msk.f32.mxu0 (!%p463_p7), %vm612_vm3, %v528_v19  ;;  %v531_v22 = vld [vmem:[%s7587_s30 + $0x18] sm:$0xff] (!%p463_p7)  ;;  %v532_v23 = vld [vmem:[%s7587_s30 + $0x20] sm:$0xff] (!%p463_p7)  ;;  %v533_v24 = vld [vmem:[%s7587_s30 + $0x28] sm:$0xff] (!%p463_p7)  ;;  %6786 = vmatprep.subr.bf16.mxu1 (!%p463_p7), %v6709_v43 }
  0x45   : > { %6186 = vmatmul.mubr.msk.f32.vlgmr.msra.gmra.mrb[0].mxu0 (!%p463_p7), %vm612_vm3, %v529_v20  ;;  %v534_v25 = vld [vmem:[%s7587_s30 + $0x30] sm:$0xff] (!%p463_p7)  ;;  %v535_v26 = vld [vmem:[%s7587_s30 + $0x38] sm:$0xff] (!%p463_p7)  ;;  %v536_v27 = vld [vmem:[%s7587_s30 + $0x40] sm:$0xff] (!%p463_p7) }
  0x46   : > { %6188 = vmatprep.mubr.msk.f32.mxu0 %vm612_vm3, %v530_v21  ;;  %v537_v28 = vld [vmem:[%s7587_s30 + $0x48] sm:$0xff]  ;;  %v538_v29 = vld [vmem:[%s7587_s30 + $0x50] sm:$0xff]  ;;  %v539_v30 = vld [vmem:[%s7587_s30 + $0x58] sm:$0xff]  ;;  %6708 = vmatpush3.bf16.msra.mxu0 %v6705_v40 }
  0x47   : > { %v540_v31 = vld [vmem:[%s7587_s30 + $0x60] sm:$0xff]  ;;  %v541_v32 = vld [vmem:[%s7587_s30 + $0x68] sm:$0xff]  ;;  %v542_v33 = vld [vmem:[%s7587_s30 + $0x70] sm:$0xff]  ;;  %6710 = vmatprep.subr.bf16.mxu0 %v6709_v43  ;;  %6790 = vmatpush3.bf16.msra.mxu1 %v6709_v43 }
  0x48   : > { %v543_v34 = vld [vmem:[%s7587_s30 + $0x78] sm:$0xff]  ;;  %v544_v35 = vld [vmem:[%s7587_s30 + $0x80] sm:$0xff]  ;;  %v545_v39 = vld [vmem:[%s7587_s30 + $0x88] sm:$0xff]  ;;  %6787 = vmatprep.subr.bf16.mxu1 %v6713_v48 }
  0x49   : > { %6189 = vmatmul.mubr.msk.f32.gmra.mrb[2].mxu0 %vm612_vm3, %v531_v22  ;;  %v546_v42 = vld [vmem:[%s7587_s30 + $0x90] sm:$0xff]  ;;  %v547_v46 = vld [vmem:[%s7587_s30 + $0x98] sm:$0xff]  ;;  %v548_v47 = vld [vmem:[%s7587_s30 + $0xa0] sm:$0xff] }
  0x4a   : > { %6191 = vmatprep.mubr.msk.f32.mxu0 %vm612_vm3, %v532_v23  ;;  %v549_v49 = vld [vmem:[%s7587_s30 + $0xa8] sm:$0xff]  ;;  %6712 = vmatpush3.bf16.msra.mxu0 %v6709_v43  ;;  %v550_v50 = vld [vmem:[%s7587_s30 + $0xb0] sm:$0xff]  ;;  %v551_v51 = vld [vmem:[%s7587_s30 + $0xb8] sm:$0xff] }
  0x4b   : > { %6714 = vmatprep.subr.bf16.mxu0 %v6713_v48  ;;  %6791 = vmatpush3.bf16.msra.mxu1 %v6713_v48  ;;  %v552_v52 = vld [vmem:[%s7587_s30 + $0xc0] sm:$0xff]  ;;  %v553_v53 = vld [vmem:[%s7587_s30 + $0xc8] sm:$0xff]  ;;  %v554_v54 = vld [vmem:[%s7587_s30 + $0xd0] sm:$0xff] }
  0x4c   : > { %v555_v55 = vld [vmem:[%s7587_s30 + $0xd8] sm:$0xff]  ;;  %v556_v56 = vld [vmem:[%s7587_s30 + $0xe0] sm:$0xff]  ;;  %v557_v57 = vld [vmem:[%s7587_s30 + $0xe8] sm:$0xff]  ;;  %6788 = vmatprep.subr.bf16.mxu1 %v6717_v11 }
  0x4d   : > { %6192 = vmatmul.mubr.msk.f32.gmra.mrb[4].mxu0 %vm612_vm3, %v533_v24  ;;  %v558_v58 = vld [vmem:[%s7587_s30 + $0xf0] sm:$0xff]  ;;  %v559_v59 = vld [vmem:[%s7587_s30 + $0xf8] sm:$0xff]  ;;  %v560_v60 = vld [vmem:[%s7587_s30 + $0x100] sm:$0xff] }
  0x4e   : > { %6194 = vmatprep.mubr.msk.f32.mxu0 %vm612_vm3, %v534_v25  ;;  %6716 = vmatpush3.bf16.msra.mxu0 %v6713_v48  ;;  %v561_v61 = vld [vmem:[%s7587_s30 + $0x108] sm:$0xff]  ;;  %v562_v62 = vld [vmem:[%s7587_s30 + $0x110] sm:$0xff]  ;;  %v563_v63 = vld [vmem:[%s7587_s30 + $0x118] sm:$0xff] }
  0x4f   : > { %v564_v0 = vld [vmem:[%s7587_s30 + $0x120] sm:$0xff]  ;;  %v565_v1 = vld [vmem:[%s7587_s30 + $0x128] sm:$0xff]  ;;  %v566_v2 = vld [vmem:[%s7587_s30 + $0x130] sm:$0xff]  ;;  %6718 = vmatprep.subr.bf16.mxu0 %v6717_v11  ;;  %6792 = vmatpush3.bf16.msra.mxu1 %v6717_v11 }
  0x50   : > { %v567_v3 = vld [vmem:[%s7587_s30 + $0x138] sm:$0xff]  ;;  %v568_v4 = vld [vmem:[%s7587_s30 + $0x140] sm:$0xff]  ;;  %v569_v5 = vld [vmem:[%s7587_s30 + $0x148] sm:$0xff] }
  0x51   : > { %6195 = vmatmul.mubr.msk.f32.gmra.mrb[6].mxu0 %vm612_vm3, %v535_v26  ;;  %v570_v6 = vld [vmem:[%s7587_s30 + $0x150] sm:$0xff]  ;;  %v571_v7 = vld [vmem:[%s7587_s30 + $0x158] sm:$0xff]  ;;  %v572_v8 = vld [vmem:[%s7587_s30 + $0x160] sm:$0xff] }
  0x52   : > { %6197 = vmatprep.mubr.msk.f32.mxu0 %vm612_vm3, %v536_v27  ;;  %v573_v12 = vld [vmem:[%s7587_s30 + $0x168] sm:$0xff]  ;;  %v574_v13 = vld [vmem:[%s7587_s30 + $0x170] sm:$0xff]  ;;  %6720 = vmatpush3.bf16.msra.mxu0 %v6717_v11  ;;  %v575_v14 = vld [vmem:[%s7587_s30 + $0x178] sm:$0xff] }
  0x53   : > { %v576_v15 = vld [vmem:[%s7587_s30 + $0x180] sm:$0xff]  ;;  %v577_v16 = vld [vmem:[%s7587_s30 + $0x188] sm:$0xff]  ;;  %v578_v17 = vld [vmem:[%s7587_s30 + $0x190] sm:$0xff] }
  0x54   : > { %v579_v18 = vld [vmem:[%s7587_s30 + $0x198] sm:$0xff]  ;;  %v580_v19 = vld [vmem:[%s7587_s30 + $0x1a0] sm:$0xff]  ;;  %v581_v20 = vld [vmem:[%s7587_s30 + $0x1a8] sm:$0xff] }
  0x55   : > { %6198 = vmatmul.mubr.msk.f32.gmra.mrb[8].mxu0 %vm612_vm3, %v537_v28  ;;  %v582_v21 = vld [vmem:[%s7587_s30 + $0x1b0] sm:$0xff]  ;;  %v583_v22 = vld [vmem:[%s7587_s30 + $0x1b8] sm:$0xff]  ;;  %v584_v23 = vld [vmem:[%s7587_s30 + $0x1c0] sm:$0xff] }
  0x56   : > { %6200 = vmatprep.mubr.msk.f32.mxu0 %vm612_vm3, %v538_v29  ;;  %v585_v24 = vld [vmem:[%s7587_s30 + $0x1c8] sm:$0xff]  ;;  %v586_v25 = vld [vmem:[%s7587_s30 + $0x1d0] sm:$0xff]  ;;  %v587_v26 = vld [vmem:[%s7587_s30 + $0x1d8] sm:$0xff] }
  0x57   : > { %v588_v27 = vld [vmem:[%s7587_s30 + $0x1e0] sm:$0xff]  ;;  %v589_v28 = vld [vmem:[%s7587_s30 + $0x1e8] sm:$0xff]  ;;  %v590_v29 = vld [vmem:[%s7587_s30 + $0x1f0] sm:$0xff] }
  0x58   : > { %v595_v37 = vld [vmem:[%s7587_s30 + $0x218] sm:$0xff]  ;;  %v596_v38 = vld [vmem:[%s7587_s30 + $0x220] sm:$0xff]  ;;  %v598_v40 = vld [vmem:[%s7587_s30 + $0x230] sm:$0xff] }
  0x59   : > { %6201 = vmatmul.mubr.msk.f32.gmra.mrb[10].mxu0 %vm612_vm3, %v539_v30  ;;  %v591_v30 = vld [vmem:[%s7587_s30 + $0x1f8] sm:$0xff]  ;;  %v601_v43 = vld [vmem:[%s7587_s30 + $0x248] sm:$0xff]  ;;  %v602_v44 = vld [vmem:[%s7587_s30 + $0x250] sm:$0xff] }
  0x5a   : > { %6203 = vmatprep.mubr.msk.f32.mxu0 %vm612_vm3, %v540_v31  ;;  %v592_v31 = vld [vmem:[%s7587_s30 + $0x200] sm:$0xff]  ;;  %v599_v41 = vld [vmem:[%s7587_s30 + $0x238] sm:$0xff]  ;;  %v606_v48 = vld [vmem:[%s7587_s30 + $0x270] sm:$0xff] }
  0x5b   : > { %v603_v45 = vld [vmem:[%s7587_s30 + $0x258] sm:$0xff] }
  0x5d   : > { %6204 = vmatmul.mubr.msk.f32.gmra.mrb[12].mxu0 %vm612_vm3, %v541_v32  ;;  %v593_v32 = vld [vmem:[%s7587_s30 + $0x208] sm:$0xff] }
  0x5e   : > { %6206 = vmatprep.mubr.msk.f32.mxu0 %vm612_vm3, %v542_v33  ;;  %v594_v33 = vld [vmem:[%s7587_s30 + $0x210] sm:$0xff] }
  0x61   : > { %6207 = vmatmul.mubr.msk.f32.gmra.mrb[14].mxu0 %vm612_vm3, %v543_v34  ;;  %v507_v34 = vld [vmem:[%s9333_s1 + $0x50] sm:$0xff] }
  0x62   : > { %6209 = vmatprep.mubr.msk.f32.mxu0 %vm612_vm3, %v544_v35  ;;  %v508_v35 = vld [vmem:[%s9333_s1 + $0x58] sm:$0xff] }
  0x63   : > { %v7752_v36 = vpack.c.bf16 %v508_v35, %v507_v34 }
  0x65   : > { %6210 = vmatmul.mubr.msk.f32.gmra.mrb[16].mxu0 %vm612_vm3, %v545_v39  ;;  %6722 = vmatprep.subr.bf16.mxu1 %v7752_v36  ;;  %v597_v39 = vld [vmem:[%s7587_s30 + $0x228] sm:$0xff] }
  0x66   : > { %6212 = vmatprep.mubr.msk.f32.mxu0 %vm612_vm3, %v546_v42  ;;  %v600_v42 = vld [vmem:[%s7587_s30 + $0x240] sm:$0xff] }
  0x69   : > { %6213 = vmatmul.mubr.msk.f32.gmra.mrb[18].mxu0 %vm612_vm3, %v547_v46  ;;  %v604_v46 = vld [vmem:[%s7587_s30 + $0x260] sm:$0xff] }
  0x6a   : > { %6215 = vmatprep.mubr.msk.f32.mxu0 %vm612_vm3, %v548_v47  ;;  %v605_v47 = vld [vmem:[%s7587_s30 + $0x268] sm:$0xff] }
  0x6d   : > { %6216 = vmatmul.mubr.msk.f32.gmra.mrb[20].mxu0 %vm612_vm3, %v549_v49  ;;  %v607_v49 = vld [vmem:[%s7587_s30 + $0x278] sm:$0xff] }
  0x6e   : > { %6218 = vmatprep.mubr.msk.f32.mxu0 %vm612_vm3, %v550_v50  ;;  %v7785_v50 = vld [vmem:[%s9333_s1 + $0xd8] ss:$0 sm:$0xff] }
  0x71   : > { %6219 = vmatmul.mubr.msk.f32.gmra.mrb[22].mxu0 %vm612_vm3, %v551_v51 }
  0x72   : > { %6221 = vmatprep.mubr.msk.f32.mxu0 %vm612_vm3, %v552_v52 }
  0x75   : > { %6222 = vmatmul.mubr.msk.f32.gmra.mrb[24].mxu0 %vm612_vm3, %v553_v53 }
  0x76   : > { %6224 = vmatprep.mubr.msk.f32.mxu0 %vm612_vm3, %v554_v54 }
  0x79   : > { %6225 = vmatmul.mubr.msk.f32.gmra.mrb[26].mxu0 %vm612_vm3, %v555_v55 }
  0x7a   : > { %6227 = vmatprep.mubr.msk.f32.mxu0 %vm612_vm3, %v556_v56 }
  0x7d   : > { %6228 = vmatmul.mubr.msk.f32.gmra.mrb[28].mxu0 %vm612_vm3, %v557_v57 }
  0x7e   : > { %6230 = vmatprep.mubr.msk.f32.mxu0 %vm612_vm3, %v558_v58 }
  0x81   : > { %6231 = vmatmul.mubr.msk.f32.gmra.mrb[30].mxu0 %vm612_vm3, %v559_v59 }
  0x82   : > { %6233 = vmatprep.mubr.msk.f32.mxu0 %vm612_vm3, %v560_v60 }
  0x85   : > { %6234 = vmatmul.mubr.msk.f32.gmra.mrb[32].mxu0 %vm612_vm3, %v561_v61 }
  0x86   : > { %6236 = vmatprep.mubr.msk.f32.mxu0 %vm612_vm3, %v562_v62 }
  0x89   : > { %6237 = vmatmul.mubr.msk.f32.gmra.mrb[34].mxu0 %vm612_vm3, %v563_v63 }
  0x8a   : > { %6239 = vmatprep.mubr.msk.f32.mxu0 %vm612_vm3, %v564_v0 }
  0x8d   : > { %6240 = vmatmul.mubr.msk.f32.gmra.mrb[36].mxu0 %vm612_vm3, %v565_v1 }
  0x8e   : > { %6242 = vmatprep.mubr.msk.f32.mxu0 %vm612_vm3, %v566_v2 }
  0x91   : > { %6243 = vmatmul.mubr.msk.f32.gmra.mrb[38].mxu0 %vm612_vm3, %v567_v3 }
  0x92   : > { %6245 = vmatprep.mubr.msk.f32.mxu0 %vm612_vm3, %v568_v4 }
  0x95   : > { %6246 = vmatmul.mubr.msk.f32.gmra.mrb[40].mxu0 %vm612_vm3, %v569_v5 }
  0x96   : > { %6248 = vmatprep.mubr.msk.f32.mxu0 %vm612_vm3, %v570_v6 }
  0x99   : > { %6249 = vmatmul.mubr.msk.f32.gmra.mrb[42].mxu0 %vm612_vm3, %v571_v7 }
  0x9a   : > { %6251 = vmatprep.mubr.msk.f32.mxu0 %vm612_vm3, %v572_v8 }
  0x9d   : > { %6252 = vmatmul.mubr.msk.f32.gmra.mrb[44].mxu0 %vm612_vm3, %v573_v12 }
  0x9e   : > { %6254 = vmatprep.mubr.msk.f32.mxu0 %vm612_vm3, %v574_v13 }
  0xa1   : > { %6255 = vmatmul.mubr.msk.f32.gmra.mrb[46].mxu0 %vm612_vm3, %v575_v14 }
  0xa2   : > { %6257 = vmatprep.mubr.msk.f32.mxu0 %vm612_vm3, %v576_v15 }
  0xa5   : > { %6258 = vmatmul.mubr.msk.f32.gmra.mrb[48].mxu0 %vm612_vm3, %v577_v16 }
  0xa6   : > { %6260 = vmatprep.mubr.msk.f32.mxu0 %vm612_vm3, %v578_v17 }
  0xa9   : > { %6261 = vmatmul.mubr.msk.f32.gmra.mrb[50].mxu0 %vm612_vm3, %v579_v18 }
  0xaa   : > { %6263 = vmatprep.mubr.msk.f32.mxu0 %vm612_vm3, %v580_v19 }
  0xad   : > { %6264 = vmatmul.mubr.msk.f32.gmra.mrb[52].mxu0 %vm612_vm3, %v581_v20 }
  0xae   : > { %6266 = vmatprep.mubr.msk.f32.mxu0 %vm612_vm3, %v582_v21 }
  0xb1   : > { %6267 = vmatmul.mubr.msk.f32.gmra.mrb[54].mxu0 %vm612_vm3, %v583_v22 }
  0xb2   : > { %6269 = vmatprep.mubr.msk.f32.mxu0 %vm612_vm3, %v584_v23 }
  0xb5   : > { %6270 = vmatmul.mubr.msk.f32.gmra.mrb[56].mxu0 %vm612_vm3, %v585_v24 }
  0xb6   : > { %6272 = vmatprep.mubr.msk.f32.mxu0 %vm612_vm3, %v586_v25 }
  0xb9   : > { %6273 = vmatmul.mubr.msk.f32.gmra.mrb[58].mxu0 %vm612_vm3, %v587_v26 }
  0xba   : > { %6275 = vmatprep.mubr.msk.f32.mxu0 %vm612_vm3, %v588_v27 }
  0xbd   : > { %6276 = vmatmul.mubr.msk.f32.gmra.mrb[60].mxu0 %vm612_vm3, %v589_v28 }
  0xbe   : > { %6278 = vmatprep.mubr.msk.f32.mxu0 %vm612_vm3, %v590_v29 }
  0xc1   : > { %6279 = vmatmul.mubr.msk.f32.gmra.mrb[62].mxu0 %vm612_vm3, %v591_v30 }
  0xc2   : > { %6281 = vmatprep.mubr.msk.f32.mxu0 %vm612_vm3, %v592_v31 }
  0xc5   : > { %6282 = vmatmul.mubr.msk.f32.gmra.mrb[64].mxu0 %vm612_vm3, %v593_v32 }
  0xc6   : > { %6284 = vmatprep.mubr.msk.f32.mxu0 %vm612_vm3, %v594_v33 }
  0xc9   : > { %6285 = vmatmul.mubr.msk.f32.gmra.mrb[66].mxu0 %vm612_vm3, %v595_v37 }
  0xca   : > { %6287 = vmatprep.mubr.msk.f32.mxu0 %vm612_vm3, %v596_v38 }
  0xcd   : > { %6288 = vmatmul.mubr.msk.f32.gmra.mrb[68].mxu0 %vm612_vm3, %v597_v39 }
  0xce   : > { %6290 = vmatprep.mubr.msk.f32.mxu0 %vm612_vm3, %v598_v40 }
  0xd1   : > { %6291 = vmatmul.mubr.msk.f32.gmra.mrb[70].mxu0 %vm612_vm3, %v599_v41 }
  0xd2   : > { %6293 = vmatprep.mubr.msk.f32.mxu0 %vm612_vm3, %v600_v42 }
  0xd5   : > { %6294 = vmatmul.mubr.msk.f32.gmra.mrb[72].mxu0 %vm612_vm3, %v601_v43 }
  0xd6   : > { %6296 = vmatprep.mubr.msk.f32.mxu0 %vm612_vm3, %v602_v44 }
  0xd9   : > { %6297 = vmatmul.mubr.msk.f32.gmra.mrb[74].mxu0 %vm612_vm3, %v603_v45 }
  0xda   : > { %6299 = vmatprep.mubr.msk.f32.mxu0 %vm612_vm3, %v604_v46  ;;  %v509_v46 = vld [vmem:[%s9333_s1 + $0x60] sm:$0xff] }
  0xdd   : > { %6300 = vmatmul.mubr.msk.f32.gmra.mrb[76].mxu0 %vm612_vm3, %v605_v47  ;;  %v510_v47 = vld [vmem:[%s9333_s1 + $0x68] sm:$0xff] }
  0xde   : > { %6302 = vmatprep.mubr.msk.f32.mxu0 %vm612_vm3, %v606_v48 }
  0xe1   : > { %6303 = vmatmul.mubr.msk.f32.gmra.mrb[78].mxu0 %vm612_vm3, %v607_v49 }
 0x118   : > { %v6187_v51 = vpop.f32.mrb[0].mxu0 }
 0x119   : > { %v929_v52 = vadd.f32 %v6187_v51, %v7785_v50  ;;  %v923_v53 = vpop.f32.mrb[1].mxu0 }
 0x11a   : > { %v924_v54 = vadd.f32 %v7785_v50, %v923_v53 }
 0x11b   : > { %v1323_v57 = vmax.f32 %v929_v52, 0.0 }
 0x11c   : > { %v1322_v55 = vmax.f32 %v924_v54, 0.0  ;;  %v6190_v56 = vpop.f32.mrb[2].mxu0  ;;  %v7832_v54 = vpack.c.bf16 %v510_v47, %v509_v46 }
 0x11d   : > { %v939_v58 = vadd.f32 %v6190_v56, %v7785_v50  ;;  %v933_v59 = vpop.f32.mrb[3].mxu0 }
 0x11e   : > { %v934_v60 = vadd.f32 %v7785_v50, %v933_v59  ;;  %6321 = vmatprep.mubr.msk.f32.mxu0 %vm1406_vm4, %v1322_v55 }
 0x11f   : > { %6322 = vmatmul.mubr.msk.f32.vlgmr.msra.gmra.mrb[80].mxu0 %vm1406_vm4, %v1323_v57  ;;  %v1325_v63 = vmax.f32 %v939_v58, 0.0 }
 0x120   : > { %v1324_v61 = vmax.f32 %v934_v60, 0.0  ;;  %v6193_v62 = vpop.f32.mrb[4].mxu0 }
 0x121   : > { %v949_v0 = vadd.f32 %v6193_v62, %v7785_v50  ;;  %v943_v1 = vpop.f32.mrb[5].mxu0 }
 0x122   : > { %v944_v2 = vadd.f32 %v7785_v50, %v943_v1  ;;  %6324 = vmatprep.mubr.msk.f32.mxu0 %vm1406_vm4, %v1324_v61 }
 0x123   : > { %6325 = vmatmul.mubr.msk.f32.gmra.mrb[82].mxu0 %vm1406_vm4, %v1325_v63  ;;  %v1327_v5 = vmax.f32 %v949_v0, 0.0 }
 0x124   : > { %v1326_v3 = vmax.f32 %v944_v2, 0.0  ;;  %v6196_v4 = vpop.f32.mrb[6].mxu0 }
 0x125   : > { %v959_v6 = vadd.f32 %v6196_v4, %v7785_v50  ;;  %v953_v7 = vpop.f32.mrb[7].mxu0 }
 0x126   : > { %v954_v8 = vadd.f32 %v7785_v50, %v953_v7  ;;  %6327 = vmatprep.mubr.msk.f32.mxu0 %vm1406_vm4, %v1326_v3 }
 0x127   : > { %6328 = vmatmul.mubr.msk.f32.gmra.mrb[84].mxu0 %vm1406_vm4, %v1327_v5  ;;  %v1329_v11 = vmax.f32 %v959_v6, 0.0 }
 0x128   : > { %v1328_v9 = vmax.f32 %v954_v8, 0.0  ;;  %v6199_v10 = vpop.f32.mrb[8].mxu0 }
 0x129   : > { %v969_v12 = vadd.f32 %v6199_v10, %v7785_v50  ;;  %v963_v13 = vpop.f32.mrb[9].mxu0 }
 0x12a   : > { %v964_v14 = vadd.f32 %v7785_v50, %v963_v13  ;;  %6330 = vmatprep.mubr.msk.f32.mxu0 %vm1406_vm4, %v1328_v9 }
 0x12b   : > { %6331 = vmatmul.mubr.msk.f32.gmra.mrb[86].mxu0 %vm1406_vm4, %v1329_v11  ;;  %v1331_v17 = vmax.f32 %v969_v12, 0.0 }
 0x12c   : > { %v1330_v15 = vmax.f32 %v964_v14, 0.0  ;;  %v6202_v16 = vpop.f32.mrb[10].mxu0 }
 0x12d   : > { %v979_v18 = vadd.f32 %v6202_v16, %v7785_v50  ;;  %v973_v19 = vpop.f32.mrb[11].mxu0 }
 0x12e   : > { %v974_v20 = vadd.f32 %v7785_v50, %v973_v19  ;;  %6333 = vmatprep.mubr.msk.f32.mxu0 %vm1406_vm4, %v1330_v15 }
 0x12f   : > { %6334 = vmatmul.mubr.msk.f32.gmra.mrb[88].mxu0 %vm1406_vm4, %v1331_v17  ;;  %v1333_v23 = vmax.f32 %v979_v18, 0.0 }
 0x130   : > { %v1332_v21 = vmax.f32 %v974_v20, 0.0  ;;  %v6205_v22 = vpop.f32.mrb[12].mxu0 }
 0x131   : > { %v989_v24 = vadd.f32 %v6205_v22, %v7785_v50  ;;  %v983_v25 = vpop.f32.mrb[13].mxu0 }
 0x132   : > { %v984_v26 = vadd.f32 %v7785_v50, %v983_v25  ;;  %6336 = vmatprep.mubr.msk.f32.mxu0 %vm1406_vm4, %v1332_v21 }
 0x133   : > { %6337 = vmatmul.mubr.msk.f32.gmra.mrb[90].mxu0 %vm1406_vm4, %v1333_v23  ;;  %v1335_v29 = vmax.f32 %v989_v24, 0.0 }
 0x134   : > { %v1334_v27 = vmax.f32 %v984_v26, 0.0  ;;  %v6208_v28 = vpop.f32.mrb[14].mxu0 }
 0x135   : > { %v999_v30 = vadd.f32 %v6208_v28, %v7785_v50  ;;  %v993_v31 = vpop.f32.mrb[15].mxu0 }
 0x136   : > { %v994_v32 = vadd.f32 %v7785_v50, %v993_v31  ;;  %6339 = vmatprep.mubr.msk.f32.mxu0 %vm1406_vm4, %v1334_v27 }
 0x137   : > { %6340 = vmatmul.mubr.msk.f32.gmra.mrb[92].mxu0 %vm1406_vm4, %v1335_v29  ;;  %v1337_v35 = vmax.f32 %v999_v30, 0.0 }
 0x138   : > { %v1336_v33 = vmax.f32 %v994_v32, 0.0  ;;  %v6211_v34 = vpop.f32.mrb[16].mxu0 }
 0x139   : > { %v1009_v37 = vadd.f32 %v6211_v34, %v7785_v50  ;;  %v1003_v38 = vpop.f32.mrb[17].mxu0 }
 0x13a   : > { %v1004_v39 = vadd.f32 %v7785_v50, %v1003_v38  ;;  %6342 = vmatprep.mubr.msk.f32.mxu0 %vm1406_vm4, %v1336_v33 }
 0x13b   : > { %6343 = vmatmul.mubr.msk.f32.gmra.mrb[94].mxu0 %vm1406_vm4, %v1337_v35  ;;  %v1339_v42 = vmax.f32 %v1009_v37, 0.0 }
 0x13c   : > { %v1338_v40 = vmax.f32 %v1004_v39, 0.0  ;;  %v6214_v41 = vpop.f32.mrb[18].mxu0 }
 0x13d   : > { %v1019_v43 = vadd.f32 %v6214_v41, %v7785_v50  ;;  %v1013_v44 = vpop.f32.mrb[19].mxu0 }
 0x13e   : > { %v1014_v45 = vadd.f32 %v7785_v50, %v1013_v44  ;;  %6345 = vmatprep.mubr.msk.f32.mxu0 %vm1406_vm4, %v1338_v40 }
 0x13f   : > { %6346 = vmatmul.mubr.msk.f32.gmra.mrb[96].mxu0 %vm1406_vm4, %v1339_v42  ;;  %v1341_v51 = vmax.f32 %v1019_v43, 0.0 }
 0x140   : > { %v1340_v48 = vmax.f32 %v1014_v45, 0.0  ;;  %v6217_v49 = vpop.f32.mrb[20].mxu0 }
 0x141   : > { %v1029_v52 = vadd.f32 %v6217_v49, %v7785_v50  ;;  %v1023_v53 = vpop.f32.mrb[21].mxu0 }
 0x142   : > { %v1024_v55 = vadd.f32 %v7785_v50, %v1023_v53  ;;  %6348 = vmatprep.mubr.msk.f32.mxu1 %vm1406_vm4, %v1340_v48 }
 0x143   : > { %6349 = vmatmul.mubr.msk.f32.vlgmr.msra.gmra.mrb[0].mxu1 %vm1406_vm4, %v1341_v51  ;;  %v1343_v58 = vmax.f32 %v1029_v52, 0.0 }
 0x144   : > { %v1342_v56 = vmax.f32 %v1024_v55, 0.0  ;;  %6724 = vmatpush3.bf16.msra.mxu1 %v7752_v36  ;;  %v6220_v57 = vpop.f32.mrb[22].mxu0 }
 0x145   : > { %v1039_v59 = vadd.f32 %v6220_v57, %v7785_v50  ;;  %v1033_v60 = vpop.f32.mrb[23].mxu0  ;;  %6726 = vmatprep.subr.bf16.mxu1 %v7832_v54 }
 0x146   : > { %v1034_v61 = vadd.f32 %v7785_v50, %v1033_v60  ;;  %6351 = vmatprep.mubr.msk.f32.mxu1 %vm1406_vm4, %v1342_v56 }
 0x147   : > { %6352 = vmatmul.mubr.msk.f32.gmra.mrb[2].mxu1 %vm1406_vm4, %v1343_v58  ;;  %v1345_v0 = vmax.f32 %v1039_v59, 0.0 }
 0x148   : > { %v1344_v62 = vmax.f32 %v1034_v61, 0.0  ;;  %v6223_v63 = vpop.f32.mrb[24].mxu0  ;;  %6728 = vmatpush3.bf16.msra.mxu1 %v7832_v54 }
 0x149   : > { %v1049_v1 = vadd.f32 %v6223_v63, %v7785_v50  ;;  %v1043_v2 = vpop.f32.mrb[25].mxu0  ;;  %6730 = vmatprep.subr.bf16.mxu1 %v7752_v36 }
 0x14a   : > { %v1044_v3 = vadd.f32 %v7785_v50, %v1043_v2  ;;  %6354 = vmatprep.mubr.msk.f32.mxu1 %vm1406_vm4, %v1344_v62 }
 0x14b   : > { %6355 = vmatmul.mubr.msk.f32.gmra.mrb[4].mxu1 %vm1406_vm4, %v1345_v0  ;;  %v1347_v6 = vmax.f32 %v1049_v1, 0.0 }
 0x14c   : > { %v1346_v4 = vmax.f32 %v1044_v3, 0.0  ;;  %v6226_v5 = vpop.f32.mrb[26].mxu0 }
 0x14d   : > { %v1059_v7 = vadd.f32 %v6226_v5, %v7785_v50  ;;  %v1053_v8 = vpop.f32.mrb[27].mxu0 }
 0x14e   : > { %v1054_v9 = vadd.f32 %v7785_v50, %v1053_v8  ;;  %6357 = vmatprep.mubr.msk.f32.mxu1 %vm1406_vm4, %v1346_v4 }
 0x14f   : > { %6358 = vmatmul.mubr.msk.f32.gmra.mrb[6].mxu1 %vm1406_vm4, %v1347_v6  ;;  %v1349_v12 = vmax.f32 %v1059_v7, 0.0 }
 0x150   : > { %v1348_v10 = vmax.f32 %v1054_v9, 0.0  ;;  %v6229_v11 = vpop.f32.mrb[28].mxu0 }
 0x151   : > { %v1069_v13 = vadd.f32 %v6229_v11, %v7785_v50  ;;  %v1063_v14 = vpop.f32.mrb[29].mxu0 }
 0x152   : > { %v1064_v15 = vadd.f32 %v7785_v50, %v1063_v14  ;;  %6360 = vmatprep.mubr.msk.f32.mxu1 %vm1406_vm4, %v1348_v10 }
 0x153   : > { %6361 = vmatmul.mubr.msk.f32.gmra.mrb[8].mxu1 %vm1406_vm4, %v1349_v12  ;;  %v1351_v18 = vmax.f32 %v1069_v13, 0.0 }
 0x154   : > { %v1350_v16 = vmax.f32 %v1064_v15, 0.0  ;;  %v6232_v17 = vpop.f32.mrb[30].mxu0 }
 0x155   : > { %v1079_v19 = vadd.f32 %v6232_v17, %v7785_v50  ;;  %v1073_v20 = vpop.f32.mrb[31].mxu0 }
 0x156   : > { %v1074_v21 = vadd.f32 %v7785_v50, %v1073_v20  ;;  %6363 = vmatprep.mubr.msk.f32.mxu1 %vm1406_vm4, %v1350_v16 }
 0x157   : > { %6364 = vmatmul.mubr.msk.f32.gmra.mrb[10].mxu1 %vm1406_vm4, %v1351_v18  ;;  %v1353_v24 = vmax.f32 %v1079_v19, 0.0 }
 0x158   : > { %v1352_v22 = vmax.f32 %v1074_v21, 0.0  ;;  %v6235_v23 = vpop.f32.mrb[32].mxu0 }
 0x159   : > { %v1089_v25 = vadd.f32 %v6235_v23, %v7785_v50  ;;  %v1083_v26 = vpop.f32.mrb[33].mxu0 }
 0x15a   : > { %v1084_v27 = vadd.f32 %v7785_v50, %v1083_v26  ;;  %6366 = vmatprep.mubr.msk.f32.mxu1 %vm1406_vm4, %v1352_v22 }
 0x15b   : > { %6367 = vmatmul.mubr.msk.f32.gmra.mrb[12].mxu1 %vm1406_vm4, %v1353_v24  ;;  %v1355_v30 = vmax.f32 %v1089_v25, 0.0 }
 0x15c   : > { %v1354_v28 = vmax.f32 %v1084_v27, 0.0  ;;  %v6238_v29 = vpop.f32.mrb[34].mxu0 }
 0x15d   : > { %v1099_v31 = vadd.f32 %v6238_v29, %v7785_v50  ;;  %v1093_v32 = vpop.f32.mrb[35].mxu0 }
 0x15e   : > { %v1094_v33 = vadd.f32 %v7785_v50, %v1093_v32  ;;  %6369 = vmatprep.mubr.msk.f32.mxu1 %vm1406_vm4, %v1354_v28 }
 0x15f   : > { %6370 = vmatmul.mubr.msk.f32.gmra.mrb[14].mxu1 %vm1406_vm4, %v1355_v30  ;;  %v1357_v37 = vmax.f32 %v1099_v31, 0.0 }
 0x160   : > { %v1356_v34 = vmax.f32 %v1094_v33, 0.0  ;;  %v6241_v35 = vpop.f32.mrb[36].mxu0 }
 0x161   : > { %v1109_v38 = vadd.f32 %v6241_v35, %v7785_v50  ;;  %v1103_v39 = vpop.f32.mrb[37].mxu0 }
 0x162   : > { %v1104_v40 = vadd.f32 %v7785_v50, %v1103_v39  ;;  %6372 = vmatprep.mubr.msk.f32.mxu1 %vm1406_vm4, %v1356_v34 }
 0x163   : > { %6373 = vmatmul.mubr.msk.f32.gmra.mrb[16].mxu1 %vm1406_vm4, %v1357_v37  ;;  %v1359_v43 = vmax.f32 %v1109_v38, 0.0 }
 0x164   : > { %v1358_v41 = vmax.f32 %v1104_v40, 0.0  ;;  %v6244_v42 = vpop.f32.mrb[38].mxu0 }
 0x165   : > { %v1119_v44 = vadd.f32 %v6244_v42, %v7785_v50  ;;  %v1113_v45 = vpop.f32.mrb[39].mxu0 }
 0x166   : > { %v1114_v46 = vadd.f32 %v7785_v50, %v1113_v45  ;;  %6375 = vmatprep.mubr.msk.f32.mxu1 %vm1406_vm4, %v1358_v41 }
 0x167   : > { %6376 = vmatmul.mubr.msk.f32.gmra.mrb[18].mxu1 %vm1406_vm4, %v1359_v43  ;;  %v1361_v49 = vmax.f32 %v1119_v44, 0.0 }
 0x168   : > { %v1360_v47 = vmax.f32 %v1114_v46, 0.0  ;;  %v6247_v48 = vpop.f32.mrb[40].mxu0 }
 0x169   : > { %v1129_v51 = vadd.f32 %v6247_v48, %v7785_v50  ;;  %v1123_v52 = vpop.f32.mrb[41].mxu0 }
 0x16a   : > { %v1124_v53 = vadd.f32 %v7785_v50, %v1123_v52  ;;  %6378 = vmatprep.mubr.msk.f32.mxu1 %vm1406_vm4, %v1360_v47 }
 0x16b   : > { %6379 = vmatmul.mubr.msk.f32.gmra.mrb[20].mxu1 %vm1406_vm4, %v1361_v49  ;;  %v1363_v57 = vmax.f32 %v1129_v51, 0.0 }
 0x16c   : > { %v1362_v55 = vmax.f32 %v1124_v53, 0.0  ;;  %v6250_v56 = vpop.f32.mrb[42].mxu0 }
 0x16d   : > { %v1139_v58 = vadd.f32 %v6250_v56, %v7785_v50  ;;  %v1133_v59 = vpop.f32.mrb[43].mxu0 }
 0x16e   : > { %v1134_v60 = vadd.f32 %v7785_v50, %v1133_v59  ;;  %6381 = vmatprep.mubr.msk.f32.mxu1 %vm1406_vm4, %v1362_v55 }
 0x16f   : > { %6382 = vmatmul.mubr.msk.f32.gmra.mrb[22].mxu1 %vm1406_vm4, %v1363_v57  ;;  %v1365_v63 = vmax.f32 %v1139_v58, 0.0 }
 0x170   : > { %v1364_v61 = vmax.f32 %v1134_v60, 0.0  ;;  %v6253_v62 = vpop.f32.mrb[44].mxu0 }
 0x171   : > { %v1149_v0 = vadd.f32 %v6253_v62, %v7785_v50  ;;  %v1143_v1 = vpop.f32.mrb[45].mxu0 }
 0x172   : > { %v1144_v2 = vadd.f32 %v7785_v50, %v1143_v1  ;;  %6384 = vmatprep.mubr.msk.f32.mxu1 %vm1406_vm4, %v1364_v61 }
 0x173   : > { %6385 = vmatmul.mubr.msk.f32.gmra.mrb[24].mxu1 %vm1406_vm4, %v1365_v63  ;;  %v1367_v5 = vmax.f32 %v1149_v0, 0.0 }
 0x174   : > { %v1366_v3 = vmax.f32 %v1144_v2, 0.0  ;;  %v6256_v4 = vpop.f32.mrb[46].mxu0 }
 0x175   : > { %v1159_v6 = vadd.f32 %v6256_v4, %v7785_v50  ;;  %v1153_v7 = vpop.f32.mrb[47].mxu0 }
 0x176   : > { %v1154_v8 = vadd.f32 %v7785_v50, %v1153_v7  ;;  %6387 = vmatprep.mubr.msk.f32.mxu1 %vm1406_vm4, %v1366_v3 }
 0x177   : > { %6388 = vmatmul.mubr.msk.f32.gmra.mrb[26].mxu1 %vm1406_vm4, %v1367_v5  ;;  %v1369_v11 = vmax.f32 %v1159_v6, 0.0 }
 0x178   : > { %v1368_v9 = vmax.f32 %v1154_v8, 0.0  ;;  %v6259_v10 = vpop.f32.mrb[48].mxu0 }
 0x179   : > { %v1169_v12 = vadd.f32 %v6259_v10, %v7785_v50  ;;  %v1163_v13 = vpop.f32.mrb[49].mxu0 }
 0x17a   : > { %v1164_v14 = vadd.f32 %v7785_v50, %v1163_v13  ;;  %6390 = vmatprep.mubr.msk.f32.mxu1 %vm1406_vm4, %v1368_v9 }
 0x17b   : > { %6391 = vmatmul.mubr.msk.f32.gmra.mrb[28].mxu1 %vm1406_vm4, %v1369_v11  ;;  %v1371_v17 = vmax.f32 %v1169_v12, 0.0 }
 0x17c   : > { %v1370_v15 = vmax.f32 %v1164_v14, 0.0  ;;  %v6262_v16 = vpop.f32.mrb[50].mxu0 }
 0x17d   : > { %v1179_v18 = vadd.f32 %v6262_v16, %v7785_v50  ;;  %v1173_v19 = vpop.f32.mrb[51].mxu0 }
 0x17e   : > { %v1174_v20 = vadd.f32 %v7785_v50, %v1173_v19  ;;  %6393 = vmatprep.mubr.msk.f32.mxu1 %vm1406_vm4, %v1370_v15 }
 0x17f   : > { %6394 = vmatmul.mubr.msk.f32.gmra.mrb[30].mxu1 %vm1406_vm4, %v1371_v17  ;;  %v1373_v23 = vmax.f32 %v1179_v18, 0.0 }
 0x180   : > { %v1372_v21 = vmax.f32 %v1174_v20, 0.0  ;;  %v6265_v22 = vpop.f32.mrb[52].mxu0 }
 0x181   : > { %v1189_v24 = vadd.f32 %v6265_v22, %v7785_v50  ;;  %v1183_v25 = vpop.f32.mrb[53].mxu0 }
 0x182   : > { %v1184_v26 = vadd.f32 %v7785_v50, %v1183_v25  ;;  %6396 = vmatprep.mubr.msk.f32.mxu1 %vm1406_vm4, %v1372_v21 }
 0x183   : > { %6397 = vmatmul.mubr.msk.f32.gmra.mrb[32].mxu1 %vm1406_vm4, %v1373_v23  ;;  %v1375_v29 = vmax.f32 %v1189_v24, 0.0 }
 0x184   : > { %v1374_v27 = vmax.f32 %v1184_v26, 0.0  ;;  %v6268_v28 = vpop.f32.mrb[54].mxu0 }
 0x185   : > { %v1199_v30 = vadd.f32 %v6268_v28, %v7785_v50  ;;  %v1193_v31 = vpop.f32.mrb[55].mxu0 }
 0x186   : > { %v1194_v32 = vadd.f32 %v7785_v50, %v1193_v31  ;;  %6399 = vmatprep.mubr.msk.f32.mxu1 %vm1406_vm4, %v1374_v27 }
 0x187   : > { %6400 = vmatmul.mubr.msk.f32.gmra.mrb[34].mxu1 %vm1406_vm4, %v1375_v29  ;;  %v1377_v35 = vmax.f32 %v1199_v30, 0.0 }
 0x188   : > { %v1376_v33 = vmax.f32 %v1194_v32, 0.0  ;;  %v6271_v34 = vpop.f32.mrb[56].mxu0 }
 0x189   : > { %v1209_v37 = vadd.f32 %v6271_v34, %v7785_v50  ;;  %v1203_v38 = vpop.f32.mrb[57].mxu0 }
 0x18a   : > { %v1204_v39 = vadd.f32 %v7785_v50, %v1203_v38  ;;  %6402 = vmatprep.mubr.msk.f32.mxu1 %vm1406_vm4, %v1376_v33 }
 0x18b   : > { %6403 = vmatmul.mubr.msk.f32.gmra.mrb[36].mxu1 %vm1406_vm4, %v1377_v35  ;;  %v1379_v42 = vmax.f32 %v1209_v37, 0.0 }
 0x18c   : > { %v1378_v40 = vmax.f32 %v1204_v39, 0.0  ;;  %v6274_v41 = vpop.f32.mrb[58].mxu0 }
 0x18d   : > { %v1219_v43 = vadd.f32 %v6274_v41, %v7785_v50  ;;  %v1213_v44 = vpop.f32.mrb[59].mxu0 }
 0x18e   : > { %v1214_v45 = vadd.f32 %v7785_v50, %v1213_v44  ;;  %6405 = vmatprep.mubr.msk.f32.mxu1 %vm1406_vm4, %v1378_v40 }
 0x18f   : > { %6406 = vmatmul.mubr.msk.f32.gmra.mrb[38].mxu1 %vm1406_vm4, %v1379_v42  ;;  %v1381_v48 = vmax.f32 %v1219_v43, 0.0 }
 0x190   : > { %v1380_v46 = vmax.f32 %v1214_v45, 0.0  ;;  %v6277_v47 = vpop.f32.mrb[60].mxu0 }
 0x191   : > { %v1229_v49 = vadd.f32 %v6277_v47, %v7785_v50  ;;  %v1223_v51 = vpop.f32.mrb[61].mxu0  ;;  %v7362_v47 = vmov 0.0  }
 0x192   : > { %v1224_v52 = vadd.f32 %v7785_v50, %v1223_v51  ;;  %6408 = vmatprep.mubr.msk.f32.mxu1 %vm1406_vm4, %v1380_v46 }
 0x193   : > { %6409 = vmatmul.mubr.msk.f32.gmra.mrb[40].mxu1 %vm1406_vm4, %v1381_v48  ;;  %v1383_v56 = vmax.f32 %v1229_v49, 0.0 }
 0x194   : > { %v1382_v53 = vmax.f32 %v1224_v52, 0.0  ;;  %v6280_v55 = vpop.f32.mrb[62].mxu0 }
 0x195   : > { %v1239_v57 = vadd.f32 %v6280_v55, %v7785_v50  ;;  %v1233_v58 = vpop.f32.mrb[63].mxu0 }
 0x196   : > { %v1234_v59 = vadd.f32 %v7785_v50, %v1233_v58  ;;  %6411 = vmatprep.mubr.msk.f32.mxu1 %vm1406_vm4, %v1382_v53 }
 0x197   : > { %6412 = vmatmul.mubr.msk.f32.gmra.mrb[42].mxu1 %vm1406_vm4, %v1383_v56  ;;  %v1385_v62 = vmax.f32 %v1239_v57, 0.0 }
 0x198   : > { %v1384_v60 = vmax.f32 %v1234_v59, 0.0  ;;  %v6283_v61 = vpop.f32.mrb[64].mxu0 }
 0x199   : > { %v1249_v63 = vadd.f32 %v6283_v61, %v7785_v50  ;;  %v1243_v0 = vpop.f32.mrb[65].mxu0 }
 0x19a   : > { %v1244_v1 = vadd.f32 %v7785_v50, %v1243_v0  ;;  %6414 = vmatprep.mubr.msk.f32.mxu1 %vm1406_vm4, %v1384_v60 }
 0x19b   : > { %6415 = vmatmul.mubr.msk.f32.gmra.mrb[44].mxu1 %vm1406_vm4, %v1385_v62  ;;  %v1387_v4 = vmax.f32 %v1249_v63, 0.0 }
 0x19c   : > { %v1386_v2 = vmax.f32 %v1244_v1, 0.0  ;;  %v6286_v3 = vpop.f32.mrb[66].mxu0 }
 0x19d   : > { %v1259_v5 = vadd.f32 %v6286_v3, %v7785_v50  ;;  %v1253_v6 = vpop.f32.mrb[67].mxu0  ;;  %v7976_v3 = vld [vmem:[%s9333_s1 + $0xd9] ss:$0 sm:$0xff] }
 0x19e   : > { %v1254_v7 = vadd.f32 %v7785_v50, %v1253_v6  ;;  %6417 = vmatprep.mubr.msk.f32.mxu1 %vm1406_vm4, %v1386_v2 }
 0x19f   : > { %6418 = vmatmul.mubr.msk.f32.gmra.mrb[46].mxu1 %vm1406_vm4, %v1387_v4  ;;  %v1389_v10 = vmax.f32 %v1259_v5, 0.0 }
 0x1a0   : > { %v1388_v8 = vmax.f32 %v1254_v7, 0.0  ;;  %v6289_v9 = vpop.f32.mrb[68].mxu0 }
 0x1a1   : > { %v1269_v11 = vadd.f32 %v6289_v9, %v7785_v50  ;;  %v1263_v12 = vpop.f32.mrb[69].mxu0 }
 0x1a2   : > { %v1264_v13 = vadd.f32 %v7785_v50, %v1263_v12  ;;  %6420 = vmatprep.mubr.msk.f32.mxu1 %vm1406_vm4, %v1388_v8 }
 0x1a3   : > { %6421 = vmatmul.mubr.msk.f32.gmra.mrb[48].mxu1 %vm1406_vm4, %v1389_v10  ;;  %v1391_v16 = vmax.f32 %v1269_v11, 0.0 }
 0x1a4   : > { %v1390_v14 = vmax.f32 %v1264_v13, 0.0  ;;  %v6292_v15 = vpop.f32.mrb[70].mxu0 }
 0x1a5   : > { %v1279_v17 = vadd.f32 %v6292_v15, %v7785_v50  ;;  %v1273_v18 = vpop.f32.mrb[71].mxu0 }
 0x1a6   : > { %v1274_v19 = vadd.f32 %v7785_v50, %v1273_v18  ;;  %6423 = vmatprep.mubr.msk.f32.mxu1 %vm1406_vm4, %v1390_v14 }
 0x1a7   : > { %6424 = vmatmul.mubr.msk.f32.gmra.mrb[50].mxu1 %vm1406_vm4, %v1391_v16  ;;  %v1393_v22 = vmax.f32 %v1279_v17, 0.0 }
 0x1a8   : > { %v1392_v20 = vmax.f32 %v1274_v19, 0.0  ;;  %v6295_v21 = vpop.f32.mrb[72].mxu0 }
 0x1a9   : > { %v1289_v23 = vadd.f32 %v6295_v21, %v7785_v50  ;;  %v1283_v24 = vpop.f32.mrb[73].mxu0 }
 0x1aa   : > { %v1284_v25 = vadd.f32 %v7785_v50, %v1283_v24  ;;  %6426 = vmatprep.mubr.msk.f32.mxu1 %vm1406_vm4, %v1392_v20 }
 0x1ab   : > { %6427 = vmatmul.mubr.msk.f32.gmra.mrb[52].mxu1 %vm1406_vm4, %v1393_v22  ;;  %v1395_v28 = vmax.f32 %v1289_v23, 0.0 }
 0x1ac   : > { %v1394_v26 = vmax.f32 %v1284_v25, 0.0  ;;  %v6298_v27 = vpop.f32.mrb[74].mxu0 }
 0x1ad   : > { %v1299_v29 = vadd.f32 %v6298_v27, %v7785_v50  ;;  %v1293_v30 = vpop.f32.mrb[75].mxu0 }
 0x1ae   : > { %v1294_v31 = vadd.f32 %v7785_v50, %v1293_v30  ;;  %6429 = vmatprep.mubr.msk.f32.mxu1 %vm1406_vm4, %v1394_v26 }
 0x1af   : > { %6430 = vmatmul.mubr.msk.f32.gmra.mrb[54].mxu1 %vm1406_vm4, %v1395_v28  ;;  %v1397_v34 = vmax.f32 %v1299_v29, 0.0 }
 0x1b0   : > { %v1396_v32 = vmax.f32 %v1294_v31, 0.0  ;;  %v6301_v33 = vpop.f32.mrb[76].mxu0 }
 0x1b1   : > { %v1309_v35 = vadd.f32 %v6301_v33, %v7785_v50  ;;  %v1303_v37 = vpop.f32.mrb[77].mxu0 }
 0x1b2   : > { %v1304_v38 = vadd.f32 %v7785_v50, %v1303_v37  ;;  %6432 = vmatprep.mubr.msk.f32.mxu1 %vm1406_vm4, %v1396_v32 }
 0x1b3   : > { %6433 = vmatmul.mubr.msk.f32.gmra.mrb[56].mxu1 %vm1406_vm4, %v1397_v34  ;;  %v1399_v41 = vmax.f32 %v1309_v35, 0.0 }
 0x1b4   : > { %v1398_v39 = vmax.f32 %v1304_v38, 0.0  ;;  %v6304_v40 = vpop.f32.mrb[78].mxu0 }
 0x1b5   : > { %v1319_v42 = vadd.f32 %v6304_v40, %v7785_v50  ;;  %v1313_v43 = vpop.f32.mrb[79].mxu0 }
 0x1b6   : > { %v1314_v44 = vadd.f32 %v7785_v50, %v1313_v43  ;;  %6435 = vmatprep.mubr.msk.f32.mxu1 %vm1406_vm4, %v1398_v39 }
 0x1b7   : > { %6436 = vmatmul.mubr.msk.f32.gmra.mrb[58].mxu1 %vm1406_vm4, %v1399_v41  ;;  %v1401_v46 = vmax.f32 %v1319_v42, 0.0 }
 0x1b8   : > { %v1400_v45 = vmax.f32 %v1314_v44, 0.0 }
 0x1ba   : > { %6438 = vmatprep.mubr.msk.f32.mxu1 %vm1406_vm4, %v1400_v45 }
 0x1bb   : > { %6439 = vmatmul.mubr.msk.f32.gmra.mrb[60].mxu1 %vm1406_vm4, %v1401_v46 }
 0x1bc   : > { %6449 = vmatprep.mubr.f32.mxu1 %v7362_v47 }
 0x1bf   : > { %6450 = vmatmul.mubr.f32.vlgmr.msra.gmra.mrb[62].mxu1 %v7362_v47 }
 0x1c0   : > { %6452 = vmatprep.mubr.f32.mxu1 %v7362_v47  ;;  %6732 = vmatpush3.bf16.msra.mxu1 %v7752_v36 }
 0x1c1   : > { %6734 = vmatprep.subr.bf16.mxu1 %v7832_v54 }
 0x1c3   : > { %6453 = vmatmul.mubr.f32.gmra.mrb[64].mxu1 %v7362_v47 }
 0x1c4   : > { %6455 = vmatprep.mubr.f32.mxu1 %v7362_v47  ;;  %6736 = vmatpush3.bf16.msra.mxu1 %v7832_v54 }
 0x1c5   : > { %6738 = vmatprep.subr.bf16.mxu1 %v7752_v36 }
 0x1c7   : > { %6456 = vmatmul.mubr.f32.gmra.mrb[66].mxu1 %v7362_v47 }
 0x1c8   : > { %6458 = vmatprep.mubr.f32.mxu1 %v7362_v47 }
 0x1cb   : > { %6459 = vmatmul.mubr.f32.gmra.mrb[68].mxu1 %v7362_v47 }
 0x1cc   : > { %6461 = vmatprep.mubr.f32.mxu1 %v7362_v47 }
 0x1cf   : > { %6462 = vmatmul.mubr.f32.gmra.mrb[70].mxu1 %v7362_v47 }
 0x1d0   : > { %6464 = vmatprep.mubr.f32.mxu1 %v7362_v47 }
 0x1d3   : > { %6465 = vmatmul.mubr.f32.gmra.mrb[72].mxu1 %v7362_v47 }
 0x1d4   : > { %6467 = vmatprep.mubr.f32.mxu1 %v7362_v47 }
 0x1d7   : > { %6468 = vmatmul.mubr.f32.gmra.mrb[74].mxu1 %v7362_v47 }
 0x1d8   : > { %6470 = vmatprep.mubr.f32.mxu1 %v7362_v47 }
 0x1db   : > { %6471 = vmatmul.mubr.f32.gmra.mrb[76].mxu1 %v7362_v47 }
 0x1f2   : > { %v6323_v50 = vpop.f32.mrb[80].mxu0 }
 0x1f3   : > { %v1713_v48 = vpop.f32.mrb[81].mxu0  ;;  %v1719_v4 = vadd.f32 %v6323_v50, %v7976_v3 }
 0x1f4   : > { %v1714_v5 = vadd.f32 %v7976_v3, %v1713_v48 }
 0x1f6   : > { %v6326_v49 = vpop.f32.mrb[82].mxu0 }
 0x1f7   : > { %v1723_v51 = vpop.f32.mrb[83].mxu0  ;;  %v1729_v10 = vadd.f32 %v6326_v49, %v7976_v3 }
 0x1f8   : > { %v1724_v11 = vadd.f32 %v7976_v3, %v1723_v51 }
 0x1fa   : > { %v6329_v52 = vpop.f32.mrb[84].mxu0 }
 0x1fb   : > { %v1733_v53 = vpop.f32.mrb[85].mxu0  ;;  %v1739_v16 = vadd.f32 %v6329_v52, %v7976_v3 }
 0x1fc   : > { %v1734_v17 = vadd.f32 %v7976_v3, %v1733_v53 }
 0x1fe   : > { %v6332_v55 = vpop.f32.mrb[86].mxu0 }
 0x1ff   : > { %v1743_v56 = vpop.f32.mrb[87].mxu0  ;;  %v1749_v22 = vadd.f32 %v6332_v55, %v7976_v3 }
 0x200   : > { %v1744_v23 = vadd.f32 %v7976_v3, %v1743_v56 }
 0x202   : > { %v6335_v57 = vpop.f32.mrb[88].mxu0 }
 0x203   : > { %v1753_v58 = vpop.f32.mrb[89].mxu0  ;;  %v1759_v29 = vadd.f32 %v6335_v57, %v7976_v3 }
 0x204   : > { %v1754_v30 = vadd.f32 %v7976_v3, %v1753_v58 }
 0x206   : > { %v6338_v59 = vpop.f32.mrb[90].mxu0 }
 0x207   : > { %v1763_v60 = vpop.f32.mrb[91].mxu0  ;;  %v1769_v38 = vadd.f32 %v6338_v59, %v7976_v3 }
 0x208   : > { %v1764_v39 = vadd.f32 %v7976_v3, %v1763_v60 }
 0x20a   : > { %v6341_v61 = vpop.f32.mrb[92].mxu0 }
 0x20b   : > { %v7963_v62 = vpop.f32.mrb[93].mxu0  ;;  %v1779_v46 = vadd.f32 %v6341_v61, %v7976_v3 }
 0x20c   : > { %v1774_v47 = vadd.f32 %v7976_v3, %v7963_v62 }
 0x20e   : > { %v7965_v63 = vpop.f32.mrb[94].mxu0 }
 0x20f   : > { %v7967_v0 = vpop.f32.mrb[95].mxu0  ;;  %v1789_v55 = vadd.f32 %v7965_v63, %v7976_v3 }
 0x210   : > { %v1784_v56 = vadd.f32 %v7976_v3, %v7967_v0 }
 0x212   : > { %v7969_v1 = vpop.f32.mrb[96].mxu0 }
 0x213   : > { %v7971_v2 = vpop.f32.mrb[97].mxu0 }
 0x292   : > { %v6451_v6 = vpop.f32.mrb[62].mxu1 }
 0x293   : > { %v2262_v7 = vadd.f32 %v6451_v6, %v1719_v4  ;;  %v2182_v8 = vpop.f32.mrb[63].mxu1 }
 0x294   : > { %v2261_v9 = vadd.f32 %v2182_v8, %v1714_v5 }
 0x296   : > { %6999 = vtanh.f32 %v2261_v9  ;;  %v6454_v12 = vpop.f32.mrb[64].mxu1 }
 0x297   : > { %v2264_v13 = vadd.f32 %v6454_v12, %v1729_v10  ;;  %v2192_v14 = vpop.f32.mrb[65].mxu1  ;;  %7001 = vtanh.f32 %v2262_v7 }
 0x298   : > { %v2263_v15 = vadd.f32 %v2192_v14, %v1724_v11 }
 0x29a   : > { %7003 = vtanh.f32 %v2263_v15  ;;  %v6457_v18 = vpop.f32.mrb[66].mxu1 }
 0x29b   : > { %v2266_v19 = vadd.f32 %v6457_v18, %v1739_v16  ;;  %v2202_v20 = vpop.f32.mrb[67].mxu1  ;;  %7005 = vtanh.f32 %v2264_v13 }
 0x29c   : > { %v2265_v21 = vadd.f32 %v2202_v20, %v1734_v17 }
 0x29e   : > { %7007 = vtanh.f32 %v2265_v21  ;;  %v6460_v24 = vpop.f32.mrb[68].mxu1 }
 0x29f   : > { %v2268_v25 = vadd.f32 %v6460_v24, %v1749_v22  ;;  %v2212_v26 = vpop.f32.mrb[69].mxu1  ;;  %7009 = vtanh.f32 %v2266_v19 }
 0x2a0   : > { %v7986_v27 = vpop.eup %6999  ;;  %v2267_v28 = vadd.f32 %v2212_v26, %v1744_v23 }
 0x2a1   : > { %2357 = vrot.lane.b32.xlu0 %v7986_v27, %s7363_s9  ;;  %v7002_v32 = vpop.eup %7001  ;;  %v2293_v9 = vadd.f32 1.0, %v7986_v27 }
 0x2a2   : > { %7011 = vtanh.f32 %v2267_v28  ;;  %v6463_v31 = vpop.f32.mrb[70].mxu1  ;;  %v2294_v12 = vadd.f32 1.0, %v7002_v32 }
 0x2a3   : > { %v2270_v33 = vadd.f32 %v6463_v31, %v1759_v29  ;;  %v2222_v34 = vpop.f32.mrb[71].mxu1  ;;  %7013 = vtanh.f32 %v2268_v25  ;;  %v8026_v10 = vmul.f32 0.5, %v2293_v9 }
 0x2a4   : > { %v7004_v35 = vpop.eup %7003  ;;  %v2269_v37 = vadd.f32 %v2222_v34, %v1754_v30  ;;  %v8032_v16 = vmul.f32 0.5, %v2294_v12 }
 0x2a5   : > { %2361 = vrot.lane.b32.xlu1 %v7004_v35, %s7363_s9  ;;  %2359 = vrot.lane.b32.xlu0 %v7002_v32, %s7363_s9  ;;  %v7006_v41 = vpop.eup %7005  ;;  %v2295_v11 = vadd.f32 1.0, %v7004_v35 }
 0x2a6   : > { %7015 = vtanh.f32 %v2269_v37  ;;  %v6466_v40 = vpop.f32.mrb[72].mxu1  ;;  %v2296_v17 = vadd.f32 1.0, %v7006_v41 }
 0x2a7   : > { %v2272_v42 = vadd.f32 %v6466_v40, %v1769_v38  ;;  %v2232_v43 = vpop.f32.mrb[73].mxu1  ;;  %7017 = vtanh.f32 %v2270_v33  ;;  %v8030_v15 = vmul.f32 0.5, %v2295_v11 }
 0x2a8   : > { %v7008_v44 = vpop.eup %7007  ;;  %v2271_v45 = vadd.f32 %v2232_v43, %v1764_v39  ;;  %v8038_v23 = vmul.f32 0.5, %v2296_v17 }
 0x2a9   : > { %2363 = vrot.lane.b32.xlu1 %v7006_v41, %s7363_s9  ;;  %2365 = vrot.lane.b32.xlu0 %v7008_v44, %s7363_s9  ;;  %v7010_v48 = vpop.eup %7009  ;;  %v2297_v18 = vadd.f32 1.0, %v7008_v44 }
 0x2aa   : > { %7019 = vtanh.f32 %v2271_v45  ;;  %v6469_v50 = vpop.f32.mrb[74].mxu1  ;;  %v2298_v25 = vadd.f32 1.0, %v7010_v48 }
 0x2ab   : > { %v2274_v49 = vadd.f32 %v6469_v50, %v1779_v46  ;;  %v2242_v51 = vpop.f32.mrb[75].mxu1  ;;  %7021 = vtanh.f32 %v2272_v42  ;;  %v8040_v24 = vmul.f32 0.5, %v2297_v18  ;;  %v2325_v18 = vmul.f32 0.0, %v8026_v10 }
 0x2ac   : > { %v7012_v52 = vpop.eup %7011  ;;  %v2273_v53 = vadd.f32 %v2242_v51, %v1774_v47  ;;  %v8046_v31 = vmul.f32 0.5, %v2298_v25 }
 0x2ad   : > { %2367 = vrot.lane.b32.xlu1 %v7010_v48, %s7363_s9  ;;  %2369 = vrot.lane.b32.xlu0 %v7012_v52, %s7363_s9  ;;  %v7014_v58 = vpop.eup %7013  ;;  %v2299_v26 = vadd.f32 1.0, %v7012_v52 }
 0x2ae   : > { %7023 = vtanh.f32 %v2273_v53  ;;  %v6472_v57 = vpop.f32.mrb[76].mxu1  ;;  %v2300_v33 = vadd.f32 1.0, %v7014_v58 }
 0x2af   : > { %v2276_v59 = vadd.f32 %v6472_v57, %v1789_v55  ;;  %v2252_v60 = vpop.f32.mrb[77].mxu1  ;;  %7025 = vtanh.f32 %v2274_v49  ;;  %v8048_v32 = vmul.f32 0.5, %v2299_v26 }
 0x2b0   : > { %v7016_v61 = vpop.eup %7015  ;;  %v2275_v62 = vadd.f32 %v2252_v60, %v1784_v56  ;;  %v8054_v40 = vmul.f32 0.5, %v2300_v33 }
 0x2b1   : > { %2371 = vrot.lane.b32.xlu1 %v7014_v58, %s7363_s9  ;;  %2373 = vrot.lane.b32.xlu0 %v7016_v61, %s7363_s9  ;;  %v7018_v63 = vpop.eup %7017  ;;  %v2301_v34 = vadd.f32 1.0, %v7016_v61 }
 0x2b2   : > { %7027 = vtanh.f32 %v2275_v62  ;;  %v2302_v42 = vadd.f32 1.0, %v7018_v63 }
 0x2b3   : > { %7029 = vtanh.f32 %v2276_v59  ;;  %v8056_v41 = vmul.f32 0.5, %v2301_v34 }
 0x2b4   : > { %v7020_v4 = vpop.eup %7019  ;;  %v8062_v50 = vmul.f32 0.5, %v2302_v42 }
 0x2b5   : > { %2375 = vrot.lane.b32.xlu1 %v7018_v63, %s7363_s9  ;;  %2377 = vrot.lane.b32.xlu0 %v7020_v4, %s7363_s9  ;;  %v7022_v0 = vpop.eup %7021  ;;  %v2303_v43 = vadd.f32 1.0, %v7020_v4 }
 0x2b6   : > { %v2304_v49 = vadd.f32 1.0, %v7022_v0 }
 0x2b7   : > { %v8064_v48 = vmul.f32 0.5, %v2303_v43 }
 0x2b8   : > { %v7024_v5 = vpop.eup %7023  ;;  %v8070_v57 = vmul.f32 0.5, %v2304_v49 }
 0x2b9   : > { %2379 = vrot.lane.b32.xlu1 %v7022_v0, %s7363_s9  ;;  %2381 = vrot.lane.b32.xlu0 %v7024_v5, %s7363_s9  ;;  %v8013_v6 = vpop.eup %7025  ;;  %v2305_v51 = vadd.f32 1.0, %v7024_v5 }
 0x2ba   : > { %v2306_v59 = vadd.f32 1.0, %v8013_v6 }
 0x2bb   : > { %v8072_v58 = vmul.f32 0.5, %v2305_v51 }
 0x2bc   : > { %v8015_v7 = vpop.eup %7027  ;;  %v8080_v0 = vmul.f32 0.5, %v2306_v59  ;;  %v2334_v59 = vmul.f32 0.0, %v8062_v50 }
 0x2bd   : > { %2383 = vrot.lane.b32.xlu1 %v8013_v6, %s7363_s9  ;;  %2385 = vrot.lane.b32.xlu0 %v8015_v7, %s7363_s9  ;;  %v8021_v8 = vpop.eup %7029  ;;  %v2307_v60 = vadd.f32 1.0, %v8015_v7 }
 0x2be   : > { %v2308_v9 = vadd.f32 1.0, %v8021_v8 }
 0x2bf   : > { %v8082_v5 = vmul.f32 0.5, %v2307_v60  ;;  %v2335_v60 = vmul.f32 0.0, %v8064_v48 }
 0x2c1   : > { %2387 = vrot.lane.b32.xlu1 %v8021_v8, %s7363_s9 }
 0x313   : > { %v2358_v13 = vpop.permute.xlu0 %2357 }
 0x314   : > { %v2405_v14 = vmul.f32 %v2358_v13, %v8026_v10  ;;  %v8089_v13 = vmul.f32 0.5, %v2308_v9 }
 0x316   : > { %2437 = vrot.lane.b32.xlu0 %v2405_v14, %s7363_s9 }
 0x317   : > { %v2362_v19 = vpop.permute.xlu1 %2361  ;;  %v2360_v20 = vpop.permute.xlu0 %2359 }
 0x318   : > { %v2407_v21 = vmul.f32 %v2362_v19, %v8030_v15  ;;  %v2406_v22 = vmul.f32 %v2360_v20, %v8032_v16  ;;  %v2326_v20 = vmul.f32 0.0, %v8032_v16 }
 0x31a   : > { %2439 = vrot.lane.b32.xlu1 %v2406_v22, %s7363_s9  ;;  %2441 = vrot.lane.b32.xlu0 %v2407_v21, %s7363_s9  ;;  %v2327_v21 = vmul.f32 0.0, %v8030_v15 }
 0x31b   : > { %v2364_v27 = vpop.permute.xlu1 %2363  ;;  %v2366_v28 = vpop.permute.xlu0 %2365 }
 0x31c   : > { %v2408_v29 = vmul.f32 %v2364_v27, %v8038_v23  ;;  %v2409_v30 = vmul.f32 %v2366_v28, %v8040_v24  ;;  %v2328_v28 = vmul.f32 0.0, %v8038_v23 }
 0x31e   : > { %2443 = vrot.lane.b32.xlu1 %v2408_v29, %s7363_s9  ;;  %2445 = vrot.lane.b32.xlu0 %v2409_v30, %s7363_s9  ;;  %v2329_v29 = vmul.f32 0.0, %v8040_v24 }
 0x31f   : > { %v2368_v35 = vpop.permute.xlu1 %2367  ;;  %v2370_v37 = vpop.permute.xlu0 %2369 }
 0x320   : > { %v2410_v38 = vmul.f32 %v2368_v35, %v8046_v31  ;;  %v2411_v39 = vmul.f32 %v2370_v37, %v8048_v32  ;;  %v2330_v37 = vmul.f32 0.0, %v8046_v31 }
 0x322   : > { %2447 = vrot.lane.b32.xlu1 %v2410_v38, %s7363_s9  ;;  %2449 = vrot.lane.b32.xlu0 %v2411_v39, %s7363_s9  ;;  %v2331_v38 = vmul.f32 0.0, %v8048_v32 }
 0x323   : > { %v2372_v44 = vpop.permute.xlu1 %2371  ;;  %v2374_v45 = vpop.permute.xlu0 %2373 }
 0x324   : > { %v2412_v46 = vmul.f32 %v2372_v44, %v8054_v40  ;;  %v2413_v47 = vmul.f32 %v2374_v45, %v8056_v41 }
 0x326   : > { %2451 = vrot.lane.b32.xlu1 %v2412_v46, %s7363_s9  ;;  %2453 = vrot.lane.b32.xlu0 %v2413_v47, %s7363_s9  ;;  %v2332_v46 = vmul.f32 0.0, %v8054_v40  ;;  %v2333_v47 = vmul.f32 0.0, %v8056_v41 }
 0x327   : > { %v2376_v52 = vpop.permute.xlu1 %2375  ;;  %v2378_v53 = vpop.permute.xlu0 %2377 }
 0x328   : > { %v2414_v55 = vmul.f32 %v2376_v52, %v8062_v50  ;;  %v2415_v56 = vmul.f32 %v2378_v53, %v8064_v48 }
 0x32a   : > { %2455 = vrot.lane.b32.xlu1 %v2414_v55, %s7363_s9  ;;  %2457 = vrot.lane.b32.xlu0 %v2415_v56, %s7363_s9 }
 0x32b   : > { %v2380_v61 = vpop.permute.xlu1 %2379  ;;  %v2382_v62 = vpop.permute.xlu0 %2381 }
 0x32c   : > { %v2416_v63 = vmul.f32 %v2380_v61, %v8070_v57  ;;  %v2417_v4 = vmul.f32 %v2382_v62, %v8072_v58 }
 0x32e   : > { %2459 = vrot.lane.b32.xlu1 %v2416_v63, %s7363_s9  ;;  %2461 = vrot.lane.b32.xlu0 %v2417_v4, %s7363_s9 }
 0x32f   : > { %v2384_v11 = vpop.permute.xlu1 %2383  ;;  %v2386_v6 = vpop.permute.xlu0 %2385 }
 0x330   : > { %v2418_v7 = vmul.f32 %v2384_v11, %v8080_v0  ;;  %v2419_v12 = vmul.f32 %v2386_v6, %v8082_v5  ;;  %v2336_v6 = vmul.f32 0.0, %v8070_v57 }
 0x332   : > { %2463 = vrot.lane.b32.xlu1 %v2418_v7, %s7363_s9  ;;  %2465 = vrot.lane.b32.xlu0 %v2419_v12, %s7363_s9  ;;  %v2337_v7 = vmul.f32 0.0, %v8072_v58 }
 0x333   : > { %v2388_v14 = vpop.permute.xlu1 %2387 }
 0x334   : > { %v2420_v17 = vmul.f32 %v2388_v14, %v8089_v13 }
 0x336   : > { %2467 = vrot.lane.b32.xlu1 %v2420_v17, %s7363_s9 }
 0x388   : > { %v2438_v8 = vpop.permute.xlu0 %2437 }
 0x389   : > { %v8094_v19 = vadd.f32 %v2438_v8, %v2325_v18 }
 0x38b   : > { %7031 = vtanh.f32 %v8094_v19 }
 0x38c   : > { %v2440_v22 = vpop.permute.xlu1 %2439  ;;  %v2442_v25 = vpop.permute.xlu0 %2441 }
 0x38d   : > { %v8099_v26 = vadd.f32 %v2440_v22, %v2326_v20  ;;  %v8101_v27 = vadd.f32 %v2442_v25, %v2327_v21  ;;  %v2338_v21 = vmul.f32 0.0, %v8080_v0  ;;  %v2339_v22 = vmul.f32 0.0, %v8082_v5 }
 0x38f   : > { %7033 = vtanh.f32 %v8099_v26 }
 0x390   : > { %7035 = vtanh.f32 %v8101_v27  ;;  %v2444_v30 = vpop.permute.xlu1 %2443  ;;  %v2446_v33 = vpop.permute.xlu0 %2445 }
 0x391   : > { %v8107_v34 = vadd.f32 %v2444_v30, %v2328_v28  ;;  %v8109_v35 = vadd.f32 %v2446_v33, %v2329_v29 }
 0x393   : > { %7037 = vtanh.f32 %v8107_v34 }
 0x394   : > { %7039 = vtanh.f32 %v8109_v35  ;;  %v2448_v39 = vpop.permute.xlu1 %2447  ;;  %v2450_v42 = vpop.permute.xlu0 %2449 }
 0x395   : > { %v7032_v43 = vpop.eup %7031  ;;  %v8115_v44 = vadd.f32 %v2448_v39, %v2330_v37  ;;  %v8117_v45 = vadd.f32 %v2450_v42, %v2331_v38  ;;  %v2340_v38 = vmul.f32 0.0, %v8089_v13 }
 0x396   : > { %2533 = vrot.lane.b32.xlu0 %v7032_v43, %s7363_s9 }
 0x397   : > { %7041 = vtanh.f32 %v8115_v44 }
 0x398   : > { %7043 = vtanh.f32 %v8117_v45  ;;  %v2452_v49 = vpop.permute.xlu1 %2451  ;;  %v2454_v51 = vpop.permute.xlu0 %2453 }
 0x399   : > { %v7034_v52 = vpop.eup %7033  ;;  %v8124_v53 = vadd.f32 %v2452_v49, %v2332_v46  ;;  %v8126_v55 = vadd.f32 %v2454_v51, %v2333_v47 }
 0x39a   : > { %v7036_v56 = vpop.eup %7035  ;;  %2535 = vrot.lane.b32.xlu1 %v7034_v52, %s7363_s9 }
 0x39b   : > { %7045 = vtanh.f32 %v8124_v53  ;;  %2537 = vrot.lane.b32.xlu0 %v7036_v56, %s7363_s9 }
 0x39c   : > { %7047 = vtanh.f32 %v8126_v55  ;;  %v2456_v61 = vpop.permute.xlu1 %2455  ;;  %v2458_v62 = vpop.permute.xlu0 %2457 }
 0x39d   : > { %v7038_v63 = vpop.eup %7037  ;;  %v8134_v4 = vadd.f32 %v2456_v61, %v2334_v59  ;;  %v8136_v9 = vadd.f32 %v2458_v62, %v2335_v60 }
 0x39e   : > { %v7040_v11 = vpop.eup %7039  ;;  %2539 = vrot.lane.b32.xlu1 %v7038_v63, %s7363_s9 }
 0x39f   : > { %7049 = vtanh.f32 %v8134_v4  ;;  %2541 = vrot.lane.b32.xlu0 %v7040_v11, %s7363_s9 }
 0x3a0   : > { %7051 = vtanh.f32 %v8136_v9  ;;  %v2460_v12 = vpop.permute.xlu1 %2459  ;;  %v2462_v14 = vpop.permute.xlu0 %2461 }
 0x3a1   : > { %v7042_v17 = vpop.eup %7041  ;;  %v8144_v18 = vadd.f32 %v2460_v12, %v2336_v6  ;;  %v8146_v8 = vadd.f32 %v2462_v14, %v2337_v7 }
 0x3a2   : > { %v7044_v20 = vpop.eup %7043  ;;  %2543 = vrot.lane.b32.xlu1 %v7042_v17, %s7363_s9 }
 0x3a3   : > { %7053 = vtanh.f32 %v8144_v18  ;;  %2545 = vrot.lane.b32.xlu0 %v7044_v20, %s7363_s9 }
 0x3a4   : > { %7055 = vtanh.f32 %v8146_v8  ;;  %v2464_v25 = vpop.permute.xlu1 %2463  ;;  %v2466_v28 = vpop.permute.xlu0 %2465 }
 0x3a5   : > { %v7046_v29 = vpop.eup %7045  ;;  %v8154_v30 = vadd.f32 %v2464_v25, %v2338_v21  ;;  %v8156_v33 = vadd.f32 %v2466_v28, %v2339_v22 }
 0x3a6   : > { %v7048_v37 = vpop.eup %7047  ;;  %2547 = vrot.lane.b32.xlu1 %v7046_v29, %s7363_s9 }
 0x3a7   : > { %7057 = vtanh.f32 %v8154_v30  ;;  %2549 = vrot.lane.b32.xlu0 %v7048_v37, %s7363_s9 }
 0x3a8   : > { %7059 = vtanh.f32 %v8156_v33  ;;  %v2468_v39 = vpop.permute.xlu1 %2467 }
 0x3a9   : > { %v7050_v42 = vpop.eup %7049  ;;  %v8163_v43 = vadd.f32 %v2468_v39, %v2340_v38 }
 0x3aa   : > { %v7052_v46 = vpop.eup %7051  ;;  %2551 = vrot.lane.b32.xlu1 %v7050_v42, %s7363_s9 }
 0x3ab   : > { %7061 = vtanh.f32 %v8163_v43  ;;  %2553 = vrot.lane.b32.xlu0 %v7052_v46, %s7363_s9 }
 0x3ad   : > { %v7054_v47 = vpop.eup %7053 }
 0x3ae   : > { %v7056_v49 = vpop.eup %7055  ;;  %2555 = vrot.lane.b32.xlu1 %v7054_v47, %s7363_s9 }
 0x3af   : > { %2557 = vrot.lane.b32.xlu0 %v7056_v49, %s7363_s9 }
 0x3b1   : > { %v7058_v51 = vpop.eup %7057 }
 0x3b2   : > { %v7060_v52 = vpop.eup %7059  ;;  %2559 = vrot.lane.b32.xlu1 %v7058_v51, %s7363_s9 }
 0x3b3   : > { %2561 = vrot.lane.b32.xlu0 %v7060_v52, %s7363_s9 }
 0x3b5   : > { %v7062_v56 = vpop.eup %7061 }
 0x3b6   : > { %2563 = vrot.lane.b32.xlu1 %v7062_v56, %s7363_s9 }
 0x408   : > { %v2534_v59 = vpop.permute.xlu0 %2533 }
 0x409   : > { %v2581_v60 = vmul.f32 %v2534_v59, %v8026_v10 }
 0x40b   : > { %2613 = vrot.lane.b32.xlu0 %v2581_v60, %s7364_s14 }
 0x40c   : > { %v2536_v61 = vpop.permute.xlu1 %2535 }
 0x40d   : > { %v2582_v62 = vmul.f32 %v2536_v61, %v8032_v16  ;;  %v2538_v63 = vpop.permute.xlu0 %2537 }
 0x40e   : > { %v2583_v11 = vmul.f32 %v2538_v63, %v8030_v15 }
 0x40f   : > { %2615 = vrot.lane.b32.xlu1 %v2582_v62, %s7364_s14 }
 0x410   : > { %2617 = vrot.lane.b32.xlu0 %v2583_v11, %s7364_s14  ;;  %v2540_v6 = vpop.permute.xlu1 %2539  ;;  %v1799_v11 = vadd.f32 %v7969_v1, %v7976_v3 }
 0x411   : > { %v2584_v7 = vmul.f32 %v2540_v6, %v8038_v23  ;;  %v2542_v12 = vpop.permute.xlu0 %2541  ;;  %v1794_v6 = vadd.f32 %v7976_v3, %v7971_v2 }
 0x412   : > { %v2585_v14 = vmul.f32 %v2542_v12, %v8040_v24 }
 0x413   : > { %2619 = vrot.lane.b32.xlu1 %v2584_v7, %s7364_s14 }
 0x414   : > { %2621 = vrot.lane.b32.xlu0 %v2585_v14, %s7364_s14  ;;  %v2544_v10 = vpop.permute.xlu1 %2543 }
 0x415   : > { %v2586_v16 = vmul.f32 %v2544_v10, %v8046_v31  ;;  %v2546_v17 = vpop.permute.xlu0 %2545 }
 0x416   : > { %v2587_v15 = vmul.f32 %v2546_v17, %v8048_v32 }
 0x417   : > { %2623 = vrot.lane.b32.xlu1 %v2586_v16, %s7364_s14 }
 0x418   : > { %2625 = vrot.lane.b32.xlu0 %v2587_v15, %s7364_s14  ;;  %v2548_v20 = vpop.permute.xlu1 %2547 }
 0x419   : > { %v2588_v23 = vmul.f32 %v2548_v20, %v8054_v40  ;;  %v2550_v21 = vpop.permute.xlu0 %2549 }
 0x41a   : > { %v2589_v24 = vmul.f32 %v2550_v21, %v8056_v41 }
 0x41b   : > { %2627 = vrot.lane.b32.xlu1 %v2588_v23, %s7364_s14 }
 0x41c   : > { %2629 = vrot.lane.b32.xlu0 %v2589_v24, %s7364_s14  ;;  %v2552_v22 = vpop.permute.xlu1 %2551 }
 0x41d   : > { %v2590_v31 = vmul.f32 %v2552_v22, %v8062_v50  ;;  %v2554_v25 = vpop.permute.xlu0 %2553 }
 0x41e   : > { %v2591_v32 = vmul.f32 %v2554_v25, %v8064_v48 }
 0x41f   : > { %2631 = vrot.lane.b32.xlu1 %v2590_v31, %s7364_s14 }
 0x420   : > { %2633 = vrot.lane.b32.xlu0 %v2591_v32, %s7364_s14  ;;  %v2556_v28 = vpop.permute.xlu1 %2555 }
 0x421   : > { %v2592_v40 = vmul.f32 %v2556_v28, %v8070_v57  ;;  %v2558_v29 = vpop.permute.xlu0 %2557 }
 0x422   : > { %v2593_v41 = vmul.f32 %v2558_v29, %v8072_v58 }
 0x423   : > { %2635 = vrot.lane.b32.xlu1 %v2592_v40, %s7364_s14 }
 0x424   : > { %2637 = vrot.lane.b32.xlu0 %v2593_v41, %s7364_s14  ;;  %v2560_v37 = vpop.permute.xlu1 %2559 }
 0x425   : > { %v2594_v50 = vmul.f32 %v2560_v37, %v8080_v0  ;;  %v2562_v38 = vpop.permute.xlu0 %2561 }
 0x426   : > { %v2595_v48 = vmul.f32 %v2562_v38, %v8082_v5 }
 0x427   : > { %2639 = vrot.lane.b32.xlu1 %v2594_v50, %s7364_s14 }
 0x428   : > { %2641 = vrot.lane.b32.xlu0 %v2595_v48, %s7364_s14  ;;  %v2564_v39 = vpop.permute.xlu1 %2563 }
 0x429   : > { %v2596_v57 = vmul.f32 %v2564_v39, %v8089_v13 }
 0x42b   : > { %2643 = vrot.lane.b32.xlu1 %v2596_v57, %s7364_s14 }
 0x47d   : > { %v2614_v58 = vpop.permute.xlu0 %2613 }
 0x47e   : > { %6481 = vmatprep.mubr.msk.f32.mxu1 %vm2112_vm5, %v2614_v58 }
 0x481   : > { %v2616_v42 = vpop.permute.xlu1 %2615 }
 0x482   : > { %v2618_v46 = vpop.permute.xlu0 %2617  ;;  %6482 = vmatmul.mubr.msk.f32.vlgmr.msra.gmra.mrb[78].mxu1 %vm2112_vm5, %v2616_v42 }
 0x483   : > { %6484 = vmatprep.mubr.msk.f32.mxu1 %vm2112_vm5, %v2618_v46  ;;  %6740 = vmatpush3.bf16.msra.mxu1 %v7752_v36 }
 0x484   : > { %6742 = vmatprep.subr.bf16.mxu1 %v7832_v54 }
 0x485   : > { %v2620_v0 = vpop.permute.xlu1 %2619 }
 0x486   : > { %v2622_v5 = vpop.permute.xlu0 %2621  ;;  %6485 = vmatmul.mubr.msk.f32.gmra.mrb[0].mxu1 %vm2112_vm5, %v2620_v0 }
 0x487   : > { %6487 = vmatprep.mubr.msk.f32.mxu1 %vm2112_vm5, %v2622_v5  ;;  %6744 = vmatpush3.bf16.msra.mxu1 %v7832_v54 }
 0x488   : > { %6746 = vmatprep.subr.bf16.mxu1 %v7752_v36 }
 0x489   : > { %v2624_v13 = vpop.permute.xlu1 %2623 }
 0x48a   : > { %v2626_v47 = vpop.permute.xlu0 %2625  ;;  %6488 = vmatmul.mubr.msk.f32.gmra.mrb[2].mxu1 %vm2112_vm5, %v2624_v13 }
 0x48b   : > { %6490 = vmatprep.mubr.msk.f32.mxu1 %vm2112_vm5, %v2626_v47 }
 0x48d   : > { %v2628_v49 = vpop.permute.xlu1 %2627 }
 0x48e   : > { %v2630_v51 = vpop.permute.xlu0 %2629  ;;  %6491 = vmatmul.mubr.msk.f32.gmra.mrb[4].mxu1 %vm2112_vm5, %v2628_v49 }
 0x48f   : > { %6493 = vmatprep.mubr.msk.f32.mxu1 %vm2112_vm5, %v2630_v51 }
 0x491   : > { %v2632_v52 = vpop.permute.xlu1 %2631 }
 0x492   : > { %v2634_v56 = vpop.permute.xlu0 %2633  ;;  %6494 = vmatmul.mubr.msk.f32.gmra.mrb[6].mxu1 %vm2112_vm5, %v2632_v52 }
 0x493   : > { %6496 = vmatprep.mubr.msk.f32.mxu1 %vm2112_vm5, %v2634_v56 }
 0x495   : > { %v2636_v59 = vpop.permute.xlu1 %2635 }
 0x496   : > { %v2638_v60 = vpop.permute.xlu0 %2637  ;;  %6497 = vmatmul.mubr.msk.f32.gmra.mrb[8].mxu1 %vm2112_vm5, %v2636_v59 }
 0x497   : > { %6499 = vmatprep.mubr.msk.f32.mxu1 %vm2112_vm5, %v2638_v60 }
 0x499   : > { %v2640_v61 = vpop.permute.xlu1 %2639 }
 0x49a   : > { %v2642_v62 = vpop.permute.xlu0 %2641  ;;  %6500 = vmatmul.mubr.msk.f32.gmra.mrb[10].mxu1 %vm2112_vm5, %v2640_v61 }
 0x49b   : > { %6502 = vmatprep.mubr.msk.f32.mxu1 %vm2112_vm5, %v2642_v62 }
 0x49d   : > { %v2644_v63 = vpop.permute.xlu1 %2643 }
 0x49e   : > { %6503 = vmatmul.mubr.msk.f32.gmra.mrb[12].mxu1 %vm2112_vm5, %v2644_v63 }
 0x555   : > { %v6483_v7 = vpop.f32.mrb[78].mxu1 }
 0x556   : > { %v2823_v12 = vadd.f32 %v6483_v7, %v1799_v11  ;;  %v2743_v14 = vpop.f32.mrb[79].mxu1 }
 0x557   : > { %v2822_v10 = vadd.f32 %v2743_v14, %v1794_v6 }
 0x558   : > { %7063 = vtanh.f32 %v2823_v12 }
 0x559   : > { %7065 = vtanh.f32 %v2822_v10  ;;  %v6486_v16 = vpop.f32.mrb[0].mxu1 }
 0x55a   : > { %v6829_v17 = vadd.f32 %v6486_v16, %v7976_v3  ;;  %v2753_v15 = vpop.f32.mrb[1].mxu1 }
 0x55b   : > { %v6830_v20 = vadd.f32 %v7976_v3, %v2753_v15 }
 0x55c   : > { %7067 = vtanh.f32 %v6829_v17 }
 0x55d   : > { %7069 = vtanh.f32 %v6830_v20  ;;  %v6489_v23 = vpop.f32.mrb[2].mxu1 }
 0x55e   : > { %v6831_v1 = vadd.f32 %v6489_v23, %v7976_v3  ;;  %v2763_v21 = vpop.f32.mrb[3].mxu1 }
 0x55f   : > { %v6832_v2 = vadd.f32 %v7976_v3, %v2763_v21 }
 0x560   : > { %7071 = vtanh.f32 %v6831_v1 }
 0x561   : > { %7073 = vtanh.f32 %v6832_v2  ;;  %v6492_v24 = vpop.f32.mrb[4].mxu1 }
 0x562   : > { %v7064_v22 = vpop.eup %7063  ;;  %v6833_v31 = vadd.f32 %v6492_v24, %v7976_v3  ;;  %v2773_v25 = vpop.f32.mrb[5].mxu1 }
 0x563   : > { %v7066_v32 = vpop.eup %7065  ;;  %v6834_v28 = vadd.f32 %v7976_v3, %v2773_v25  ;;  %2920 = vrot.lane.b32.xlu1 %v7064_v22, %s7363_s9  ;;  %v2855_v14 = vadd.f32 1.0, %v7064_v22 }
 0x564   : > { %7075 = vtanh.f32 %v6833_v31  ;;  %2918 = vrot.lane.b32.xlu0 %v7066_v32, %s7363_s9  ;;  %v2854_v10 = vadd.f32 1.0, %v7066_v32 }
 0x565   : > { %7077 = vtanh.f32 %v6834_v28  ;;  %v6495_v40 = vpop.f32.mrb[6].mxu1  ;;  %v8265_v16 = vmul.f32 0.5, %v2855_v14 }
 0x566   : > { %v7068_v29 = vpop.eup %7067  ;;  %v6835_v41 = vadd.f32 %v6495_v40, %v7976_v3  ;;  %v2783_v37 = vpop.f32.mrb[7].mxu1  ;;  %v8267_v20 = vmul.f32 0.5, %v2854_v10 }
 0x567   : > { %v7070_v50 = vpop.eup %7069  ;;  %v6836_v38 = vadd.f32 %v7976_v3, %v2783_v37  ;;  %2924 = vrot.lane.b32.xlu1 %v7068_v29, %s7363_s9  ;;  %v2857_v17 = vadd.f32 1.0, %v7068_v29 }
 0x568   : > { %7079 = vtanh.f32 %v6835_v41  ;;  %2922 = vrot.lane.b32.xlu0 %v7070_v50, %s7363_s9  ;;  %v2856_v23 = vadd.f32 1.0, %v7070_v50 }
 0x569   : > { %7081 = vtanh.f32 %v6836_v38  ;;  %v6498_v48 = vpop.f32.mrb[8].mxu1  ;;  %v8272_v24 = vmul.f32 0.5, %v2857_v17 }
 0x56a   : > { %v7072_v39 = vpop.eup %7071  ;;  %v6837_v57 = vadd.f32 %v6498_v48, %v7976_v3  ;;  %v2793_v58 = vpop.f32.mrb[9].mxu1  ;;  %v8275_v22 = vmul.f32 0.5, %v2856_v23 }
 0x56b   : > { %v7074_v42 = vpop.eup %7073  ;;  %v6838_v46 = vadd.f32 %v7976_v3, %v2793_v58  ;;  %2928 = vrot.lane.b32.xlu1 %v7072_v39, %s7363_s9  ;;  %v2859_v31 = vadd.f32 1.0, %v7072_v39 }
 0x56c   : > { %7083 = vtanh.f32 %v6837_v57  ;;  %2926 = vrot.lane.b32.xlu0 %v7074_v42, %s7363_s9  ;;  %v2858_v32 = vadd.f32 1.0, %v7074_v42 }
 0x56d   : > { %7085 = vtanh.f32 %v6838_v46  ;;  %v6501_v0 = vpop.f32.mrb[10].mxu1  ;;  %v8280_v41 = vmul.f32 0.5, %v2859_v31 }
 0x56e   : > { %v7076_v5 = vpop.eup %7075  ;;  %v6839_v13 = vadd.f32 %v6501_v0, %v7976_v3  ;;  %v2803_v47 = vpop.f32.mrb[11].mxu1  ;;  %v8283_v38 = vmul.f32 0.5, %v2858_v32 }
 0x56f   : > { %v7078_v49 = vpop.eup %7077  ;;  %v6840_v51 = vadd.f32 %v7976_v3, %v2803_v47  ;;  %2932 = vrot.lane.b32.xlu1 %v7076_v5, %s7363_s9  ;;  %v2861_v37 = vadd.f32 1.0, %v7076_v5 }
 0x570   : > { %7087 = vtanh.f32 %v6839_v13  ;;  %2930 = vrot.lane.b32.xlu0 %v7078_v49, %s7363_s9  ;;  %v2860_v48 = vadd.f32 1.0, %v7078_v49 }
 0x571   : > { %7089 = vtanh.f32 %v6840_v51  ;;  %v6504_v52 = vpop.f32.mrb[12].mxu1  ;;  %v8288_v42 = vmul.f32 0.5, %v2861_v37 }
 0x572   : > { %v7080_v56 = vpop.eup %7079  ;;  %v6841_v59 = vadd.f32 %v6504_v52, %v7976_v3  ;;  %v2813_v60 = vpop.f32.mrb[13].mxu1  ;;  %v8291_v5 = vmul.f32 0.5, %v2860_v48 }
 0x573   : > { %v7082_v61 = vpop.eup %7081  ;;  %v6842_v62 = vadd.f32 %v7976_v3, %v2813_v60  ;;  %2936 = vrot.lane.b32.xlu1 %v7080_v56, %s7363_s9  ;;  %v2863_v46 = vadd.f32 1.0, %v7080_v56 }
 0x574   : > { %7091 = vtanh.f32 %v6841_v59  ;;  %2934 = vrot.lane.b32.xlu0 %v7082_v61, %s7363_s9  ;;  %v2862_v13 = vadd.f32 1.0, %v7082_v61 }
 0x575   : > { %7093 = vtanh.f32 %v6842_v62  ;;  %v8296_v52 = vmul.f32 0.5, %v2863_v46  ;;  %v2886_v46 = vmul.f32 %v8267_v20, %v8094_v19 }
 0x576   : > { %v7084_v63 = vpop.eup %7083  ;;  %v8299_v56 = vmul.f32 0.5, %v2862_v13 }
 0x577   : > { %v7086_v11 = vpop.eup %7085  ;;  %2940 = vrot.lane.b32.xlu1 %v7084_v63, %s7363_s9  ;;  %v2865_v59 = vadd.f32 1.0, %v7084_v63 }
 0x578   : > { %2938 = vrot.lane.b32.xlu0 %v7086_v11, %s7363_s9  ;;  %v2864_v62 = vadd.f32 1.0, %v7086_v11 }
 0x579   : > { %v8304_v17 = vmul.f32 0.5, %v2865_v59 }
 0x57a   : > { %v7088_v6 = vpop.eup %7087  ;;  %v8307_v63 = vmul.f32 0.5, %v2864_v62  ;;  %v2891_v62 = vmul.f32 %v8280_v41, %v8115_v44  ;;  %v2892_v44 = vmul.f32 %v8291_v5, %v8117_v45  ;;  %v2894_v45 = vmul.f32 %v8299_v56, %v8126_v55 }
 0x57b   : > { %v7090_v7 = vpop.eup %7089  ;;  %2944 = vrot.lane.b32.xlu1 %v7088_v6, %s7363_s9 }
 0x57c   : > { %2942 = vrot.lane.b32.xlu0 %v7090_v7, %s7363_s9  ;;  %v2896_v55 = vmul.f32 %v8307_v63, %v8136_v9 }
 0x57e   : > { %v8257_v12 = vpop.eup %7091 }
 0x57f   : > { %v8259_v3 = vpop.eup %7093  ;;  %2948 = vrot.lane.b32.xlu1 %v8257_v12, %s7363_s9 }
 0x580   : > { %2946 = vrot.lane.b32.xlu0 %v8259_v3, %s7363_s9 }
 0x5d5   : > { %v2921_v15 = vpop.permute.xlu1 %2920 }
 0x5d6   : > { %v2967_v1 = vmul.f32 %v2921_v15, %v8265_v16  ;;  %v2919_v21 = vpop.permute.xlu0 %2918  ;;  %v2867_v15 = vadd.f32 1.0, %v7088_v6 }
 0x5d7   : > { %v2966_v2 = vmul.f32 %v2919_v21, %v8267_v20 }
 0x5d8   : > { %3000 = vrot.lane.b32.xlu1 %v2967_v1, %s7363_s9  ;;  %v2866_v1 = vadd.f32 1.0, %v7090_v7  ;;  %v8312_v31 = vmul.f32 0.5, %v2867_v15  ;;  %v2893_v15 = vmul.f32 %v8288_v42, %v8124_v53  ;;  %v2895_v53 = vmul.f32 %v8296_v52, %v8134_v4 }
 0x5d9   : > { %v2925_v25 = vpop.permute.xlu1 %2924  ;;  %2998 = vrot.lane.b32.xlu0 %v2966_v2, %s7363_s9  ;;  %v2897_v4 = vmul.f32 %v8304_v17, %v8144_v18 }
 0x5da   : > { %v2969_v28 = vmul.f32 %v2925_v25, %v8272_v24  ;;  %v2923_v40 = vpop.permute.xlu0 %2922  ;;  %v2869_v25 = vadd.f32 1.0, %v8257_v12  ;;  %v8316_v6 = vmul.f32 0.5, %v2866_v1  ;;  %v2899_v18 = vmul.f32 %v8312_v31, %v8154_v30 }
 0x5db   : > { %v2968_v29 = vmul.f32 %v2923_v40, %v8275_v22 }
 0x5dc   : > { %3004 = vrot.lane.b32.xlu1 %v2969_v28, %s7363_s9  ;;  %v2868_v28 = vadd.f32 1.0, %v8259_v3  ;;  %v8322_v37 = vmul.f32 0.5, %v2869_v25  ;;  %v2887_v3 = vmul.f32 %v8265_v16, %v8099_v26  ;;  %v2888_v26 = vmul.f32 %v8275_v22, %v8101_v27 }
 0x5dd   : > { %v2929_v50 = vpop.permute.xlu1 %2928  ;;  %3002 = vrot.lane.b32.xlu0 %v2968_v29, %s7363_s9  ;;  %v2898_v9 = vmul.f32 %v8316_v6, %v8146_v8 }
 0x5de   : > { %v2971_v39 = vmul.f32 %v2929_v50, %v8280_v41  ;;  %v2927_v57 = vpop.permute.xlu0 %2926  ;;  %v8325_v12 = vmul.f32 0.5, %v2868_v28  ;;  %v2901_v30 = vmul.f32 %v8322_v37, %v8163_v43 }
 0x5df   : > { %v2970_v58 = vmul.f32 %v2927_v57, %v8283_v38 }
 0x5e0   : > { %3008 = vrot.lane.b32.xlu1 %v2971_v39, %s7363_s9  ;;  %v2900_v8 = vmul.f32 %v8325_v12, %v8156_v33 }
 0x5e1   : > { %v2933_v0 = vpop.permute.xlu1 %2932  ;;  %3006 = vrot.lane.b32.xlu0 %v2970_v58, %s7363_s9 }
 0x5e2   : > { %v2973_v47 = vmul.f32 %v2933_v0, %v8288_v42  ;;  %v2931_v51 = vpop.permute.xlu0 %2930 }
 0x5e3   : > { %v2972_v49 = vmul.f32 %v2931_v51, %v8291_v5  ;;  %v2889_v51 = vmul.f32 %v8272_v24, %v8107_v34  ;;  %v2890_v34 = vmul.f32 %v8283_v38, %v8109_v35 }
 0x5e4   : > { %3012 = vrot.lane.b32.xlu1 %v2973_v47, %s7363_s9 }
 0x5e5   : > { %v2937_v60 = vpop.permute.xlu1 %2936  ;;  %3010 = vrot.lane.b32.xlu0 %v2972_v49, %s7363_s9 }
 0x5e6   : > { %v2975_v14 = vmul.f32 %v2937_v60, %v8296_v52  ;;  %v2935_v10 = vpop.permute.xlu0 %2934 }
 0x5e7   : > { %v2974_v61 = vmul.f32 %v2935_v10, %v8299_v56 }
 0x5e8   : > { %3016 = vrot.lane.b32.xlu1 %v2975_v14, %s7363_s9 }
 0x5e9   : > { %v2941_v23 = vpop.permute.xlu1 %2940  ;;  %3014 = vrot.lane.b32.xlu0 %v2974_v61, %s7363_s9 }
 0x5ea   : > { %v2977_v21 = vmul.f32 %v2941_v23, %v8304_v17  ;;  %v2939_v2 = vpop.permute.xlu0 %2938 }
 0x5eb   : > { %v2976_v11 = vmul.f32 %v2939_v2, %v8307_v63 }
 0x5ec   : > { %3020 = vrot.lane.b32.xlu1 %v2977_v21, %s7363_s9 }
 0x5ed   : > { %v2945_v32 = vpop.permute.xlu1 %2944  ;;  %3018 = vrot.lane.b32.xlu0 %v2976_v11, %s7363_s9 }
 0x5ee   : > { %v2979_v7 = vmul.f32 %v2945_v32, %v8312_v31  ;;  %v2943_v40 = vpop.permute.xlu0 %2942 }
 0x5ef   : > { %v2978_v29 = vmul.f32 %v2943_v40, %v8316_v6 }
 0x5f0   : > { %3024 = vrot.lane.b32.xlu1 %v2979_v7, %s7363_s9 }
 0x5f1   : > { %v2949_v50 = vpop.permute.xlu1 %2948  ;;  %3022 = vrot.lane.b32.xlu0 %v2978_v29, %s7363_s9 }
 0x5f2   : > { %v2981_v48 = vmul.f32 %v2949_v50, %v8322_v37  ;;  %v2947_v39 = vpop.permute.xlu0 %2946 }
 0x5f3   : > { %v2980_v57 = vmul.f32 %v2947_v39, %v8325_v12 }
 0x5f4   : > { %3028 = vrot.lane.b32.xlu1 %v2981_v48, %s7363_s9 }
 0x5f5   : > { %3026 = vrot.lane.b32.xlu0 %v2980_v57, %s7363_s9 }
 0x64a   : > { %v3001_v58 = vpop.permute.xlu1 %3000 }
 0x64b   : > { %v8335_v0 = vadd.f32 %v3001_v58, %v2887_v3  ;;  %v2999_v13 = vpop.permute.xlu0 %2998 }
 0x64c   : > { %v8337_v47 = vadd.f32 %v2999_v13, %v2886_v46 }
 0x64d   : > { %7095 = vtanh.f32 %v8335_v0 }
 0x64e   : > { %7097 = vtanh.f32 %v8337_v47  ;;  %v3005_v49 = vpop.permute.xlu1 %3004 }
 0x64f   : > { %v8345_v59 = vadd.f32 %v3005_v49, %v2889_v51  ;;  %v3003_v60 = vpop.permute.xlu0 %3002 }
 0x650   : > { %v8347_v19 = vadd.f32 %v3003_v60, %v2888_v26 }
 0x651   : > { %7099 = vtanh.f32 %v8345_v59 }
 0x652   : > { %7101 = vtanh.f32 %v8347_v19  ;;  %v3009_v14 = vpop.permute.xlu1 %3008 }
 0x653   : > { %v8355_v10 = vadd.f32 %v3009_v14, %v2891_v62  ;;  %v3007_v61 = vpop.permute.xlu0 %3006 }
 0x654   : > { %v8357_v27 = vadd.f32 %v3007_v61, %v2890_v34 }
 0x655   : > { %7103 = vtanh.f32 %v8355_v10 }
 0x656   : > { %7105 = vtanh.f32 %v8357_v27  ;;  %v3013_v23 = vpop.permute.xlu1 %3012 }
 0x657   : > { %v7096_v1 = vpop.eup %7095  ;;  %v8365_v21 = vadd.f32 %v3013_v23, %v2893_v15  ;;  %v3011_v35 = vpop.permute.xlu0 %3010 }
 0x658   : > { %v7098_v2 = vpop.eup %7097  ;;  %v8367_v11 = vadd.f32 %v3011_v35, %v2892_v44  ;;  %3096 = vrot.lane.b32.xlu1 %v7096_v1, %s7363_s9 }
 0x659   : > { %7107 = vtanh.f32 %v8365_v21  ;;  %3094 = vrot.lane.b32.xlu0 %v7098_v2, %s7363_s9 }
 0x65a   : > { %7109 = vtanh.f32 %v8367_v11  ;;  %v3017_v25 = vpop.permute.xlu1 %3016 }
 0x65b   : > { %v7100_v32 = vpop.eup %7099  ;;  %v8377_v28 = vadd.f32 %v3017_v25, %v2895_v53  ;;  %v3015_v7 = vpop.permute.xlu0 %3014 }
 0x65c   : > { %v7102_v40 = vpop.eup %7101  ;;  %v8379_v29 = vadd.f32 %v3015_v7, %v2894_v45  ;;  %3100 = vrot.lane.b32.xlu1 %v7100_v32, %s7363_s9 }
 0x65d   : > { %7111 = vtanh.f32 %v8377_v28  ;;  %3098 = vrot.lane.b32.xlu0 %v7102_v40, %s7363_s9 }
 0x65e   : > { %7113 = vtanh.f32 %v8379_v29  ;;  %v3021_v50 = vpop.permute.xlu1 %3020 }
 0x65f   : > { %v7104_v48 = vpop.eup %7103  ;;  %v8389_v39 = vadd.f32 %v3021_v50, %v2897_v4  ;;  %v3019_v57 = vpop.permute.xlu0 %3018 }
 0x660   : > { %v7106_v3 = vpop.eup %7105  ;;  %v8391_v58 = vadd.f32 %v3019_v57, %v2896_v55  ;;  %3104 = vrot.lane.b32.xlu1 %v7104_v48, %s7363_s9 }
 0x661   : > { %7115 = vtanh.f32 %v8389_v39  ;;  %3102 = vrot.lane.b32.xlu0 %v7106_v3, %s7363_s9 }
 0x662   : > { %7117 = vtanh.f32 %v8391_v58  ;;  %v3025_v46 = vpop.permute.xlu1 %3024 }
 0x663   : > { %v7108_v13 = vpop.eup %7107  ;;  %v8401_v51 = vadd.f32 %v3025_v46, %v2899_v18  ;;  %v3023_v49 = vpop.permute.xlu0 %3022 }
 0x664   : > { %v7110_v26 = vpop.eup %7109  ;;  %v8403_v60 = vadd.f32 %v3023_v49, %v2898_v9  ;;  %3108 = vrot.lane.b32.xlu1 %v7108_v13, %s7363_s9 }
 0x665   : > { %7119 = vtanh.f32 %v8401_v51  ;;  %3106 = vrot.lane.b32.xlu0 %v7110_v26, %s7363_s9 }
 0x666   : > { %7121 = vtanh.f32 %v8403_v60  ;;  %v3029_v62 = vpop.permute.xlu1 %3028 }
 0x667   : > { %v7112_v14 = vpop.eup %7111  ;;  %v8413_v34 = vadd.f32 %v3029_v62, %v2901_v30  ;;  %v3027_v61 = vpop.permute.xlu0 %3026 }
 0x668   : > { %v7114_v15 = vpop.eup %7113  ;;  %v8415_v23 = vadd.f32 %v3027_v61, %v2900_v8  ;;  %3112 = vrot.lane.b32.xlu1 %v7112_v14, %s7363_s9 }
 0x669   : > { %7123 = vtanh.f32 %v8413_v34  ;;  %3110 = vrot.lane.b32.xlu0 %v7114_v15, %s7363_s9 }
 0x66a   : > { %7125 = vtanh.f32 %v8415_v23 }
 0x66b   : > { %v7116_v43 = vpop.eup %7115 }
 0x66c   : > { %v7118_v44 = vpop.eup %7117  ;;  %3116 = vrot.lane.b32.xlu1 %v7116_v43, %s7363_s9 }
 0x66d   : > { %3114 = vrot.lane.b32.xlu0 %v7118_v44, %s7363_s9 }
 0x66f   : > { %v7120_v33 = vpop.eup %7119 }
 0x670   : > { %v7122_v1 = vpop.eup %7121  ;;  %3120 = vrot.lane.b32.xlu1 %v7120_v33, %s7363_s9 }
 0x671   : > { %3118 = vrot.lane.b32.xlu0 %v7122_v1, %s7363_s9 }
 0x673   : > { %v7124_v35 = vpop.eup %7123 }
 0x674   : > { %v7126_v2 = vpop.eup %7125  ;;  %3124 = vrot.lane.b32.xlu1 %v7124_v35, %s7363_s9 }
 0x675   : > { %3122 = vrot.lane.b32.xlu0 %v7126_v2, %s7363_s9 }
 0x6ca   : > { %v3097_v53 = vpop.permute.xlu1 %3096 }
 0x6cb   : > { %v3143_v25 = vmul.f32 %v3097_v53, %v8265_v16  ;;  %v3095_v45 = vpop.permute.xlu0 %3094 }
 0x6cc   : > { %v3142_v32 = vmul.f32 %v3095_v45, %v8267_v20 }
 0x6cd   : > { %3176 = vrot.lane.b32.xlu1 %v3143_v25, %s7364_s14 }
 0x6ce   : > { %v3101_v7 = vpop.permute.xlu1 %3100  ;;  %3174 = vrot.lane.b32.xlu0 %v3142_v32, %s7364_s14  ;;  %v8482_v32 = vld [vmem:[%s9333_s1 + $0xd9] ss:$0 sm:$0xff] }
 0x6cf   : > { %v3145_v40 = vmul.f32 %v3101_v7, %v8272_v24  ;;  %v3099_v4 = vpop.permute.xlu0 %3098 }
 0x6d0   : > { %v3144_v50 = vmul.f32 %v3099_v4, %v8275_v22 }
 0x6d1   : > { %3180 = vrot.lane.b32.xlu1 %v3145_v40, %s7364_s14 }
 0x6d2   : > { %v3105_v55 = vpop.permute.xlu1 %3104  ;;  %3178 = vrot.lane.b32.xlu0 %v3144_v50, %s7364_s14 }
 0x6d3   : > { %v3147_v16 = vmul.f32 %v3105_v55, %v8280_v41  ;;  %v3103_v48 = vpop.permute.xlu0 %3102 }
 0x6d4   : > { %v3146_v20 = vmul.f32 %v3103_v48, %v8283_v38 }
 0x6d5   : > { %3184 = vrot.lane.b32.xlu1 %v3147_v16, %s7364_s14 }
 0x6d6   : > { %v3109_v57 = vpop.permute.xlu1 %3108  ;;  %3182 = vrot.lane.b32.xlu0 %v3146_v20, %s7364_s14 }
 0x6d7   : > { %v3149_v24 = vmul.f32 %v3109_v57, %v8288_v42  ;;  %v3107_v3 = vpop.permute.xlu0 %3106 }
 0x6d8   : > { %v3148_v22 = vmul.f32 %v3107_v3, %v8291_v5 }
 0x6d9   : > { %3188 = vrot.lane.b32.xlu1 %v3149_v24, %s7364_s14 }
 0x6da   : > { %v3113_v18 = vpop.permute.xlu1 %3112  ;;  %3186 = vrot.lane.b32.xlu0 %v3148_v22, %s7364_s14 }
 0x6db   : > { %v3151_v41 = vmul.f32 %v3113_v18, %v8296_v52  ;;  %v3111_v46 = vpop.permute.xlu0 %3110 }
 0x6dc   : > { %v3150_v38 = vmul.f32 %v3111_v46, %v8299_v56 }
 0x6dd   : > { %3192 = vrot.lane.b32.xlu1 %v3151_v41, %s7364_s14 }
 0x6de   : > { %v3117_v9 = vpop.permute.xlu1 %3116  ;;  %3190 = vrot.lane.b32.xlu0 %v3150_v38, %s7364_s14 }
 0x6df   : > { %v3153_v42 = vmul.f32 %v3117_v9, %v8304_v17  ;;  %v3115_v13 = vpop.permute.xlu0 %3114 }
 0x6e0   : > { %v3152_v5 = vmul.f32 %v3115_v13, %v8307_v63 }
 0x6e1   : > { %3196 = vrot.lane.b32.xlu1 %v3153_v42, %s7364_s14 }
 0x6e2   : > { %v3121_v49 = vpop.permute.xlu1 %3120  ;;  %3194 = vrot.lane.b32.xlu0 %v3152_v5, %s7364_s14 }
 0x6e3   : > { %v3155_v52 = vmul.f32 %v3121_v49, %v8312_v31  ;;  %v3119_v26 = vpop.permute.xlu0 %3118 }
 0x6e4   : > { %v3154_v56 = vmul.f32 %v3119_v26, %v8316_v6 }
 0x6e5   : > { %3200 = vrot.lane.b32.xlu1 %v3155_v52, %s7364_s14 }
 0x6e6   : > { %v3125_v30 = vpop.permute.xlu1 %3124  ;;  %3198 = vrot.lane.b32.xlu0 %v3154_v56, %s7364_s14 }
 0x6e7   : > { %v3157_v17 = vmul.f32 %v3125_v30, %v8322_v37  ;;  %v3123_v62 = vpop.permute.xlu0 %3122 }
 0x6e8   : > { %v3156_v63 = vmul.f32 %v3123_v62, %v8325_v12 }
 0x6e9   : > { %3204 = vrot.lane.b32.xlu1 %v3157_v17, %s7364_s14 }
 0x6ea   : > { %3202 = vrot.lane.b32.xlu0 %v3156_v63, %s7364_s14 }
 0x73f   : > { %v3177_v8 = vpop.permute.xlu1 %3176 }
 0x740   : > { %v3175_v14 = vpop.permute.xlu0 %3174 }
 0x741   : > { %6513 = vmatprep.mubr.msk.f32.mxu1 %vm2112_vm5, %v3175_v14 }
 0x742   : > { %6514 = vmatmul.mubr.msk.f32.vlgmr.msra.gmra.mrb[14].mxu1 %vm2112_vm5, %v3177_v8 }
 0x743   : > { %v3181_v31 = vpop.permute.xlu1 %3180  ;;  %6748 = vmatpush3.bf16.msra.mxu1 %v7752_v36 }
 0x744   : > { %v3179_v6 = vpop.permute.xlu0 %3178  ;;  %6750 = vmatprep.subr.bf16.mxu1 %v7832_v54 }
 0x745   : > { %6516 = vmatprep.mubr.msk.f32.mxu1 %vm2112_vm5, %v3179_v6 }
 0x746   : > { %6517 = vmatmul.mubr.msk.f32.gmra.mrb[16].mxu1 %vm2112_vm5, %v3181_v31 }
 0x747   : > { %v3185_v37 = vpop.permute.xlu1 %3184  ;;  %6752 = vmatpush3.bf16.msra.mxu1 %v7832_v54 }
 0x748   : > { %v3183_v12 = vpop.permute.xlu0 %3182  ;;  %6754 = vmatprep.subr.bf16.mxu1 %v7752_v36 }
 0x749   : > { %6519 = vmatprep.mubr.msk.f32.mxu1 %vm2112_vm5, %v3183_v12 }
 0x74a   : > { %6520 = vmatmul.mubr.msk.f32.gmra.mrb[18].mxu1 %vm2112_vm5, %v3185_v37 }
 0x74b   : > { %v3189_v61 = vpop.permute.xlu1 %3188 }
 0x74c   : > { %v3187_v15 = vpop.permute.xlu0 %3186 }
 0x74d   : > { %6522 = vmatprep.mubr.msk.f32.mxu1 %vm2112_vm5, %v3187_v15 }
 0x74e   : > { %6523 = vmatmul.mubr.msk.f32.gmra.mrb[20].mxu1 %vm2112_vm5, %v3189_v61 }
 0x74f   : > { %v3193_v43 = vpop.permute.xlu1 %3192 }
 0x750   : > { %v3191_v44 = vpop.permute.xlu0 %3190 }
 0x751   : > { %6525 = vmatprep.mubr.msk.f32.mxu1 %vm2112_vm5, %v3191_v44 }
 0x752   : > { %6526 = vmatmul.mubr.msk.f32.gmra.mrb[22].mxu1 %vm2112_vm5, %v3193_v43 }
 0x753   : > { %v3197_v33 = vpop.permute.xlu1 %3196 }
 0x754   : > { %v3195_v1 = vpop.permute.xlu0 %3194 }
 0x755   : > { %6528 = vmatprep.mubr.msk.f32.mxu1 %vm2112_vm5, %v3195_v1 }
 0x756   : > { %6529 = vmatmul.mubr.msk.f32.gmra.mrb[24].mxu1 %vm2112_vm5, %v3197_v33 }
 0x757   : > { %v3201_v35 = vpop.permute.xlu1 %3200 }
 0x758   : > { %v3199_v2 = vpop.permute.xlu0 %3198 }
 0x759   : > { %6531 = vmatprep.mubr.msk.f32.mxu1 %vm2112_vm5, %v3199_v2 }
 0x75a   : > { %6532 = vmatmul.mubr.msk.f32.gmra.mrb[26].mxu1 %vm2112_vm5, %v3201_v35 }
 0x75b   : > { %v3205_v25 = vpop.permute.xlu1 %3204 }
 0x75c   : > { %v3203_v53 = vpop.permute.xlu0 %3202 }
 0x75d   : > { %6534 = vmatprep.mubr.msk.f32.mxu1 %vm2112_vm5, %v3203_v53 }
 0x75e   : > { %6535 = vmatmul.mubr.msk.f32.gmra.mrb[28].mxu1 %vm2112_vm5, %v3205_v25 }
 0x815   : > { %v6515_v45 = vpop.f32.mrb[14].mxu1 }
 0x816   : > { %v6843_v7 = vadd.f32 %v8482_v32, %v6515_v45  ;;  %v3304_v40 = vpop.f32.mrb[15].mxu1 }
 0x817   : > { %v6844_v4 = vadd.f32 %v8482_v32, %v3304_v40 }
 0x818   : > { %7127 = vtanh.f32 %v6843_v7 }
 0x819   : > { %7129 = vtanh.f32 %v6844_v4  ;;  %v6518_v50 = vpop.f32.mrb[16].mxu1 }
 0x81a   : > { %v6845_v55 = vadd.f32 %v8482_v32, %v6518_v50  ;;  %v3314_v16 = vpop.f32.mrb[17].mxu1 }
 0x81b   : > { %v6846_v48 = vadd.f32 %v8482_v32, %v3314_v16 }
 0x81c   : > { %7131 = vtanh.f32 %v6845_v55 }
 0x81d   : > { %7133 = vtanh.f32 %v6846_v48  ;;  %v6521_v20 = vpop.f32.mrb[18].mxu1 }
 0x81e   : > { %v6847_v57 = vadd.f32 %v8482_v32, %v6521_v20  ;;  %v3324_v24 = vpop.f32.mrb[19].mxu1 }
 0x81f   : > { %v6848_v3 = vadd.f32 %v8482_v32, %v3324_v24 }
 0x820   : > { %7135 = vtanh.f32 %v6847_v57 }
 0x821   : > { %7137 = vtanh.f32 %v6848_v3  ;;  %v6524_v22 = vpop.f32.mrb[20].mxu1 }
 0x822   : > { %v7128_v18 = vpop.eup %7127  ;;  %v6849_v41 = vadd.f32 %v8482_v32, %v6524_v22  ;;  %v3334_v46 = vpop.f32.mrb[21].mxu1 }
 0x823   : > { %v7130_v38 = vpop.eup %7129  ;;  %v6850_v9 = vadd.f32 %v8482_v32, %v3334_v46  ;;  %3481 = vrot.lane.b32.xlu1 %v7128_v18, %s7363_s9  ;;  %v3416_v4 = vadd.f32 1.0, %v7128_v18 }
 0x824   : > { %7139 = vtanh.f32 %v6849_v41  ;;  %3479 = vrot.lane.b32.xlu0 %v7130_v38, %s7363_s9  ;;  %v3415_v50 = vadd.f32 1.0, %v7130_v38 }
 0x825   : > { %7141 = vtanh.f32 %v6850_v9  ;;  %v6527_v42 = vpop.f32.mrb[22].mxu1  ;;  %v8522_v55 = vmul.f32 0.5, %v3416_v4 }
 0x826   : > { %v7132_v13 = vpop.eup %7131  ;;  %v6851_v5 = vadd.f32 %v8482_v32, %v6527_v42  ;;  %v3344_v49 = vpop.f32.mrb[23].mxu1  ;;  %v8524_v20 = vmul.f32 0.5, %v3415_v50 }
 0x827   : > { %v7134_v52 = vpop.eup %7133  ;;  %v6852_v26 = vadd.f32 %v8482_v32, %v3344_v49  ;;  %3485 = vrot.lane.b32.xlu1 %v7132_v13, %s7363_s9  ;;  %v3418_v16 = vadd.f32 1.0, %v7132_v13 }
 0x828   : > { %7143 = vtanh.f32 %v6851_v5  ;;  %3483 = vrot.lane.b32.xlu0 %v7134_v52, %s7363_s9  ;;  %v3417_v57 = vadd.f32 1.0, %v7134_v52 }
 0x829   : > { %7145 = vtanh.f32 %v6852_v26  ;;  %v6530_v56 = vpop.f32.mrb[24].mxu1  ;;  %v8529_v41 = vmul.f32 0.5, %v3418_v16 }
 0x82a   : > { %v7136_v30 = vpop.eup %7135  ;;  %v6853_v17 = vadd.f32 %v8482_v32, %v6530_v56  ;;  %v3354_v62 = vpop.f32.mrb[25].mxu1  ;;  %v8532_v18 = vmul.f32 0.5, %v3417_v57 }
 0x82b   : > { %v7138_v63 = vpop.eup %7137  ;;  %v6854_v8 = vadd.f32 %v8482_v32, %v3354_v62  ;;  %3489 = vrot.lane.b32.xlu1 %v7136_v30, %s7363_s9  ;;  %v3420_v46 = vadd.f32 1.0, %v7136_v30 }
 0x82c   : > { %7147 = vtanh.f32 %v6853_v17  ;;  %3487 = vrot.lane.b32.xlu0 %v7138_v63, %s7363_s9  ;;  %v3419_v38 = vadd.f32 1.0, %v7138_v63 }
 0x82d   : > { %7149 = vtanh.f32 %v6854_v8  ;;  %v6533_v14 = vpop.f32.mrb[26].mxu1  ;;  %v8537_v49 = vmul.f32 0.5, %v3420_v46 }
 0x82e   : > { %v7140_v31 = vpop.eup %7139  ;;  %v6855_v6 = vadd.f32 %v8482_v32, %v6533_v14  ;;  %v3364_v37 = vpop.f32.mrb[27].mxu1  ;;  %v8540_v56 = vmul.f32 0.5, %v3419_v38 }
 0x82f   : > { %v7142_v12 = vpop.eup %7141  ;;  %v6856_v61 = vadd.f32 %v8482_v32, %v3364_v37  ;;  %3493 = vrot.lane.b32.xlu1 %v7140_v31, %s7363_s9  ;;  %v3422_v52 = vadd.f32 1.0, %v7140_v31 }
 0x830   : > { %7151 = vtanh.f32 %v6855_v6  ;;  %3491 = vrot.lane.b32.xlu0 %v7142_v12, %s7363_s9  ;;  %v3421_v30 = vadd.f32 1.0, %v7142_v12 }
 0x831   : > { %7153 = vtanh.f32 %v6856_v61  ;;  %v6536_v15 = vpop.f32.mrb[28].mxu1  ;;  %v8545_v8 = vmul.f32 0.5, %v3422_v52 }
 0x832   : > { %v7144_v43 = vpop.eup %7143  ;;  %v6857_v44 = vadd.f32 %v8482_v32, %v6536_v15  ;;  %v3374_v33 = vpop.f32.mrb[29].mxu1  ;;  %v8548_v31 = vmul.f32 0.5, %v3421_v30 }
 0x833   : > { %v7146_v1 = vpop.eup %7145  ;;  %v6858_v35 = vadd.f32 %v8482_v32, %v3374_v33  ;;  %3497 = vrot.lane.b32.xlu1 %v7144_v43, %s7363_s9  ;;  %v3424_v14 = vadd.f32 1.0, %v7144_v43 }
 0x834   : > { %7155 = vtanh.f32 %v6857_v44  ;;  %3495 = vrot.lane.b32.xlu0 %v7146_v1, %s7363_s9  ;;  %v3423_v37 = vadd.f32 1.0, %v7146_v1 }
 0x835   : > { %7157 = vtanh.f32 %v6858_v35  ;;  %v8553_v44 = vmul.f32 0.5, %v3424_v14 }
 0x836   : > { %v7148_v2 = vpop.eup %7147  ;;  %v8556_v43 = vmul.f32 0.5, %v3423_v37 }
 0x837   : > { %v7150_v53 = vpop.eup %7149  ;;  %3501 = vrot.lane.b32.xlu1 %v7148_v2, %s7363_s9  ;;  %v3426_v33 = vadd.f32 1.0, %v7148_v2 }
 0x838   : > { %3499 = vrot.lane.b32.xlu0 %v7150_v53, %s7363_s9  ;;  %v3425_v4 = vadd.f32 1.0, %v7150_v53 }
 0x83a   : > { %v7152_v25 = vpop.eup %7151  ;;  %v8564_v2 = vmul.f32 0.5, %v3425_v4 }
 0x83b   : > { %v7154_v45 = vpop.eup %7153  ;;  %3505 = vrot.lane.b32.xlu1 %v7152_v25, %s7363_s9  ;;  %v3428_v57 = vadd.f32 1.0, %v7152_v25 }
 0x83c   : > { %3503 = vrot.lane.b32.xlu0 %v7154_v45, %s7363_s9 }
 0x83e   : > { %v8514_v7 = vpop.eup %7155 }
 0x83f   : > { %v8516_v40 = vpop.eup %7157  ;;  %3509 = vrot.lane.b32.xlu1 %v8514_v7, %s7363_s9  ;;  %v3430_v38 = vadd.f32 1.0, %v8514_v7 }
 0x840   : > { %3507 = vrot.lane.b32.xlu0 %v8516_v40, %s7363_s9 }
 0x895   : > { %v3482_v48 = vpop.permute.xlu1 %3481 }
 0x896   : > { %v3528_v24 = vmul.f32 %v3482_v48, %v8522_v55  ;;  %v3480_v3 = vpop.permute.xlu0 %3479  ;;  %v8561_v48 = vmul.f32 0.5, %v3426_v33 }
 0x897   : > { %v3527_v22 = vmul.f32 %v3480_v3, %v8524_v20  ;;  %v3427_v3 = vadd.f32 1.0, %v7154_v45 }
 0x898   : > { %3561 = vrot.lane.b32.xlu1 %v3528_v24, %s7363_s9 }
 0x899   : > { %v3486_v9 = vpop.permute.xlu1 %3485  ;;  %3559 = vrot.lane.b32.xlu0 %v3527_v22, %s7363_s9  ;;  %v8573_v25 = vmul.f32 0.5, %v3427_v3 }
 0x89a   : > { %v3530_v42 = vmul.f32 %v3486_v9, %v8529_v41  ;;  %v3484_v13 = vpop.permute.xlu0 %3483  ;;  %v8569_v9 = vmul.f32 0.5, %v3428_v57 }
 0x89b   : > { %v3529_v5 = vmul.f32 %v3484_v13, %v8532_v18  ;;  %v3429_v13 = vadd.f32 1.0, %v8516_v40  ;;  %v3448_v40 = vmul.f32 %v8522_v55, %v8335_v0  ;;  %v3449_v0 = vmul.f32 %v8532_v18, %v8347_v19 }
 0x89c   : > { %3565 = vrot.lane.b32.xlu1 %v3530_v42, %s7363_s9 }
 0x89d   : > { %v3490_v26 = vpop.permute.xlu1 %3489  ;;  %3563 = vrot.lane.b32.xlu0 %v3529_v5, %s7363_s9  ;;  %v8582_v7 = vmul.f32 0.5, %v3429_v13 }
 0x89e   : > { %v3532_v17 = vmul.f32 %v3490_v26, %v8537_v49  ;;  %v3488_v62 = vpop.permute.xlu0 %3487  ;;  %v8579_v26 = vmul.f32 0.5, %v3430_v38 }
 0x89f   : > { %v3531_v63 = vmul.f32 %v3488_v62, %v8540_v56 }
 0x8a0   : > { %3569 = vrot.lane.b32.xlu1 %v3532_v17, %s7363_s9 }
 0x8a1   : > { %v3494_v6 = vpop.permute.xlu1 %3493  ;;  %3567 = vrot.lane.b32.xlu0 %v3531_v63, %s7363_s9 }
 0x8a2   : > { %v3534_v61 = vmul.f32 %v3494_v6, %v8545_v8  ;;  %v3492_v15 = vpop.permute.xlu0 %3491  ;;  %v3447_v6 = vmul.f32 %v8524_v20, %v8337_v47 }
 0x8a3   : > { %v3533_v12 = vmul.f32 %v3492_v15, %v8548_v31 }
 0x8a4   : > { %3573 = vrot.lane.b32.xlu1 %v3534_v61, %s7363_s9 }
 0x8a5   : > { %v3498_v35 = vpop.permute.xlu1 %3497  ;;  %3571 = vrot.lane.b32.xlu0 %v3533_v12, %s7363_s9  ;;  %v3450_v12 = vmul.f32 %v8529_v41, %v8345_v59  ;;  %v3451_v59 = vmul.f32 %v8540_v56, %v8357_v27 }
 0x8a6   : > { %v3536_v50 = vmul.f32 %v3498_v35, %v8553_v44  ;;  %v3496_v16 = vpop.permute.xlu0 %3495 }
 0x8a7   : > { %v3535_v1 = vmul.f32 %v3496_v16, %v8556_v43 }
 0x8a8   : > { %3577 = vrot.lane.b32.xlu1 %v3536_v50, %s7363_s9  ;;  %v3452_v50 = vmul.f32 %v8537_v49, %v8355_v10  ;;  %v3453_v10 = vmul.f32 %v8548_v31, %v8367_v11  ;;  %v3455_v11 = vmul.f32 %v8556_v43, %v8379_v29  ;;  %v3457_v29 = vmul.f32 %v8564_v2, %v8391_v58 }
 0x8a9   : > { %v3502_v24 = vpop.permute.xlu1 %3501  ;;  %3575 = vrot.lane.b32.xlu0 %v3535_v1, %s7363_s9  ;;  %v3459_v58 = vmul.f32 %v8573_v25, %v8403_v60  ;;  %v3461_v60 = vmul.f32 %v8582_v7, %v8415_v23 }
 0x8aa   : > { %v3538_v22 = vmul.f32 %v3502_v24, %v8561_v48  ;;  %v3500_v46 = vpop.permute.xlu0 %3499  ;;  %v3454_v24 = vmul.f32 %v8545_v8, %v8365_v21  ;;  %v3456_v21 = vmul.f32 %v8553_v44, %v8377_v28  ;;  %v3458_v28 = vmul.f32 %v8561_v48, %v8389_v39 }
 0x8ab   : > { %v3537_v53 = vmul.f32 %v3500_v46, %v8564_v2  ;;  %v3460_v39 = vmul.f32 %v8569_v9, %v8401_v51  ;;  %v3462_v51 = vmul.f32 %v8579_v26, %v8413_v34 }
 0x8ac   : > { %3581 = vrot.lane.b32.xlu1 %v3538_v22, %s7363_s9 }
 0x8ad   : > { %v3506_v42 = vpop.permute.xlu1 %3505  ;;  %3579 = vrot.lane.b32.xlu0 %v3537_v53, %s7363_s9 }
 0x8ae   : > { %v3540_v45 = vmul.f32 %v3506_v42, %v8569_v9  ;;  %v3504_v5 = vpop.permute.xlu0 %3503 }
 0x8af   : > { %v3539_v52 = vmul.f32 %v3504_v5, %v8573_v25 }
 0x8b0   : > { %3585 = vrot.lane.b32.xlu1 %v3540_v45, %s7363_s9 }
 0x8b1   : > { %v3510_v30 = vpop.permute.xlu1 %3509  ;;  %3583 = vrot.lane.b32.xlu0 %v3539_v52, %s7363_s9 }
 0x8b2   : > { %v3542_v17 = vmul.f32 %v3510_v30, %v8579_v26  ;;  %v3508_v62 = vpop.permute.xlu0 %3507 }
 0x8b3   : > { %v3541_v63 = vmul.f32 %v3508_v62, %v8582_v7 }
 0x8b4   : > { %3589 = vrot.lane.b32.xlu1 %v3542_v17, %s7363_s9 }
 0x8b5   : > { %3587 = vrot.lane.b32.xlu0 %v3541_v63, %s7363_s9 }
 0x90a   : > { %v3562_v14 = vpop.permute.xlu1 %3561 }
 0x90b   : > { %v8592_v37 = vadd.f32 %v3562_v14, %v3448_v40  ;;  %v3560_v61 = vpop.permute.xlu0 %3559 }
 0x90c   : > { %v8594_v15 = vadd.f32 %v3560_v61, %v3447_v6 }
 0x90d   : > { %7159 = vtanh.f32 %v8592_v37 }
 0x90e   : > { %7161 = vtanh.f32 %v8594_v15  ;;  %v3566_v33 = vpop.permute.xlu1 %3565 }
 0x90f   : > { %v8602_v35 = vadd.f32 %v3566_v33, %v3450_v12  ;;  %v3564_v4 = vpop.permute.xlu0 %3563 }
 0x910   : > { %v8604_v47 = vadd.f32 %v3564_v4, %v3449_v0 }
 0x911   : > { %7163 = vtanh.f32 %v8602_v35 }
 0x912   : > { %7165 = vtanh.f32 %v8604_v47  ;;  %v3570_v16 = vpop.permute.xlu1 %3569 }
 0x913   : > { %v8612_v1 = vadd.f32 %v3570_v16, %v3452_v50  ;;  %v3568_v57 = vpop.permute.xlu0 %3567 }
 0x914   : > { %v8614_v19 = vadd.f32 %v3568_v57, %v3451_v59 }
 0x915   : > { %7167 = vtanh.f32 %v8612_v1 }
 0x916   : > { %7169 = vtanh.f32 %v8614_v19  ;;  %v3574_v3 = vpop.permute.xlu1 %3573 }
 0x917   : > { %v7160_v22 = vpop.eup %7159  ;;  %v8622_v46 = vadd.f32 %v3574_v3, %v3454_v24  ;;  %v3572_v27 = vpop.permute.xlu0 %3571 }
 0x918   : > { %v7162_v53 = vpop.eup %7161  ;;  %v8624_v38 = vadd.f32 %v3572_v27, %v3453_v10  ;;  %3657 = vrot.lane.b32.xlu1 %v7160_v22, %s7363_s9 }
 0x919   : > { %7171 = vtanh.f32 %v8622_v46  ;;  %3655 = vrot.lane.b32.xlu0 %v7162_v53, %s7363_s9 }
 0x91a   : > { %7173 = vtanh.f32 %v8624_v38  ;;  %v3578_v42 = vpop.permute.xlu1 %3577 }
 0x91b   : > { %v7164_v13 = vpop.eup %7163  ;;  %v8634_v45 = vadd.f32 %v3578_v42, %v3456_v21  ;;  %v3576_v5 = vpop.permute.xlu0 %3575 }
 0x91c   : > { %v7166_v52 = vpop.eup %7165  ;;  %v8636_v30 = vadd.f32 %v3576_v5, %v3455_v11  ;;  %3661 = vrot.lane.b32.xlu1 %v7164_v13, %s7363_s9 }
 0x91d   : > { %7175 = vtanh.f32 %v8634_v45  ;;  %3659 = vrot.lane.b32.xlu0 %v7166_v52, %s7363_s9 }
 0x91e   : > { %7177 = vtanh.f32 %v8636_v30  ;;  %v3582_v17 = vpop.permute.xlu1 %3581 }
 0x91f   : > { %v7168_v62 = vpop.eup %7167  ;;  %v8646_v63 = vadd.f32 %v3582_v17, %v3458_v28  ;;  %v3580_v40 = vpop.permute.xlu0 %3579 }
 0x920   : > { %v7170_v14 = vpop.eup %7169  ;;  %v8648_v6 = vadd.f32 %v3580_v40, %v3457_v29  ;;  %3665 = vrot.lane.b32.xlu1 %v7168_v62, %s7363_s9 }
 0x921   : > { %7179 = vtanh.f32 %v8646_v63  ;;  %3663 = vrot.lane.b32.xlu0 %v7170_v14, %s7363_s9 }
 0x922   : > { %7181 = vtanh.f32 %v8648_v6  ;;  %v3586_v61 = vpop.permute.xlu1 %3585 }
 0x923   : > { %v7172_v12 = vpop.eup %7171  ;;  %v8658_v33 = vadd.f32 %v3586_v61, %v3460_v39  ;;  %v3584_v0 = vpop.permute.xlu0 %3583 }
 0x924   : > { %v7174_v4 = vpop.eup %7173  ;;  %v8660_v50 = vadd.f32 %v3584_v0, %v3459_v58  ;;  %3669 = vrot.lane.b32.xlu1 %v7172_v12, %s7363_s9 }
 0x925   : > { %7183 = vtanh.f32 %v8658_v33  ;;  %3667 = vrot.lane.b32.xlu0 %v7174_v4, %s7363_s9 }
 0x926   : > { %7185 = vtanh.f32 %v8660_v50  ;;  %v3590_v16 = vpop.permute.xlu1 %3589 }
 0x927   : > { %v7176_v59 = vpop.eup %7175  ;;  %v8670_v57 = vadd.f32 %v3590_v16, %v3462_v51  ;;  %v3588_v24 = vpop.permute.xlu0 %3587 }
 0x928   : > { %v7178_v3 = vpop.eup %7177  ;;  %v8672_v10 = vadd.f32 %v3588_v24, %v3461_v60  ;;  %3673 = vrot.lane.b32.xlu1 %v7176_v59, %s7363_s9 }
 0x929   : > { %7187 = vtanh.f32 %v8670_v57  ;;  %3671 = vrot.lane.b32.xlu0 %v7178_v3, %s7363_s9 }
 0x92a   : > { %7189 = vtanh.f32 %v8672_v10 }
 0x92b   : > { %v7180_v34 = vpop.eup %7179 }
 0x92c   : > { %v7182_v22 = vpop.eup %7181  ;;  %3677 = vrot.lane.b32.xlu1 %v7180_v34, %s7363_s9 }
 0x92d   : > { %3675 = vrot.lane.b32.xlu0 %v7182_v22, %s7363_s9 }
 0x92f   : > { %v7184_v23 = vpop.eup %7183 }
 0x930   : > { %v7186_v27 = vpop.eup %7185  ;;  %3681 = vrot.lane.b32.xlu1 %v7184_v23, %s7363_s9 }
 0x931   : > { %3679 = vrot.lane.b32.xlu0 %v7186_v27, %s7363_s9 }
 0x933   : > { %v7188_v53 = vpop.eup %7187 }
 0x934   : > { %v7190_v21 = vpop.eup %7189  ;;  %3685 = vrot.lane.b32.xlu1 %v7188_v53, %s7363_s9 }
 0x935   : > { %3683 = vrot.lane.b32.xlu0 %v7190_v21, %s7363_s9 }
 0x98a   : > { %v3658_v42 = vpop.permute.xlu1 %3657 }
 0x98b   : > { %v3704_v11 = vmul.f32 %v3658_v42, %v8522_v55  ;;  %v3656_v13 = vpop.permute.xlu0 %3655 }
 0x98c   : > { %v3703_v5 = vmul.f32 %v3656_v13, %v8524_v20 }
 0x98d   : > { %3737 = vrot.lane.b32.xlu1 %v3704_v11, %s7364_s14 }
 0x98e   : > { %v3662_v52 = vpop.permute.xlu1 %3661  ;;  %3735 = vrot.lane.b32.xlu0 %v3703_v5, %s7364_s14 }
 0x98f   : > { %v3706_v28 = vmul.f32 %v3662_v52, %v8529_v41  ;;  %v3660_v17 = vpop.permute.xlu0 %3659 }
 0x990   : > { %v3705_v29 = vmul.f32 %v3660_v17, %v8532_v18 }
 0x991   : > { %3741 = vrot.lane.b32.xlu1 %v3706_v28, %s7364_s14 }
 0x992   : > { %v3666_v62 = vpop.permute.xlu1 %3665  ;;  %3739 = vrot.lane.b32.xlu0 %v3705_v29, %s7364_s14 }
 0x993   : > { %v3708_v55 = vmul.f32 %v3666_v62, %v8537_v49  ;;  %v3664_v40 = vpop.permute.xlu0 %3663 }
 0x994   : > { %v3707_v20 = vmul.f32 %v3664_v40, %v8540_v56 }
 0x995   : > { %3745 = vrot.lane.b32.xlu1 %v3708_v55, %s7364_s14 }
 0x996   : > { %v3670_v14 = vpop.permute.xlu1 %3669  ;;  %3743 = vrot.lane.b32.xlu0 %v3707_v20, %s7364_s14 }
 0x997   : > { %v3710_v41 = vmul.f32 %v3670_v14, %v8545_v8  ;;  %v3668_v39 = vpop.permute.xlu0 %3667 }
 0x998   : > { %v3709_v18 = vmul.f32 %v3668_v39, %v8548_v31 }
 0x999   : > { %3749 = vrot.lane.b32.xlu1 %v3710_v41, %s7364_s14 }
 0x99a   : > { %v3674_v61 = vpop.permute.xlu1 %3673  ;;  %3747 = vrot.lane.b32.xlu0 %v3709_v18, %s7364_s14 }
 0x99b   : > { %v3712_v49 = vmul.f32 %v3674_v61, %v8553_v44  ;;  %v3672_v58 = vpop.permute.xlu0 %3671 }
 0x99c   : > { %v3711_v56 = vmul.f32 %v3672_v58, %v8556_v43 }
 0x99d   : > { %3753 = vrot.lane.b32.xlu1 %v3712_v49, %s7364_s14 }
 0x99e   : > { %v3678_v12 = vpop.permute.xlu1 %3677  ;;  %3751 = vrot.lane.b32.xlu0 %v3711_v56, %s7364_s14 }
 0x99f   : > { %v3714_v8 = vmul.f32 %v3678_v12, %v8561_v48  ;;  %v3676_v0 = vpop.permute.xlu0 %3675 }
 0x9a0   : > { %v3713_v31 = vmul.f32 %v3676_v0, %v8564_v2 }
 0x9a1   : > { %3757 = vrot.lane.b32.xlu1 %v3714_v8, %s7364_s14 }
 0x9a2   : > { %v3682_v4 = vpop.permute.xlu1 %3681  ;;  %3755 = vrot.lane.b32.xlu0 %v3713_v31, %s7364_s14 }
 0x9a3   : > { %v3716_v44 = vmul.f32 %v3682_v4, %v8569_v9  ;;  %v3680_v51 = vpop.permute.xlu0 %3679 }
 0x9a4   : > { %v3715_v43 = vmul.f32 %v3680_v51, %v8573_v25 }
 0x9a5   : > { %3761 = vrot.lane.b32.xlu1 %v3716_v44, %s7364_s14 }
 0x9a6   : > { %v3686_v16 = vpop.permute.xlu1 %3685  ;;  %3759 = vrot.lane.b32.xlu0 %v3715_v43, %s7364_s14 }
 0x9a7   : > { %v3718_v48 = vmul.f32 %v3686_v16, %v8579_v26  ;;  %v3684_v60 = vpop.permute.xlu0 %3683 }
 0x9a8   : > { %v3717_v2 = vmul.f32 %v3684_v60, %v8582_v7 }
 0x9a9   : > { %3765 = vrot.lane.b32.xlu1 %v3718_v48, %s7364_s14 }
 0x9aa   : > { %3763 = vrot.lane.b32.xlu0 %v3717_v2, %s7364_s14 }
 0x9ff   : > { %v3738_v59 = vpop.permute.xlu1 %3737 }
 0xa00   : > { %v3736_v24 = vpop.permute.xlu0 %3735 }
 0xa01   : > { %6545 = vmatprep.mubr.msk.f32.mxu1 %vm2112_vm5, %v3736_v24 }
 0xa02   : > { %6546 = vmatmul.mubr.msk.f32.vlgmr.msra.gmra.mrb[30].mxu1 %vm2112_vm5, %v3738_v59 }
 0xa03   : > { %v3742_v9 = vpop.permute.xlu1 %3741  ;;  %6756 = vmatpush3.bf16.msra.mxu1 %v7752_v36 }
 0xa04   : > { %v3740_v25 = vpop.permute.xlu0 %3739  ;;  %6758 = vmatprep.subr.bf16.mxu1 %v7832_v54 }
 0xa05   : > { %6548 = vmatprep.mubr.msk.f32.mxu1 %vm2112_vm5, %v3740_v25 }
 0xa06   : > { %6549 = vmatmul.mubr.msk.f32.gmra.mrb[32].mxu1 %vm2112_vm5, %v3742_v9 }
 0xa07   : > { %v3746_v26 = vpop.permute.xlu1 %3745  ;;  %6760 = vmatpush3.bf16.msra.mxu1 %v7832_v54 }
 0xa08   : > { %v3744_v7 = vpop.permute.xlu0 %3743 }
 0xa09   : > { %6551 = vmatprep.mubr.msk.f32.mxu1 %vm2112_vm5, %v3744_v7 }
 0xa0a   : > { %6552 = vmatmul.mubr.msk.f32.gmra.mrb[34].mxu1 %vm2112_vm5, %v3746_v26 }
 0xa0b   : > { %v3750_v3 = vpop.permute.xlu1 %3749 }
 0xa0c   : > { %v3748_v34 = vpop.permute.xlu0 %3747 }
 0xa0d   : > { %6554 = vmatprep.mubr.msk.f32.mxu1 %vm2112_vm5, %v3748_v34 }
 0xa0e   : > { %6555 = vmatmul.mubr.msk.f32.gmra.mrb[36].mxu1 %vm2112_vm5, %v3750_v3 }
 0xa0f   : > { %v3754_v36 = vpop.permute.xlu1 %3753 }
 0xa10   : > { %v3752_v22 = vpop.permute.xlu0 %3751 }
 0xa11   : > { %6557 = vmatprep.mubr.msk.f32.mxu1 %vm2112_vm5, %v3752_v22 }
 0xa12   : > { %6558 = vmatmul.mubr.msk.f32.gmra.mrb[38].mxu1 %vm2112_vm5, %v3754_v36 }
 0xa13   : > { %v3758_v23 = vpop.permute.xlu1 %3757 }
 0xa14   : > { %v3756_v27 = vpop.permute.xlu0 %3755 }
 0xa15   : > { %6560 = vmatprep.mubr.msk.f32.mxu1 %vm2112_vm5, %v3756_v27 }
 0xa16   : > { %6561 = vmatmul.mubr.msk.f32.gmra.mrb[40].mxu1 %vm2112_vm5, %v3758_v23 }
 0xa17   : > { %v3762_v54 = vpop.permute.xlu1 %3761 }
 0xa18   : > { %v3760_v53 = vpop.permute.xlu0 %3759 }
 0xa19   : > { %6563 = vmatprep.mubr.msk.f32.mxu1 %vm2112_vm5, %v3760_v53 }
 0xa1a   : > { %6564 = vmatmul.mubr.msk.f32.gmra.mrb[42].mxu1 %vm2112_vm5, %v3762_v54 }
 0xa1b   : > { %v3766_v42 = vpop.permute.xlu1 %3765 }
 0xa1c   : > { %v3764_v21 = vpop.permute.xlu0 %3763 }
 0xa1d   : > { %6566 = vmatprep.mubr.msk.f32.mxu1 %vm2112_vm5, %v3764_v21 }
 0xa1e   : > { %6567 = vmatmul.mubr.msk.f32.gmra.mrb[44].mxu1 %vm2112_vm5, %v3766_v42 }
 0xad5   : > { %v6547_v11 = vpop.f32.mrb[30].mxu1 }
 0xad6   : > { %v6859_v13 = vadd.f32 %v8482_v32, %v6547_v11  ;;  %v3865_v5 = vpop.f32.mrb[31].mxu1 }
 0xad7   : > { %v6860_v52 = vadd.f32 %v8482_v32, %v3865_v5 }
 0xad8   : > { %7191 = vtanh.f32 %v6859_v13 }
 0xad9   : > { %7193 = vtanh.f32 %v6860_v52  ;;  %v6550_v28 = vpop.f32.mrb[32].mxu1 }
 0xada   : > { %v6861_v17 = vadd.f32 %v8482_v32, %v6550_v28  ;;  %v3875_v29 = vpop.f32.mrb[33].mxu1 }
 0xadb   : > { %v6862_v62 = vadd.f32 %v8482_v32, %v3875_v29 }
 0xadc   : > { %7195 = vtanh.f32 %v6861_v17 }
 0xadd   : > { %7197 = vtanh.f32 %v6862_v62  ;;  %v6553_v55 = vpop.f32.mrb[34].mxu1 }
 0xade   : > { %v6863_v40 = vadd.f32 %v8482_v32, %v6553_v55  ;;  %v3885_v20 = vpop.f32.mrb[35].mxu1 }
 0xadf   : > { %v6864_v14 = vadd.f32 %v8482_v32, %v3885_v20 }
 0xae0   : > { %7199 = vtanh.f32 %v6863_v40 }
 0xae1   : > { %7201 = vtanh.f32 %v6864_v14  ;;  %v6556_v41 = vpop.f32.mrb[36].mxu1 }
 0xae2   : > { %v7192_v39 = vpop.eup %7191  ;;  %v6865_v18 = vadd.f32 %v8482_v32, %v6556_v41  ;;  %v3895_v61 = vpop.f32.mrb[37].mxu1 }
 0xae3   : > { %v7194_v49 = vpop.eup %7193  ;;  %v6866_v58 = vadd.f32 %v8482_v32, %v3895_v61  ;;  %4042 = vrot.lane.b32.xlu1 %v7192_v39, %s7363_s9  ;;  %v3977_v11 = vadd.f32 1.0, %v7192_v39 }
 0xae4   : > { %7203 = vtanh.f32 %v6865_v18  ;;  %4040 = vrot.lane.b32.xlu0 %v7194_v49, %s7363_s9  ;;  %v3976_v13 = vadd.f32 1.0, %v7194_v49 }
 0xae5   : > { %7205 = vtanh.f32 %v6866_v58  ;;  %v6559_v56 = vpop.f32.mrb[38].mxu1  ;;  %v8773_v5 = vmul.f32 0.5, %v3977_v11 }
 0xae6   : > { %v7196_v12 = vpop.eup %7195  ;;  %v6867_v8 = vadd.f32 %v8482_v32, %v6559_v56  ;;  %v3905_v0 = vpop.f32.mrb[39].mxu1  ;;  %v8775_v17 = vmul.f32 0.5, %v3976_v13 }
 0xae7   : > { %v7198_v31 = vpop.eup %7197  ;;  %v6868_v4 = vadd.f32 %v8482_v32, %v3905_v0  ;;  %4046 = vrot.lane.b32.xlu1 %v7196_v12, %s7363_s9  ;;  %v3979_v52 = vadd.f32 1.0, %v7196_v12 }
 0xae8   : > { %7207 = vtanh.f32 %v6867_v8  ;;  %4044 = vrot.lane.b32.xlu0 %v7198_v31, %s7363_s9  ;;  %v3978_v29 = vadd.f32 1.0, %v7198_v31 }
 0xae9   : > { %7209 = vtanh.f32 %v6868_v4  ;;  %v6562_v44 = vpop.f32.mrb[40].mxu1  ;;  %v8780_v20 = vmul.f32 0.5, %v3979_v52 }
 0xaea   : > { %v7200_v51 = vpop.eup %7199  ;;  %v6869_v43 = vadd.f32 %v8482_v32, %v6562_v44  ;;  %v3915_v16 = vpop.f32.mrb[41].mxu1  ;;  %v8783_v39 = vmul.f32 0.5, %v3978_v29 }
 0xaeb   : > { %v7202_v48 = vpop.eup %7201  ;;  %v6870_v60 = vadd.f32 %v8482_v32, %v3915_v16  ;;  %4050 = vrot.lane.b32.xlu1 %v7200_v51, %s7363_s9  ;;  %v3981_v14 = vadd.f32 1.0, %v7200_v51 }
 0xaec   : > { %7211 = vtanh.f32 %v6869_v43  ;;  %4048 = vrot.lane.b32.xlu0 %v7202_v48, %s7363_s9  ;;  %v3980_v18 = vadd.f32 1.0, %v7202_v48 }
 0xaed   : > { %7213 = vtanh.f32 %v6870_v60  ;;  %v6565_v2 = vpop.f32.mrb[42].mxu1  ;;  %v8788_v56 = vmul.f32 0.5, %v3981_v14 }
 0xaee   : > { %v7204_v59 = vpop.eup %7203  ;;  %v6871_v24 = vadd.f32 %v8482_v32, %v6565_v2  ;;  %v3925_v9 = vpop.f32.mrb[43].mxu1  ;;  %v8791_v0 = vmul.f32 0.5, %v3980_v18 }
 0xaef   : > { %v7206_v25 = vpop.eup %7205  ;;  %v6872_v26 = vadd.f32 %v8482_v32, %v3925_v9  ;;  %4054 = vrot.lane.b32.xlu1 %v7204_v59, %s7363_s9  ;;  %v3983_v12 = vadd.f32 1.0, %v7204_v59 }
 0xaf0   : > { %7215 = vtanh.f32 %v6871_v24  ;;  %4052 = vrot.lane.b32.xlu0 %v7206_v25, %s7363_s9  ;;  %v3982_v31 = vadd.f32 1.0, %v7206_v25 }
 0xaf1   : > { %7217 = vtanh.f32 %v6872_v26  ;;  %v6568_v7 = vpop.f32.mrb[44].mxu1  ;;  %v8796_v43 = vmul.f32 0.5, %v3983_v12 }
 0xaf2   : > { %v7208_v3 = vpop.eup %7207  ;;  %v6873_v34 = vadd.f32 %v8482_v32, %v6568_v7  ;;  %v3935_v36 = vpop.f32.mrb[45].mxu1  ;;  %v8799_v60 = vmul.f32 0.5, %v3982_v31 }
 0xaf3   : > { %v7210_v22 = vpop.eup %7209  ;;  %v6874_v23 = vadd.f32 %v8482_v32, %v3935_v36  ;;  %4058 = vrot.lane.b32.xlu1 %v7208_v3, %s7363_s9  ;;  %v3985_v16 = vadd.f32 1.0, %v7208_v3 }
 0xaf4   : > { %7219 = vtanh.f32 %v6873_v34  ;;  %4056 = vrot.lane.b32.xlu0 %v7210_v22, %s7363_s9  ;;  %v3984_v2 = vadd.f32 1.0, %v7210_v22 }
 0xaf5   : > { %7221 = vtanh.f32 %v6874_v23  ;;  %v8804_v25 = vmul.f32 0.5, %v3985_v16 }
 0xaf6   : > { %v7212_v27 = vpop.eup %7211  ;;  %v8807_v3 = vmul.f32 0.5, %v3984_v2  ;;  %v4011_v2 = vmul.f32 %v8780_v20, %v8602_v35  ;;  %v4012_v35 = vmul.f32 %v8791_v0, %v8614_v19 }
 0xaf7   : > { %v7214_v54 = vpop.eup %7213  ;;  %4062 = vrot.lane.b32.xlu1 %v7212_v27, %s7363_s9  ;;  %v3987_v26 = vadd.f32 1.0, %v7212_v27 }
 0xaf8   : > { %4060 = vrot.lane.b32.xlu0 %v7214_v54, %s7363_s9  ;;  %v3986_v34 = vadd.f32 1.0, %v7214_v54 }
 0xaf9   : > { %v8812_v11 = vmul.f32 0.5, %v3987_v26  ;;  %v4013_v26 = vmul.f32 %v8788_v56, %v8612_v1  ;;  %v4014_v1 = vmul.f32 %v8799_v60, %v8624_v38  ;;  %v4016_v38 = vmul.f32 %v8807_v3, %v8636_v30 }
 0xafa   : > { %v7216_v53 = vpop.eup %7215  ;;  %v8815_v27 = vmul.f32 0.5, %v3986_v34 }
 0xafb   : > { %v7218_v21 = vpop.eup %7217  ;;  %4066 = vrot.lane.b32.xlu1 %v7216_v53, %s7363_s9  ;;  %v3989_v13 = vadd.f32 1.0, %v7216_v53 }
 0xafc   : > { %4064 = vrot.lane.b32.xlu0 %v7218_v21, %s7363_s9  ;;  %v4018_v30 = vmul.f32 %v8815_v27, %v8648_v6 }
 0xafe   : > { %v8765_v42 = vpop.eup %7219 }
 0xaff   : > { %v8767_v32 = vpop.eup %7221  ;;  %4070 = vrot.lane.b32.xlu1 %v8765_v42, %s7363_s9 }
 0xb00   : > { %4068 = vrot.lane.b32.xlu0 %v8767_v32, %s7363_s9 }
 0xb55   : > { %v4043_v28 = vpop.permute.xlu1 %4042 }
 0xb56   : > { %v4089_v62 = vmul.f32 %v4043_v28, %v8773_v5  ;;  %v4041_v55 = vpop.permute.xlu0 %4040  ;;  %v3988_v28 = vadd.f32 1.0, %v7218_v21 }
 0xb57   : > { %v4088_v40 = vmul.f32 %v4041_v55, %v8775_v17  ;;  %v8820_v55 = vmul.f32 0.5, %v3989_v13 }
 0xb58   : > { %4122 = vrot.lane.b32.xlu1 %v4089_v62, %s7363_s9  ;;  %v8824_v53 = vmul.f32 0.5, %v3988_v28 }
 0xb59   : > { %v4047_v41 = vpop.permute.xlu1 %4046  ;;  %4120 = vrot.lane.b32.xlu0 %v4088_v40, %s7363_s9  ;;  %v3991_v40 = vadd.f32 1.0, %v8765_v42 }
 0xb5a   : > { %v4091_v61 = vmul.f32 %v4047_v41, %v8780_v20  ;;  %v4045_v49 = vpop.permute.xlu0 %4044  ;;  %v3990_v41 = vadd.f32 1.0, %v8767_v32  ;;  %v4009_v32 = vmul.f32 %v8773_v5, %v8592_v37  ;;  %v4010_v37 = vmul.f32 %v8783_v39, %v8604_v47 }
 0xb5b   : > { %v4090_v58 = vmul.f32 %v4045_v49, %v8783_v39  ;;  %v8830_v49 = vmul.f32 0.5, %v3991_v40  ;;  %v4020_v6 = vmul.f32 %v8824_v53, %v8660_v50 }
 0xb5c   : > { %4126 = vrot.lane.b32.xlu1 %v4091_v61, %s7363_s9  ;;  %v8833_v42 = vmul.f32 0.5, %v3990_v41 }
 0xb5d   : > { %v4051_v8 = vpop.permute.xlu1 %4050  ;;  %4124 = vrot.lane.b32.xlu0 %v4090_v58, %s7363_s9 }
 0xb5e   : > { %v4093_v4 = vmul.f32 %v4051_v8, %v8788_v56  ;;  %v4049_v44 = vpop.permute.xlu0 %4048  ;;  %v4022_v50 = vmul.f32 %v8833_v42, %v8672_v10 }
 0xb5f   : > { %v4092_v51 = vmul.f32 %v4049_v44, %v8791_v0  ;;  %v4008_v44 = vmul.f32 %v8775_v17, %v8594_v15 }
 0xb60   : > { %4130 = vrot.lane.b32.xlu1 %v4093_v4, %s7363_s9 }
 0xb61   : > { %v4055_v48 = vpop.permute.xlu1 %4054  ;;  %4128 = vrot.lane.b32.xlu0 %v4092_v51, %s7363_s9 }
 0xb62   : > { %v4095_v59 = vmul.f32 %v4055_v48, %v8796_v43  ;;  %v4053_v24 = vpop.permute.xlu0 %4052 }
 0xb63   : > { %v4094_v9 = vmul.f32 %v4053_v24, %v8799_v60 }
 0xb64   : > { %4134 = vrot.lane.b32.xlu1 %v4095_v59, %s7363_s9 }
 0xb65   : > { %v4059_v7 = vpop.permute.xlu1 %4058  ;;  %4132 = vrot.lane.b32.xlu0 %v4094_v9, %s7363_s9 }
 0xb66   : > { %v4097_v36 = vmul.f32 %v4059_v7, %v8804_v25  ;;  %v4057_v23 = vpop.permute.xlu0 %4056 }
 0xb67   : > { %v4096_v22 = vmul.f32 %v4057_v23, %v8807_v3  ;;  %v4015_v23 = vmul.f32 %v8796_v43, %v8622_v46  ;;  %v4017_v46 = vmul.f32 %v8804_v25, %v8634_v45  ;;  %v4019_v45 = vmul.f32 %v8812_v11, %v8646_v63 }
 0xb68   : > { %4138 = vrot.lane.b32.xlu1 %v4097_v36, %s7363_s9  ;;  %v4021_v63 = vmul.f32 %v8820_v55, %v8658_v33  ;;  %v4023_v33 = vmul.f32 %v8830_v49, %v8670_v57 }
 0xb69   : > { %v4063_v52 = vpop.permute.xlu1 %4062  ;;  %4136 = vrot.lane.b32.xlu0 %v4096_v22, %s7363_s9 }
 0xb6a   : > { %v4099_v29 = vmul.f32 %v4063_v52, %v8812_v11  ;;  %v4061_v62 = vpop.permute.xlu0 %4060 }
 0xb6b   : > { %v4098_v54 = vmul.f32 %v4061_v62, %v8815_v27 }
 0xb6c   : > { %4142 = vrot.lane.b32.xlu1 %v4099_v29, %s7363_s9 }
 0xb6d   : > { %v4067_v14 = vpop.permute.xlu1 %4066  ;;  %4140 = vrot.lane.b32.xlu0 %v4098_v54, %s7363_s9 }
 0xb6e   : > { %v4101_v21 = vmul.f32 %v4067_v14, %v8820_v55  ;;  %v4065_v18 = vpop.permute.xlu0 %4064 }
 0xb6f   : > { %v4100_v61 = vmul.f32 %v4065_v18, %v8824_v53 }
 0xb70   : > { %4146 = vrot.lane.b32.xlu1 %v4101_v21, %s7363_s9 }
 0xb71   : > { %v4071_v58 = vpop.permute.xlu1 %4070  ;;  %4144 = vrot.lane.b32.xlu0 %v4100_v61, %s7363_s9 }
 0xb72   : > { %v4103_v12 = vmul.f32 %v4071_v58, %v8830_v49  ;;  %v4069_v8 = vpop.permute.xlu0 %4068 }
 0xb73   : > { %v4102_v31 = vmul.f32 %v4069_v8, %v8833_v42 }
 0xb74   : > { %4150 = vrot.lane.b32.xlu1 %v4103_v12, %s7363_s9 }
 0xb75   : > { %4148 = vrot.lane.b32.xlu0 %v4102_v31, %s7363_s9 }
 0xbca   : > { %v4123_v4 = vpop.permute.xlu1 %4122 }
 0xbcb   : > { %v8843_v51 = vadd.f32 %v4123_v4, %v4009_v32  ;;  %v4121_v16 = vpop.permute.xlu0 %4120 }
 0xbcc   : > { %v8845_v48 = vadd.f32 %v4121_v16, %v4008_v44 }
 0xbcd   : > { %7223 = vtanh.f32 %v8843_v51 }
 0xbce   : > { %7225 = vtanh.f32 %v8845_v48  ;;  %v4127_v59 = vpop.permute.xlu1 %4126 }
 0xbcf   : > { %v8853_v24 = vadd.f32 %v4127_v59, %v4011_v2  ;;  %v4125_v9 = vpop.permute.xlu0 %4124 }
 0xbd0   : > { %v8855_v15 = vadd.f32 %v4125_v9, %v4010_v37 }
 0xbd1   : > { %7227 = vtanh.f32 %v8853_v24 }
 0xbd2   : > { %7229 = vtanh.f32 %v8855_v15  ;;  %v4131_v7 = vpop.permute.xlu1 %4130 }
 0xbd3   : > { %v8863_v34 = vadd.f32 %v4131_v7, %v4013_v26  ;;  %v4129_v36 = vpop.permute.xlu0 %4128 }
 0xbd4   : > { %v8865_v47 = vadd.f32 %v4129_v36, %v4012_v35 }
 0xbd5   : > { %7231 = vtanh.f32 %v8863_v34 }
 0xbd6   : > { %7233 = vtanh.f32 %v8865_v47  ;;  %v4135_v22 = vpop.permute.xlu1 %4134 }
 0xbd7   : > { %v7224_v13 = vpop.eup %7223  ;;  %v8873_v52 = vadd.f32 %v4135_v22, %v4015_v23  ;;  %v4133_v19 = vpop.permute.xlu0 %4132 }
 0xbd8   : > { %v7226_v28 = vpop.eup %7225  ;;  %v8875_v29 = vadd.f32 %v4133_v19, %v4014_v1  ;;  %4218 = vrot.lane.b32.xlu1 %v7224_v13, %s7363_s9 }
 0xbd9   : > { %7235 = vtanh.f32 %v8873_v52  ;;  %4216 = vrot.lane.b32.xlu0 %v7226_v28, %s7363_s9 }
 0xbda   : > { %7237 = vtanh.f32 %v8875_v29  ;;  %v4139_v62 = vpop.permute.xlu1 %4138 }
 0xbdb   : > { %v7228_v54 = vpop.eup %7227  ;;  %v8885_v40 = vadd.f32 %v4139_v62, %v4017_v46  ;;  %v4137_v14 = vpop.permute.xlu0 %4136 }
 0xbdc   : > { %v7230_v41 = vpop.eup %7229  ;;  %v8887_v21 = vadd.f32 %v4137_v14, %v4016_v38  ;;  %4222 = vrot.lane.b32.xlu1 %v7228_v54, %s7363_s9 }
 0xbdd   : > { %7239 = vtanh.f32 %v8885_v40  ;;  %4220 = vrot.lane.b32.xlu0 %v7230_v41, %s7363_s9 }
 0xbde   : > { %7241 = vtanh.f32 %v8887_v21  ;;  %v4143_v18 = vpop.permute.xlu1 %4142 }
 0xbdf   : > { %v7232_v61 = vpop.eup %7231  ;;  %v8897_v58 = vadd.f32 %v4143_v18, %v4019_v45  ;;  %v4141_v12 = vpop.permute.xlu0 %4140 }
 0xbe0   : > { %v7234_v8 = vpop.eup %7233  ;;  %v8899_v31 = vadd.f32 %v4141_v12, %v4018_v30  ;;  %4226 = vrot.lane.b32.xlu1 %v7232_v61, %s7363_s9 }
 0xbe1   : > { %7243 = vtanh.f32 %v8897_v58  ;;  %4224 = vrot.lane.b32.xlu0 %v7234_v8, %s7363_s9 }
 0xbe2   : > { %7245 = vtanh.f32 %v8899_v31  ;;  %v4147_v32 = vpop.permute.xlu1 %4146 }
 0xbe3   : > { %v7236_v4 = vpop.eup %7235  ;;  %v8909_v44 = vadd.f32 %v4147_v32, %v4021_v63  ;;  %v4145_v16 = vpop.permute.xlu0 %4144 }
 0xbe4   : > { %v7238_v2 = vpop.eup %7237  ;;  %v8911_v59 = vadd.f32 %v4145_v16, %v4020_v6  ;;  %4230 = vrot.lane.b32.xlu1 %v7236_v4, %s7363_s9 }
 0xbe5   : > { %7247 = vtanh.f32 %v8909_v44  ;;  %4228 = vrot.lane.b32.xlu0 %v7238_v2, %s7363_s9 }
 0xbe6   : > { %7249 = vtanh.f32 %v8911_v59  ;;  %v4151_v37 = vpop.permute.xlu1 %4150 }
 0xbe7   : > { %v7240_v9 = vpop.eup %7239  ;;  %v8921_v26 = vadd.f32 %v4151_v37, %v4023_v33  ;;  %v4149_v7 = vpop.permute.xlu0 %4148 }
 0xbe8   : > { %v7242_v35 = vpop.eup %7241  ;;  %v8923_v36 = vadd.f32 %v4149_v7, %v4022_v50  ;;  %4234 = vrot.lane.b32.xlu1 %v7240_v9, %s7363_s9 }
 0xbe9   : > { %7251 = vtanh.f32 %v8921_v26  ;;  %4232 = vrot.lane.b32.xlu0 %v7242_v35, %s7363_s9 }
 0xbea   : > { %7253 = vtanh.f32 %v8923_v36 }
 0xbeb   : > { %v7244_v57 = vpop.eup %7243 }
 0xbec   : > { %v7246_v23 = vpop.eup %7245  ;;  %4238 = vrot.lane.b32.xlu1 %v7244_v57, %s7363_s9 }
 0xbed   : > { %4236 = vrot.lane.b32.xlu0 %v7246_v23, %s7363_s9 }
 0xbef   : > { %v7248_v10 = vpop.eup %7247 }
 0xbf0   : > { %v7250_v22 = vpop.eup %7249  ;;  %4242 = vrot.lane.b32.xlu1 %v7248_v10, %s7363_s9 }
 0xbf1   : > { %4240 = vrot.lane.b32.xlu0 %v7250_v22, %s7363_s9 }
 0xbf3   : > { %v7252_v1 = vpop.eup %7251 }
 0xbf4   : > { %v7254_v13 = vpop.eup %7253  ;;  %4246 = vrot.lane.b32.xlu1 %v7252_v1, %s7363_s9 }
 0xbf5   : > { %4244 = vrot.lane.b32.xlu0 %v7254_v13, %s7363_s9 }
 0xc4a   : > { %v4219_v19 = vpop.permute.xlu1 %4218 }
 0xc4b   : > { %v4265_v28 = vmul.f32 %v4219_v19, %v8773_v5  ;;  %v4217_v46 = vpop.permute.xlu0 %4216 }
 0xc4c   : > { %v4264_v62 = vmul.f32 %v4217_v46, %v8775_v17 }
 0xc4d   : > { %4298 = vrot.lane.b32.xlu1 %v4265_v28, %s7364_s14  ;;  %v8986_v28 = vld [vmem:[%s9333_s1 + $0xd9] ss:$0 sm:$0xff] }
 0xc4e   : > { %v4223_v38 = vpop.permute.xlu1 %4222  ;;  %4296 = vrot.lane.b32.xlu0 %v4264_v62, %s7364_s14 }
 0xc4f   : > { %v4267_v54 = vmul.f32 %v4223_v38, %v8780_v20  ;;  %v4221_v14 = vpop.permute.xlu0 %4220 }
 0xc50   : > { %v4266_v41 = vmul.f32 %v4221_v14, %v8783_v39 }
 0xc51   : > { %4302 = vrot.lane.b32.xlu1 %v4267_v54, %s7364_s14 }
 0xc52   : > { %v4227_v45 = vpop.permute.xlu1 %4226  ;;  %4300 = vrot.lane.b32.xlu0 %v4266_v41, %s7364_s14 }
 0xc53   : > { %v4269_v5 = vmul.f32 %v4227_v45, %v8788_v56  ;;  %v4225_v18 = vpop.permute.xlu0 %4224 }
 0xc54   : > { %v4268_v17 = vmul.f32 %v4225_v18, %v8791_v0 }
 0xc55   : > { %4306 = vrot.lane.b32.xlu1 %v4269_v5, %s7364_s14 }
 0xc56   : > { %v4231_v30 = vpop.permute.xlu1 %4230  ;;  %4304 = vrot.lane.b32.xlu0 %v4268_v17, %s7364_s14 }
 0xc57   : > { %v4271_v20 = vmul.f32 %v4231_v30, %v8796_v43  ;;  %v4229_v61 = vpop.permute.xlu0 %4228 }
 0xc58   : > { %v4270_v39 = vmul.f32 %v4229_v61, %v8799_v60 }
 0xc59   : > { %4310 = vrot.lane.b32.xlu1 %v4271_v20, %s7364_s14 }
 0xc5a   : > { %v4235_v12 = vpop.permute.xlu1 %4234  ;;  %4308 = vrot.lane.b32.xlu0 %v4270_v39, %s7364_s14 }
 0xc5b   : > { %v4273_v56 = vmul.f32 %v4235_v12, %v8804_v25  ;;  %v4233_v8 = vpop.permute.xlu0 %4232 }
 0xc5c   : > { %v4272_v0 = vmul.f32 %v4233_v8, %v8807_v3 }
 0xc5d   : > { %4314 = vrot.lane.b32.xlu1 %v4273_v56, %s7364_s14 }
 0xc5e   : > { %v4239_v63 = vpop.permute.xlu1 %4238  ;;  %4312 = vrot.lane.b32.xlu0 %v4272_v0, %s7364_s14 }
 0xc5f   : > { %v4275_v43 = vmul.f32 %v4239_v63, %v8812_v11  ;;  %v4237_v32 = vpop.permute.xlu0 %4236 }
 0xc60   : > { %v4274_v60 = vmul.f32 %v4237_v32, %v8815_v27 }
 0xc61   : > { %4318 = vrot.lane.b32.xlu1 %v4275_v43, %s7364_s14 }
 0xc62   : > { %v4243_v6 = vpop.permute.xlu1 %4242  ;;  %4316 = vrot.lane.b32.xlu0 %v4274_v60, %s7364_s14 }
 0xc63   : > { %v4277_v25 = vmul.f32 %v4243_v6, %v8820_v55  ;;  %v4241_v4 = vpop.permute.xlu0 %4240 }
 0xc64   : > { %v4276_v3 = vmul.f32 %v4241_v4, %v8824_v53 }
 0xc65   : > { %4322 = vrot.lane.b32.xlu1 %v4277_v25, %s7364_s14 }
 0xc66   : > { %v4247_v16 = vpop.permute.xlu1 %4246  ;;  %4320 = vrot.lane.b32.xlu0 %v4276_v3, %s7364_s14 }
 0xc67   : > { %v4279_v11 = vmul.f32 %v4247_v16, %v8830_v49  ;;  %v4245_v2 = vpop.permute.xlu0 %4244 }
 0xc68   : > { %v4278_v27 = vmul.f32 %v4245_v2, %v8833_v42 }
 0xc69   : > { %4326 = vrot.lane.b32.xlu1 %v4279_v11, %s7364_s14 }
 0xc6a   : > { %4324 = vrot.lane.b32.xlu0 %v4278_v27, %s7364_s14 }
 0xcbf   : > { %v4299_v33 = vpop.permute.xlu1 %4298 }
 0xcc0   : > { %v4297_v37 = vpop.permute.xlu0 %4296 }
 0xcc1   : > { %6577 = vmatprep.mubr.msk.f32.mxu1 %vm2112_vm5, %v4297_v37 }
 0xcc2   : > { %6578 = vmatmul.mubr.msk.f32.vlgmr.msra.gmra.mrb[46].mxu1 %vm2112_vm5, %v4299_v33 }
 0xcc3   : > { %v4303_v55 = vpop.permute.xlu1 %4302 }
 0xcc4   : > { %v4301_v53 = vpop.permute.xlu0 %4300 }
 0xcc5   : > { %6580 = vmatprep.mubr.msk.f32.mxu1 %vm2112_vm5, %v4301_v53 }
 0xcc6   : > { %6581 = vmatmul.mubr.msk.f32.gmra.mrb[48].mxu1 %vm2112_vm5, %v4303_v55 }
 0xcc7   : > { %v4307_v49 = vpop.permute.xlu1 %4306 }
 0xcc8   : > { %v4305_v50 = vpop.permute.xlu0 %4304 }
 0xcc9   : > { %6583 = vmatprep.mubr.msk.f32.mxu1 %vm2112_vm5, %v4305_v50 }
 0xcca   : > { %6584 = vmatmul.mubr.msk.f32.gmra.mrb[50].mxu1 %vm2112_vm5, %v4307_v49 }
 0xccb   : > { %v4311_v42 = vpop.permute.xlu1 %4310 }
 0xccc   : > { %v4309_v9 = vpop.permute.xlu0 %4308 }
 0xccd   : > { %6586 = vmatprep.mubr.msk.f32.mxu1 %vm2112_vm5, %v4309_v9 }
 0xcce   : > { %6587 = vmatmul.mubr.msk.f32.gmra.mrb[52].mxu1 %vm2112_vm5, %v4311_v42 }
 0xccf   : > { %v4315_v7 = vpop.permute.xlu1 %4314 }
 0xcd0   : > { %v4313_v35 = vpop.permute.xlu0 %4312 }
 0xcd1   : > { %6589 = vmatprep.mubr.msk.f32.mxu1 %vm2112_vm5, %v4313_v35 }
 0xcd2   : > { %6590 = vmatmul.mubr.msk.f32.gmra.mrb[54].mxu1 %vm2112_vm5, %v4315_v7 }
 0xcd3   : > { %v4319_v57 = vpop.permute.xlu1 %4318 }
 0xcd4   : > { %v4317_v23 = vpop.permute.xlu0 %4316 }
 0xcd5   : > { %6592 = vmatprep.mubr.msk.f32.mxu1 %vm2112_vm5, %v4317_v23 }
 0xcd6   : > { %6593 = vmatmul.mubr.msk.f32.gmra.mrb[56].mxu1 %vm2112_vm5, %v4319_v57 }
 0xcd7   : > { %v4323_v10 = vpop.permute.xlu1 %4322 }
 0xcd8   : > { %v4321_v22 = vpop.permute.xlu0 %4320 }
 0xcd9   : > { %6595 = vmatprep.mubr.msk.f32.mxu1 %vm2112_vm5, %v4321_v22 }
 0xcda   : > { %6596 = vmatmul.mubr.msk.f32.gmra.mrb[58].mxu1 %vm2112_vm5, %v4323_v10 }
 0xcdb   : > { %v4327_v13 = vpop.permute.xlu1 %4326 }
 0xcdc   : > { %v4325_v1 = vpop.permute.xlu0 %4324 }
 0xcdd   : > { %6598 = vmatprep.mubr.msk.f32.mxu1 %vm2112_vm5, %v4325_v1 }
 0xcde   : > { %6599 = vmatmul.mubr.msk.f32.gmra.mrb[60].mxu1 %vm2112_vm5, %v4327_v13 }
 0xd95   : > { %v6579_v19 = vpop.f32.mrb[46].mxu1 }
 0xd96   : > { %v6875_v46 = vadd.f32 %v8986_v28, %v6579_v19  ;;  %v4426_v62 = vpop.f32.mrb[47].mxu1 }
 0xd97   : > { %v6876_v38 = vadd.f32 %v8986_v28, %v4426_v62 }
 0xd98   : > { %7255 = vtanh.f32 %v6875_v46 }
 0xd99   : > { %7257 = vtanh.f32 %v6876_v38  ;;  %v6582_v54 = vpop.f32.mrb[48].mxu1 }
 0xd9a   : > { %v6877_v14 = vadd.f32 %v8986_v28, %v6582_v54  ;;  %v4436_v41 = vpop.f32.mrb[49].mxu1 }
 0xd9b   : > { %v6878_v45 = vadd.f32 %v8986_v28, %v4436_v41 }
 0xd9c   : > { %7259 = vtanh.f32 %v6877_v14 }
 0xd9d   : > { %7261 = vtanh.f32 %v6878_v45  ;;  %v6585_v5 = vpop.f32.mrb[50].mxu1 }
 0xd9e   : > { %v6879_v18 = vadd.f32 %v8986_v28, %v6585_v5  ;;  %v4446_v17 = vpop.f32.mrb[51].mxu1 }
 0xd9f   : > { %v6880_v30 = vadd.f32 %v8986_v28, %v4446_v17 }
 0xda0   : > { %7263 = vtanh.f32 %v6879_v18 }
 0xda1   : > { %7265 = vtanh.f32 %v6880_v30  ;;  %v6588_v20 = vpop.f32.mrb[52].mxu1 }
 0xda2   : > { %v7256_v61 = vpop.eup %7255  ;;  %v6881_v39 = vadd.f32 %v8986_v28, %v6588_v20  ;;  %v4456_v12 = vpop.f32.mrb[53].mxu1 }
 0xda3   : > { %v7258_v56 = vpop.eup %7257  ;;  %v6882_v8 = vadd.f32 %v8986_v28, %v4456_v12  ;;  %4603 = vrot.lane.b32.xlu1 %v7256_v61, %s7363_s9 }
 0xda4   : > { %7267 = vtanh.f32 %v6881_v39  ;;  %4601 = vrot.lane.b32.xlu0 %v7258_v56, %s7363_s9  ;;  %v4537_v46 = vadd.f32 1.0, %v7258_v56 }
 0xda5   : > { %7269 = vtanh.f32 %v6882_v8  ;;  %v6591_v0 = vpop.f32.mrb[54].mxu1 }
 0xda6   : > { %v7260_v63 = vpop.eup %7259  ;;  %v6883_v43 = vadd.f32 %v8986_v28, %v6591_v0  ;;  %v4466_v32 = vpop.f32.mrb[55].mxu1  ;;  %v9028_v14 = vmul.f32 0.5, %v4537_v46 }
 0xda7   : > { %v7262_v60 = vpop.eup %7261  ;;  %v6884_v6 = vadd.f32 %v8986_v28, %v4466_v32  ;;  %4607 = vrot.lane.b32.xlu1 %v7260_v63, %s7363_s9  ;;  %v4540_v38 = vadd.f32 1.0, %v7260_v63 }
 0xda8   : > { %7271 = vtanh.f32 %v6883_v43  ;;  %4605 = vrot.lane.b32.xlu0 %v7262_v60, %s7363_s9  ;;  %v4539_v41 = vadd.f32 1.0, %v7262_v60 }
 0xda9   : > { %7273 = vtanh.f32 %v6884_v6  ;;  %v6594_v25 = vpop.f32.mrb[56].mxu1  ;;  %v9033_v17 = vmul.f32 0.5, %v4540_v38 }
 0xdaa   : > { %v7264_v4 = vpop.eup %7263  ;;  %v6885_v3 = vadd.f32 %v8986_v28, %v6594_v25  ;;  %v4476_v16 = vpop.f32.mrb[57].mxu1 }
 0xdab   : > { %v7266_v11 = vpop.eup %7265  ;;  %v6886_v2 = vadd.f32 %v8986_v28, %v4476_v16  ;;  %4611 = vrot.lane.b32.xlu1 %v7264_v4, %s7363_s9  ;;  %v4542_v30 = vadd.f32 1.0, %v7264_v4 }
 0xdac   : > { %7275 = vtanh.f32 %v6885_v3  ;;  %4609 = vrot.lane.b32.xlu0 %v7266_v11, %s7363_s9  ;;  %v4541_v39 = vadd.f32 1.0, %v7266_v11 }
 0xdad   : > { %7277 = vtanh.f32 %v6886_v2  ;;  %v6597_v27 = vpop.f32.mrb[58].mxu1  ;;  %v9041_v0 = vmul.f32 0.5, %v4542_v30 }
 0xdae   : > { %v7268_v33 = vpop.eup %7267  ;;  %v6887_v37 = vadd.f32 %v8986_v28, %v6597_v27  ;;  %v4486_v55 = vpop.f32.mrb[59].mxu1  ;;  %v9044_v32 = vmul.f32 0.5, %v4541_v39 }
 0xdaf   : > { %v7270_v53 = vpop.eup %7269  ;;  %v6888_v49 = vadd.f32 %v8986_v28, %v4486_v55  ;;  %4615 = vrot.lane.b32.xlu1 %v7268_v33, %s7363_s9  ;;  %v4544_v63 = vadd.f32 1.0, %v7268_v33 }
 0xdb0   : > { %7279 = vtanh.f32 %v6887_v37  ;;  %4613 = vrot.lane.b32.xlu0 %v7270_v53, %s7363_s9  ;;  %v4543_v60 = vadd.f32 1.0, %v7270_v53 }
 0xdb1   : > { %7281 = vtanh.f32 %v6888_v49  ;;  %v6600_v50 = vpop.f32.mrb[60].mxu1  ;;  %v9049_v3 = vmul.f32 0.5, %v4544_v63 }
 0xdb2   : > { %v7272_v42 = vpop.eup %7271  ;;  %v6889_v9 = vadd.f32 %v8986_v28, %v6600_v50  ;;  %v4496_v7 = vpop.f32.mrb[61].mxu1  ;;  %v9052_v2 = vmul.f32 0.5, %v4543_v60 }
 0xdb3   : > { %v7274_v35 = vpop.eup %7273  ;;  %v6890_v57 = vadd.f32 %v8986_v28, %v4496_v7  ;;  %4619 = vrot.lane.b32.xlu1 %v7272_v42, %s7363_s9  ;;  %v4538_v28 = vadd.f32 1.0, %v7256_v61  ;;  %v9036_v61 = vmul.f32 0.5, %v4539_v41  ;;  %v4546_v16 = vadd.f32 1.0, %v7272_v42 }
 0xdb4   : > { %7283 = vtanh.f32 %v6889_v9  ;;  %4617 = vrot.lane.b32.xlu0 %v7274_v35, %s7363_s9  ;;  %v4545_v27 = vadd.f32 1.0, %v7274_v35 }
 0xdb5   : > { %7285 = vtanh.f32 %v6890_v57  ;;  %v9026_v62 = vmul.f32 0.5, %v4538_v28  ;;  %v9057_v53 = vmul.f32 0.5, %v4546_v16 }
 0xdb6   : > { %v7276_v23 = vpop.eup %7275  ;;  %v9060_v42 = vmul.f32 0.5, %v4545_v27  ;;  %v4572_v27 = vmul.f32 %v9033_v17, %v8853_v24 }
 0xdb7   : > { %v7278_v10 = vpop.eup %7277  ;;  %4623 = vrot.lane.b32.xlu1 %v7276_v23, %s7363_s9  ;;  %v4548_v49 = vadd.f32 1.0, %v7276_v23 }
 0xdb8   : > { %4621 = vrot.lane.b32.xlu0 %v7278_v10, %s7363_s9  ;;  %v4547_v9 = vadd.f32 1.0, %v7278_v10 }
 0xdb9   : > { %v9065_v28 = vmul.f32 0.5, %v4548_v49 }
 0xdba   : > { %v7280_v22 = vpop.eup %7279  ;;  %v9068_v23 = vmul.f32 0.5, %v4547_v9  ;;  %v4573_v9 = vmul.f32 %v9044_v32, %v8865_v47  ;;  %v4578_v47 = vmul.f32 %v9057_v53, %v8885_v40 }
 0xdbb   : > { %v7282_v1 = vpop.eup %7281  ;;  %4627 = vrot.lane.b32.xlu1 %v7280_v22, %s7363_s9  ;;  %v4550_v46 = vadd.f32 1.0, %v7280_v22 }
 0xdbc   : > { %4625 = vrot.lane.b32.xlu0 %v7282_v1, %s7363_s9 }
 0xdbe   : > { %v9018_v13 = vpop.eup %7283 }
 0xdbf   : > { %v9020_v19 = vpop.eup %7285  ;;  %4631 = vrot.lane.b32.xlu1 %v9018_v13, %s7363_s9 }
 0xdc0   : > { %4629 = vrot.lane.b32.xlu0 %v9020_v19, %s7363_s9 }
 0xe15   : > { %v4604_v54 = vpop.permute.xlu1 %4603 }
 0xe16   : > { %v4650_v45 = vmul.f32 %v4604_v54, %v9026_v62  ;;  %v4602_v5 = vpop.permute.xlu0 %4601  ;;  %v4549_v54 = vadd.f32 1.0, %v7282_v1 }
 0xe17   : > { %v4649_v18 = vmul.f32 %v4602_v5, %v9028_v14  ;;  %v9073_v5 = vmul.f32 0.5, %v4550_v46  ;;  %v4575_v46 = vmul.f32 %v9052_v2, %v8875_v29 }
 0xe18   : > { %4683 = vrot.lane.b32.xlu1 %v4650_v45, %s7363_s9  ;;  %v9077_v22 = vmul.f32 0.5, %v4549_v54 }
 0xe19   : > { %v4608_v20 = vpop.permute.xlu1 %4607  ;;  %4681 = vrot.lane.b32.xlu0 %v4649_v18, %s7363_s9  ;;  %v4552_v18 = vadd.f32 1.0, %v9018_v13 }
 0xe1a   : > { %v4652_v12 = vmul.f32 %v4608_v20, %v9033_v17  ;;  %v4606_v56 = vpop.permute.xlu0 %4605  ;;  %v4551_v20 = vadd.f32 1.0, %v9020_v19  ;;  %v4570_v19 = vmul.f32 %v9026_v62, %v8843_v51  ;;  %v4574_v51 = vmul.f32 %v9041_v0, %v8863_v34 }
 0xe1b   : > { %v4651_v8 = vmul.f32 %v4606_v56, %v9036_v61  ;;  %v9083_v56 = vmul.f32 0.5, %v4552_v18 }
 0xe1c   : > { %4687 = vrot.lane.b32.xlu1 %v4652_v12, %s7363_s9  ;;  %v9086_v13 = vmul.f32 0.5, %v4551_v20 }
 0xe1d   : > { %v4612_v43 = vpop.permute.xlu1 %4611  ;;  %4685 = vrot.lane.b32.xlu0 %v4651_v8, %s7363_s9 }
 0xe1e   : > { %v4654_v6 = vmul.f32 %v4612_v43, %v9041_v0  ;;  %v4610_v25 = vpop.permute.xlu0 %4609 }
 0xe1f   : > { %v4653_v4 = vmul.f32 %v4610_v25, %v9044_v32  ;;  %v4569_v25 = vmul.f32 %v9028_v14, %v8845_v48 }
 0xe20   : > { %4691 = vrot.lane.b32.xlu1 %v4654_v6, %s7363_s9 }
 0xe21   : > { %v4616_v11 = vpop.permute.xlu1 %4615  ;;  %4689 = vrot.lane.b32.xlu0 %v4653_v4, %s7363_s9 }
 0xe22   : > { %v4656_v33 = vmul.f32 %v4616_v11, %v9049_v3  ;;  %v4614_v37 = vpop.permute.xlu0 %4613 }
 0xe23   : > { %v4655_v55 = vmul.f32 %v4614_v37, %v9052_v2  ;;  %v4571_v37 = vmul.f32 %v9036_v61, %v8855_v15 }
 0xe24   : > { %4695 = vrot.lane.b32.xlu1 %v4656_v33, %s7363_s9 }
 0xe25   : > { %v4620_v50 = vpop.permute.xlu1 %4619  ;;  %4693 = vrot.lane.b32.xlu0 %v4655_v55, %s7363_s9 }
 0xe26   : > { %v4658_v7 = vmul.f32 %v4620_v50, %v9057_v53  ;;  %v4618_v57 = vpop.permute.xlu0 %4617 }
 0xe27   : > { %v4657_v35 = vmul.f32 %v4618_v57, %v9060_v42 }
 0xe28   : > { %4699 = vrot.lane.b32.xlu1 %v4658_v7, %s7363_s9 }
 0xe29   : > { %v4624_v38 = vpop.permute.xlu1 %4623  ;;  %4697 = vrot.lane.b32.xlu0 %v4657_v35, %s7363_s9  ;;  %v4576_v35 = vmul.f32 %v9049_v3, %v8873_v52 }
 0xe2a   : > { %v4660_v41 = vmul.f32 %v4624_v38, %v9065_v28  ;;  %v4622_v45 = vpop.permute.xlu0 %4621 }
 0xe2b   : > { %v4659_v10 = vmul.f32 %v4622_v45, %v9068_v23 }
 0xe2c   : > { %4703 = vrot.lane.b32.xlu1 %v4660_v41, %s7363_s9 }
 0xe2d   : > { %v4628_v30 = vpop.permute.xlu1 %4627  ;;  %4701 = vrot.lane.b32.xlu0 %v4659_v10, %s7363_s9  ;;  %v4577_v10 = vmul.f32 %v9060_v42, %v8887_v21 }
 0xe2e   : > { %v4662_v1 = vmul.f32 %v4628_v30, %v9073_v5  ;;  %v4626_v39 = vpop.permute.xlu0 %4625 }
 0xe2f   : > { %v4661_v12 = vmul.f32 %v4626_v39, %v9077_v22  ;;  %v4580_v39 = vmul.f32 %v9065_v28, %v8897_v58 }
 0xe30   : > { %4707 = vrot.lane.b32.xlu1 %v4662_v1, %s7363_s9 }
 0xe31   : > { %v4632_v8 = vpop.permute.xlu1 %4631  ;;  %4705 = vrot.lane.b32.xlu0 %v4661_v12, %s7363_s9  ;;  %v4579_v12 = vmul.f32 %v9068_v23, %v8899_v31 }
 0xe32   : > { %v4664_v63 = vmul.f32 %v4632_v8, %v9083_v56  ;;  %v4630_v43 = vpop.permute.xlu0 %4629 }
 0xe33   : > { %v4663_v60 = vmul.f32 %v4630_v43, %v9086_v13 }
 0xe34   : > { %4711 = vrot.lane.b32.xlu1 %v4664_v63, %s7363_s9 }
 0xe35   : > { %4709 = vrot.lane.b32.xlu0 %v4663_v60, %s7363_s9 }
 0xe8a   : > { %v4684_v6 = vpop.permute.xlu1 %4683 }
 0xe8b   : > { %v4730_v4 = vadd.f32 %v4684_v6, %v4570_v19  ;;  %v4682_v16 = vpop.permute.xlu0 %4681  ;;  %v4582_v19 = vmul.f32 %v9073_v5, %v8909_v44  ;;  %v4581_v6 = vmul.f32 %v9077_v22, %v8911_v59 }
 0xe8c   : > { %v4729_v11 = vadd.f32 %v4682_v16, %v4569_v25 }
 0xe8d   : > { %7287 = vtanh.f32 %v4730_v4 }
 0xe8e   : > { %7289 = vtanh.f32 %v4729_v11  ;;  %v4688_v33 = vpop.permute.xlu1 %4687 }
 0xe8f   : > { %v4732_v55 = vadd.f32 %v4688_v33, %v4572_v27  ;;  %v4686_v49 = vpop.permute.xlu0 %4685  ;;  %v4584_v27 = vmul.f32 %v9083_v56, %v8921_v26  ;;  %v4583_v33 = vmul.f32 %v9086_v13, %v8923_v36  ;;  %v512_v26 = vld [vmem:[%s9333_s1 + $0x78] sm:$0xff]  ;;  %v514_v36 = vld [vmem:[%s9333_s1 + $0x88] sm:$0xff] }
 0xe90   : > { %v4731_v50 = vadd.f32 %v4686_v49, %v4571_v37 }
 0xe91   : > { %7291 = vtanh.f32 %v4732_v55 }
 0xe92   : > { %7293 = vtanh.f32 %v4731_v50  ;;  %v4692_v48 = vpop.permute.xlu1 %4691 }
 0xe93   : > { %v4734_v7 = vadd.f32 %v4692_v48, %v4574_v51  ;;  %v4690_v57 = vpop.permute.xlu0 %4689  ;;  %v513_v51 = vld [vmem:[%s9333_s1 + $0x80] sm:$0xff] }
 0xe94   : > { %v4733_v24 = vadd.f32 %v4690_v57, %v4573_v9  ;;  %v6761_v9 = vpack.c.bf16 %v513_v51, %v512_v26  ;;  %v518_v26 = vld [vmem:[%s9333_s1 + $0xa8] sm:$0xff]  ;;  %v519_v51 = vld [vmem:[%s9333_s1 + $0xb0] sm:$0xff] }
 0xe95   : > { %7295 = vtanh.f32 %v4734_v7  ;;  %v515_v7 = vld [vmem:[%s9333_s1 + $0x90] sm:$0xff] }
 0xe96   : > { %7297 = vtanh.f32 %v4733_v24  ;;  %v4696_v15 = vpop.permute.xlu1 %4695  ;;  %v6765_v24 = vpack.c.bf16 %v515_v7, %v514_v36  ;;  %6762 = vmatprep.subr.bf16.mxu0 %v6761_v9  ;;  %v7321_v36 = vld [vmem:[%s7587_s30] sm:$0xff] }
 0xe97   : > { %v7288_v38 = vpop.eup %7287  ;;  %v4736_v54 = vadd.f32 %v4696_v15, %v4576_v35  ;;  %v4694_v34 = vpop.permute.xlu0 %4693  ;;  %6764 = vmatpush3.bf16.msra.mxu0 %v6761_v9  ;;  %v520_v9 = vld [vmem:[%s9333_s1 + $0xb8] sm:$0xff]  ;;  %v521_v7 = vld [vmem:[%s9333_s1 + $0xc0] sm:$0xff] }
 0xe98   : > { %v7290_v41 = vpop.eup %7289  ;;  %v4735_v45 = vadd.f32 %v4694_v34, %v4575_v46  ;;  %4779 = vrot.lane.b32.xlu1 %v7288_v38, %s7363_s9  ;;  %6766 = vmatprep.subr.bf16.mxu0 %v6765_v24 }
 0xe99   : > { %7299 = vtanh.f32 %v4736_v54  ;;  %4777 = vrot.lane.b32.xlu0 %v7290_v41, %s7363_s9  ;;  %v511_v54 = vld [vmem:[%s9333_s1 + $0x70] sm:$0x3f] }
 0xe9a   : > { %7301 = vtanh.f32 %v4735_v45  ;;  %v4700_v52 = vpop.permute.xlu1 %4699 }
 0xe9b   : > { %v7292_v18 = vpop.eup %7291  ;;  %v4738_v29 = vadd.f32 %v4700_v52, %v4578_v47  ;;  %v4698_v30 = vpop.permute.xlu0 %4697  ;;  %6768 = vmatpush3.bf16.msra.mxu0 %v6765_v24  ;;  %v7323_v24 = vld [vmem:[%s7587_s30 + $0x10] sm:$0xff] }
 0xe9c   : > { %v7294_v20 = vpop.eup %7293  ;;  %v4737_v1 = vadd.f32 %v4698_v30, %v4577_v10  ;;  %4783 = vrot.lane.b32.xlu1 %v7292_v18, %s7363_s9  ;;  %6633 = vmatprep.subr.msk.mxu0 %vm5099_vm6, %v511_v54 }
 0xe9d   : > { %7303 = vtanh.f32 %v4738_v29  ;;  %4781 = vrot.lane.b32.xlu0 %v7294_v20, %s7363_s9 }
 0xe9e   : > { %7305 = vtanh.f32 %v4737_v1  ;;  %v4704_v40 = vpop.permute.xlu1 %4703 }
 0xe9f   : > { %v7296_v8 = vpop.eup %7295  ;;  %v4740_v21 = vadd.f32 %v4704_v40, %v4580_v39  ;;  %v4702_v63 = vpop.permute.xlu0 %4701 }
 0xea0   : > { %v7298_v43 = vpop.eup %7297  ;;  %v4739_v60 = vadd.f32 %v4702_v63, %v4579_v12  ;;  %4787 = vrot.lane.b32.xlu1 %v7296_v8, %s7363_s9 }
 0xea1   : > { %7307 = vtanh.f32 %v4740_v21  ;;  %4785 = vrot.lane.b32.xlu0 %v7298_v43, %s7363_s9 }
 0xea2   : > { %7309 = vtanh.f32 %v4739_v60  ;;  %v4708_v58 = vpop.permute.xlu1 %4707 }
 0xea3   : > { %v7300_v25 = vpop.eup %7299  ;;  %v4742_v31 = vadd.f32 %v4708_v58, %v4582_v19  ;;  %v4706_v4 = vpop.permute.xlu0 %4705 }
 0xea4   : > { %v7302_v16 = vpop.eup %7301  ;;  %v4741_v11 = vadd.f32 %v4706_v4, %v4581_v6  ;;  %4791 = vrot.lane.b32.xlu1 %v7300_v25, %s7363_s9 }
 0xea5   : > { %7311 = vtanh.f32 %v4742_v31  ;;  %4789 = vrot.lane.b32.xlu0 %v7302_v16, %s7363_s9 }
 0xea6   : > { %7313 = vtanh.f32 %v4741_v11  ;;  %v4712_v44 = vpop.permute.xlu1 %4711 }
 0xea7   : > { %v7304_v37 = vpop.eup %7303  ;;  %v4744_v59 = vadd.f32 %v4712_v44, %v4584_v27  ;;  %v4710_v55 = vpop.permute.xlu0 %4709 }
 0xea8   : > { %v7306_v49 = vpop.eup %7305  ;;  %v4743_v50 = vadd.f32 %v4710_v55, %v4583_v33  ;;  %4795 = vrot.lane.b32.xlu1 %v7304_v37, %s7363_s9 }
 0xea9   : > { %7315 = vtanh.f32 %v4744_v59  ;;  %4793 = vrot.lane.b32.xlu0 %v7306_v49, %s7363_s9 }
 0xeaa   : > { %7317 = vtanh.f32 %v4743_v50 }
 0xeab   : > { %v7308_v48 = vpop.eup %7307 }
 0xeac   : > { %v7310_v57 = vpop.eup %7309  ;;  %4799 = vrot.lane.b32.xlu1 %v7308_v48, %s7363_s9  ;;  %v6773_v48 = vpack.c.bf16 %v519_v51, %v518_v26 }
 0xead   : > { %4797 = vrot.lane.b32.xlu0 %v7310_v57, %s7363_s9  ;;  %v7322_v57 = vld [vmem:[%s7587_s30 + $0x8] sm:$0xff] }
 0xeaf   : > { %v7312_v35 = vpop.eup %7311 }
 0xeb0   : > { %v7314_v15 = vpop.eup %7313  ;;  %4803 = vrot.lane.b32.xlu1 %v7312_v35, %s7363_s9  ;;  %v6777_v35 = vpack.c.bf16 %v521_v7, %v520_v9 }
 0xeb1   : > { %4801 = vrot.lane.b32.xlu0 %v7314_v15, %s7363_s9  ;;  %v522_v15 = vld [vmem:[%s9333_s1 + $0xc8] sm:$0xff] }
 0xeb3   : > { %v7316_v46 = vpop.eup %7315 }
 0xeb4   : > { %v7318_v38 = vpop.eup %7317  ;;  %4807 = vrot.lane.b32.xlu1 %v7316_v46, %s7363_s9  ;;  %v523_v46 = vld [vmem:[%s9333_s1 + $0xd0] sm:$0xff] }
 0xeb5   : > { %4805 = vrot.lane.b32.xlu0 %v7318_v38, %s7363_s9  ;;  %v7324_v38 = vld [vmem:[%s7587_s30 + $0x18] sm:$0xff] }
 0xf0a   : > { %v4780_v34 = vpop.permute.xlu1 %4779 }
 0xf0b   : > { %v4826_v41 = vmul.f32 %v4780_v34, %v9026_v62  ;;  %v4778_v45 = vpop.permute.xlu0 %4777  ;;  %v6781_v34 = vpack.c.bf16 %v523_v46, %v522_v15  ;;  %v5830_v46 = vld [vmem:[%s9333_s1 + $0xdb] ss:$0 sm:$0xff] }
 0xf0c   : > { %v4825_v47 = vmul.f32 %v4778_v45, %v9028_v14  ;;  %v7327_v45 = vld [vmem:[%s7587_s30 + $0x30] sm:$0xff] }
 0xf0d   : > { %4859 = vrot.lane.b32.xlu1 %v4826_v41, %s7364_s14  ;;  %v7326_v41 = vld [vmem:[%s7587_s30 + $0x28] sm:$0xff] }
 0xf0e   : > { %v4784_v52 = vpop.permute.xlu1 %4783  ;;  %4857 = vrot.lane.b32.xlu0 %v4825_v47, %s7364_s14  ;;  %v7328_v47 = vld [vmem:[%s7587_s30 + $0x38] sm:$0xff] }
 0xf0f   : > { %v4828_v10 = vmul.f32 %v4784_v52, %v9033_v17  ;;  %v4782_v18 = vpop.permute.xlu0 %4781  ;;  %v7329_v52 = vld [vmem:[%s7587_s30 + $0x40] sm:$0xff] }
 0xf10   : > { %v4827_v29 = vmul.f32 %v4782_v18, %v9036_v61  ;;  %v7331_v18 = vld [vmem:[%s7587_s30 + $0x50] sm:$0xff] }
 0xf11   : > { %4863 = vrot.lane.b32.xlu1 %v4828_v10, %s7364_s14  ;;  %v7330_v10 = vld [vmem:[%s7587_s30 + $0x48] sm:$0xff] }
 0xf12   : > { %v4788_v30 = vpop.permute.xlu1 %4787  ;;  %4861 = vrot.lane.b32.xlu0 %v4827_v29, %s7364_s14  ;;  %v7332_v29 = vld [vmem:[%s7587_s30 + $0x58] sm:$0xff] }
 0xf13   : > { %v4830_v62 = vmul.f32 %v4788_v30, %v9041_v0  ;;  %v4786_v20 = vpop.permute.xlu0 %4785  ;;  %v7333_v30 = vld [vmem:[%s7587_s30 + $0x60] sm:$0xff] }
 0xf14   : > { %v4829_v14 = vmul.f32 %v4786_v20, %v9044_v32  ;;  %v7335_v20 = vld [vmem:[%s7587_s30 + $0x70] sm:$0xff] }
 0xf15   : > { %4867 = vrot.lane.b32.xlu1 %v4830_v62, %s7364_s14  ;;  %v7334_v62 = vld [vmem:[%s7587_s30 + $0x68] sm:$0xff] }
 0xf16   : > { %v4792_v1 = vpop.permute.xlu1 %4791  ;;  %4865 = vrot.lane.b32.xlu0 %v4829_v14, %s7364_s14  ;;  %v7336_v14 = vld [vmem:[%s7587_s30 + $0x78] sm:$0xff] }
 0xf17   : > { %v4832_v17 = vmul.f32 %v4792_v1, %v9049_v3  ;;  %v4790_v39 = vpop.permute.xlu0 %4789  ;;  %v5829_v1 = vld [vmem:[%s9333_s1 + $0xda] ss:$0 sm:$0xff] }
 0xf18   : > { %v4831_v61 = vmul.f32 %v4790_v39, %v9052_v2 }
 0xf19   : > { %4871 = vrot.lane.b32.xlu1 %v4832_v17, %s7364_s14 }
 0xf1a   : > { %v4796_v40 = vpop.permute.xlu1 %4795  ;;  %4869 = vrot.lane.b32.xlu0 %v4831_v61, %s7364_s14 }
 0xf1b   : > { %v4834_v0 = vmul.f32 %v4796_v40, %v9057_v53  ;;  %v4794_v12 = vpop.permute.xlu0 %4793 }
 0xf1c   : > { %v4833_v32 = vmul.f32 %v4794_v12, %v9060_v42 }
 0xf1d   : > { %4875 = vrot.lane.b32.xlu1 %v4834_v0, %s7364_s14 }
 0xf1e   : > { %v4800_v8 = vpop.permute.xlu1 %4799  ;;  %4873 = vrot.lane.b32.xlu0 %v4833_v32, %s7364_s14 }
 0xf1f   : > { %v4836_v3 = vmul.f32 %v4800_v8, %v9065_v28  ;;  %v4798_v21 = vpop.permute.xlu0 %4797 }
 0xf20   : > { %v4835_v2 = vmul.f32 %v4798_v21, %v9068_v23 }
 0xf21   : > { %4879 = vrot.lane.b32.xlu1 %v4836_v3, %s7364_s14 }
 0xf22   : > { %v4804_v63 = vpop.permute.xlu1 %4803  ;;  %4877 = vrot.lane.b32.xlu0 %v4835_v2, %s7364_s14 }
 0xf23   : > { %v4838_v53 = vmul.f32 %v4804_v63, %v9073_v5  ;;  %v4802_v43 = vpop.permute.xlu0 %4801  ;;  %v516_v5 = vld [vmem:[%s9333_s1 + $0x98] sm:$0xff] }
 0xf24   : > { %v4837_v42 = vmul.f32 %v4802_v43, %v9077_v22  ;;  %v517_v22 = vld [vmem:[%s9333_s1 + $0xa0] sm:$0xff] }
 0xf25   : > { %4883 = vrot.lane.b32.xlu1 %v4838_v53, %s7364_s14  ;;  %v6769_v25 = vpack.c.bf16 %v517_v22, %v516_v5 }
 0xf26   : > { %v4808_v60 = vpop.permute.xlu1 %4807  ;;  %4881 = vrot.lane.b32.xlu0 %v4837_v42, %s7364_s14 }
 0xf27   : > { %v4840_v28 = vmul.f32 %v4808_v60, %v9083_v56  ;;  %v4806_v19 = vpop.permute.xlu0 %4805 }
 0xf28   : > { %v4839_v23 = vmul.f32 %v4806_v19, %v9086_v13 }
 0xf29   : > { %4887 = vrot.lane.b32.xlu1 %v4840_v28, %s7364_s14 }
 0xf2a   : > { %4885 = vrot.lane.b32.xlu0 %v4839_v23, %s7364_s14 }
 0xf7f   : > { %v4860_v58 = vpop.permute.xlu1 %4859 }
 0xf80   : > { %v4858_v6 = vpop.permute.xlu0 %4857 }
 0xf81   : > { %6609 = vmatprep.mubr.msk.f32.mxu0 %vm2112_vm5, %v4858_v6 }
 0xf82   : > { %6610 = vmatmul.mubr.msk.f32.vlgmr.msra.gmra.mrb[98].mxu0 %vm2112_vm5, %v4860_v58 }
 0xf83   : > { %6634 = vmatpush3.msk.msra.mxu0 %vm5099_vm6, %v511_v54  ;;  %v4864_v56 = vpop.permute.xlu1 %4863  ;;  %v7325_v54 = vld [vmem:[%s7587_s30 + $0x20] sm:$0xff]  ;;  %s5567_s30 = sshll.u32 %s5560_s12, 4 }
 0xf84   : > { %v4862_v13 = vpop.permute.xlu0 %4861  ;;  %6770 = vmatprep.subr.bf16.mxu0 %v6769_v25  ;;  %p492_p8 = scmp.lt.s32.totalorder %s5567_s30, 31 }
 0xf85   : > { %6612 = vmatprep.mubr.msk.f32.mxu0 %vm2112_vm5, %v4862_v13 }
 0xf86   : > { %6613 = vmatmul.mubr.msk.f32.gmra.mrb[100].mxu0 %vm2112_vm5, %v4864_v56  ;;  %s9339_s30 = smov (!%p492_p8, %s5567_s30), 31 }
 0xf87   : > { %v4868_v31 = vpop.permute.xlu1 %4867  ;;  %s5568_s26 = sshll.u32 %s9339_s30, 3 }
 0xf88   : > { %v4866_v4 = vpop.permute.xlu0 %4865  ;;  %s9288_s4 = scalar_lea.vmem %s9334_s2, %s5568_s26 }
 0xf89   : > { %6615 = vmatprep.mubr.msk.f32.mxu0 %vm2112_vm5, %v4866_v4 }
 0xf8a   : > { %6616 = vmatmul.mubr.msk.f32.gmra.mrb[102].mxu0 %vm2112_vm5, %v4868_v31 }
 0xf8b   : > { %v4872_v16 = vpop.permute.xlu1 %4871 }
 0xf8c   : > { %v4870_v11 = vpop.permute.xlu0 %4869 }
 0xf8d   : > { %6618 = vmatprep.mubr.msk.f32.mxu0 %vm2112_vm5, %v4870_v11 }
 0xf8e   : > { %6619 = vmatmul.mubr.msk.f32.gmra.mrb[104].mxu0 %vm2112_vm5, %v4872_v16 }
 0xf8f   : > { %v4876_v27 = vpop.permute.xlu1 %4875 }
 0xf90   : > { %v4874_v44 = vpop.permute.xlu0 %4873 }
 0xf91   : > { %6621 = vmatprep.mubr.msk.f32.mxu0 %vm2112_vm5, %v4874_v44 }
 0xf92   : > { %6622 = vmatmul.mubr.msk.f32.gmra.mrb[106].mxu0 %vm2112_vm5, %v4876_v27 }
 0xf93   : > { %v4880_v33 = vpop.permute.xlu1 %4879 }
 0xf94   : > { %v4878_v37 = vpop.permute.xlu0 %4877 }
 0xf95   : > { %6624 = vmatprep.mubr.msk.f32.mxu0 %vm2112_vm5, %v4878_v37 }
 0xf96   : > { %6625 = vmatmul.mubr.msk.f32.gmra.mrb[108].mxu0 %vm2112_vm5, %v4880_v33 }
 0xf97   : > { %v4884_v59 = vpop.permute.xlu1 %4883 }
 0xf98   : > { %v4882_v55 = vpop.permute.xlu0 %4881 }
 0xf99   : > { %6627 = vmatprep.mubr.msk.f32.mxu0 %vm2112_vm5, %v4882_v55 }
 0xf9a   : > { %6628 = vmatmul.mubr.msk.f32.gmra.mrb[110].mxu0 %vm2112_vm5, %v4884_v59 }
 0xf9b   : > { %v4888_v50 = vpop.permute.xlu1 %4887 }
 0xf9c   : > { %v4886_v49 = vpop.permute.xlu0 %4885 }
 0xf9d   : > { %6630 = vmatprep.mubr.msk.f32.mxu0 %vm2112_vm5, %v4886_v49 }
 0xf9e   : > { %6631 = vmatmul.mubr.msk.f32.gmra.mrb[112].mxu0 %vm2112_vm5, %v4888_v50 }
 0xf9f   : > { %6635 = vmatprep.mubr.msk.f32.mxu0 %vm5066_vm7, %v7321_v36 }
 0xfa2   : > { %6636 = vmatmul.mubr.msk.f32.vlgmr.msra.gmra.mrb[98].mxu0 %vm5066_vm7, %v7322_v57 }
 0xfa3   : > { %6638 = vmatprep.mubr.msk.f32.mxu0 %vm5066_vm7, %v7323_v24  ;;  %6772 = vmatpush3.bf16.msra.mxu0 %v6769_v25 }
 0xfa4   : > { %6774 = vmatprep.subr.bf16.mxu0 %v6773_v48 }
 0xfa6   : > { %6639 = vmatmul.mubr.msk.f32.gmra.mrb[100].mxu0 %vm5066_vm7, %v7324_v38 }
 0xfa7   : > { %6641 = vmatprep.mubr.msk.f32.mxu0 %vm5066_vm7, %v7325_v54  ;;  %6776 = vmatpush3.bf16.msra.mxu0 %v6773_v48 }
 0xfa8   : > { %6778 = vmatprep.subr.bf16.mxu0 %v6777_v35 }
 0xfaa   : > { %6642 = vmatmul.mubr.msk.f32.gmra.mrb[102].mxu0 %vm5066_vm7, %v7326_v41 }
 0xfab   : > { %6644 = vmatprep.mubr.msk.f32.mxu0 %vm5066_vm7, %v7327_v45  ;;  %6780 = vmatpush3.bf16.msra.mxu0 %v6777_v35 }
 0xfac   : > { %6782 = vmatprep.subr.bf16.mxu0 %v6781_v34 }
 0xfae   : > { %6645 = vmatmul.mubr.msk.f32.gmra.mrb[104].mxu0 %vm5066_vm7, %v7328_v47 }
 0xfaf   : > { %6647 = vmatprep.mubr.msk.f32.mxu0 %vm5066_vm7, %v7329_v52  ;;  %6784 = vmatpush3.bf16.msra.mxu0 %v6781_v34 }
 0xfb2   : > { %6648 = vmatmul.mubr.msk.f32.gmra.mrb[106].mxu0 %vm5066_vm7, %v7330_v10 }
 0xfb3   : > { %6650 = vmatprep.mubr.msk.f32.mxu0 %vm5066_vm7, %v7331_v18 }
 0xfb6   : > { %6651 = vmatmul.mubr.msk.f32.gmra.mrb[108].mxu0 %vm5066_vm7, %v7332_v29 }
 0xfb7   : > { %6653 = vmatprep.mubr.msk.f32.mxu0 %vm5066_vm7, %v7333_v30 }
 0xfba   : > { %6654 = vmatmul.mubr.msk.f32.gmra.mrb[110].mxu0 %vm5066_vm7, %v7334_v62 }
 0xfbb   : > { %6656 = vmatprep.mubr.msk.f32.mxu0 %vm5066_vm7, %v7335_v20 }
 0xfbe   : > { %6657 = vmatmul.mubr.msk.f32.gmra.mrb[112].mxu0 %vm5066_vm7, %v7336_v14 }
0x1075   : > { %v6637_v17 = vpop.f32.mrb[98].mxu0 }
0x1076   : > { %v5253_v39 = vadd.f32 %v6637_v17, %v5829_v1  ;;  %v5169_v61 = vpop.f32.mrb[99].mxu0 }
0x1077   : > { %v5252_v40 = vadd.f32 %v5829_v1, %v5169_v61 }
0x1078   : > { %v5269_v32 = vmax.f32 %v5253_v39, 0.0 }
0x1079   : > { %v5268_v0 = vmax.f32 %v5252_v40, 0.0  ;;  %v6640_v12 = vpop.f32.mrb[100].mxu0 }
0x107a   : > { %v5255_v8 = vadd.f32 %v6640_v12, %v5829_v1  ;;  %v5179_v3 = vpop.f32.mrb[101].mxu0 }
0x107b   : > { %v5254_v21 = vadd.f32 %v5829_v1, %v5179_v3  ;;  %6675 = vmatprep.mubr.msk.f32.mxu0 %vm1406_vm4, %v5268_v0 }
0x107c   : > { %6676 = vmatmul.mubr.msk.f32.vlgmr.msra.gmra.mrb[114].mxu0 %vm1406_vm4, %v5269_v32  ;;  %v5271_v53 = vmax.f32 %v5255_v8, 0.0 }
0x107d   : > { %v5270_v2 = vmax.f32 %v5254_v21, 0.0  ;;  %v6643_v63 = vpop.f32.mrb[102].mxu0 }
0x107e   : > { %v5257_v43 = vadd.f32 %v6643_v63, %v5829_v1  ;;  %v5189_v42 = vpop.f32.mrb[103].mxu0 }
0x107f   : > { %v5256_v60 = vadd.f32 %v5829_v1, %v5189_v42  ;;  %6678 = vmatprep.mubr.msk.f32.mxu0 %vm1406_vm4, %v5270_v2 }
0x1080   : > { %6679 = vmatmul.mubr.msk.f32.gmra.mrb[116].mxu0 %vm1406_vm4, %v5271_v53  ;;  %v5273_v23 = vmax.f32 %v5257_v43, 0.0 }
0x1081   : > { %v5272_v28 = vmax.f32 %v5256_v60, 0.0  ;;  %v6646_v19 = vpop.f32.mrb[104].mxu0 }
0x1082   : > { %v5259_v5 = vadd.f32 %v6646_v19, %v5829_v1  ;;  %v5199_v22 = vpop.f32.mrb[105].mxu0 }
0x1083   : > { %v5258_v58 = vadd.f32 %v5829_v1, %v5199_v22  ;;  %6681 = vmatprep.mubr.msk.f32.mxu0 %vm1406_vm4, %v5272_v28 }
0x1084   : > { %6682 = vmatmul.mubr.msk.f32.gmra.mrb[118].mxu0 %vm1406_vm4, %v5273_v23  ;;  %v5275_v56 = vmax.f32 %v5259_v5, 0.0 }
0x1085   : > { %v5274_v6 = vmax.f32 %v5258_v58, 0.0  ;;  %v6649_v25 = vpop.f32.mrb[106].mxu0 }
0x1086   : > { %v5261_v13 = vadd.f32 %v6649_v25, %v5829_v1  ;;  %v5209_v31 = vpop.f32.mrb[107].mxu0 }
0x1087   : > { %v5260_v4 = vadd.f32 %v5829_v1, %v5209_v31  ;;  %6684 = vmatprep.mubr.msk.f32.mxu0 %vm1406_vm4, %v5274_v6 }
0x1088   : > { %6685 = vmatmul.mubr.msk.f32.gmra.mrb[120].mxu0 %vm1406_vm4, %v5275_v56  ;;  %v5277_v27 = vmax.f32 %v5261_v13, 0.0 }
0x1089   : > { %v5276_v16 = vmax.f32 %v5260_v4, 0.0  ;;  %v6652_v11 = vpop.f32.mrb[108].mxu0 }
0x108a   : > { %v5263_v44 = vadd.f32 %v6652_v11, %v5829_v1  ;;  %v5219_v33 = vpop.f32.mrb[109].mxu0 }
0x108b   : > { %v5262_v37 = vadd.f32 %v5829_v1, %v5219_v33  ;;  %6687 = vmatprep.mubr.msk.f32.mxu0 %vm1406_vm4, %v5276_v16 }
0x108c   : > { %6688 = vmatmul.mubr.msk.f32.gmra.mrb[122].mxu0 %vm1406_vm4, %v5277_v27  ;;  %v5279_v49 = vmax.f32 %v5263_v44, 0.0 }
0x108d   : > { %v5278_v59 = vmax.f32 %v5262_v37, 0.0  ;;  %v6655_v55 = vpop.f32.mrb[110].mxu0 }
0x108e   : > { %v5265_v50 = vadd.f32 %v6655_v55, %v5829_v1  ;;  %v5229_v26 = vpop.f32.mrb[111].mxu0 }
0x108f   : > { %v5264_v51 = vadd.f32 %v5829_v1, %v5229_v26  ;;  %6690 = vmatprep.mubr.msk.f32.mxu0 %vm1406_vm4, %v5278_v59 }
0x1090   : > { %6691 = vmatmul.mubr.msk.f32.gmra.mrb[124].mxu0 %vm1406_vm4, %v5279_v49  ;;  %v5281_v9 = vmax.f32 %v5265_v50, 0.0 }
0x1091   : > { %v5280_v36 = vmax.f32 %v5264_v51, 0.0  ;;  %v6658_v48 = vpop.f32.mrb[112].mxu0 }
0x1092   : > { %v5267_v7 = vadd.f32 %v6658_v48, %v5829_v1  ;;  %v5239_v57 = vpop.f32.mrb[113].mxu0 }
0x1093   : > { %v5266_v24 = vadd.f32 %v5829_v1, %v5239_v57  ;;  %6693 = vmatprep.mubr.msk.f32.mxu0 %vm1406_vm4, %v5280_v36 }
0x1094   : > { %6694 = vmatmul.mubr.msk.f32.gmra.mrb[126].mxu0 %vm1406_vm4, %v5281_v9  ;;  %v5283_v15 = vmax.f32 %v5267_v7, 0.0 }
0x1095   : > { %v5282_v35 = vmax.f32 %v5266_v24, 0.0 }
0x1097   : > { %6696 = vmatprep.mubr.msk.f32.mxu0 %vm1406_vm4, %v5282_v35 }
0x1098   : > { %6697 = vmatmul.mubr.msk.f32.gmra.mrb[128].mxu0 %vm1406_vm4, %v5283_v15 }
0x114f   : > { %v6677_v38 = vpop.f32.mrb[114].mxu0 }
0x1150   : > { %v5408_v54 = vadd.f32 %v6677_v38, %v5830_v46  ;;  %v5402_v34 = vpop.f32.mrb[115].mxu0 }
0x1151   : > { %v5403_v41 = vadd.f32 %v5830_v46, %v5402_v34 }
0x1152   : > { %5483 = vst.msk [vmem:[%s9288_s4 + $0x8] sm:$0xff] %vm5481_vm8, %v5408_v54 }
0x1153   : > { %5482 = vst.msk [vmem:[%s9288_s4] sm:$0xff] %vm5481_vm8, %v5403_v41  ;;  %v6680_v45 = vpop.f32.mrb[116].mxu0 }
0x1154   : > { %v5418_v47 = vadd.f32 %v6680_v45, %v5830_v46  ;;  %v5412_v52 = vpop.f32.mrb[117].mxu0 }
0x1155   : > { %v5413_v10 = vadd.f32 %v5830_v46, %v5412_v52 }
0x1156   : > { %5485 = vst.msk [vmem:[%s9288_s4 + $0x18] sm:$0xff] %vm5481_vm8, %v5418_v47 }
0x1157   : > { %5484 = vst.msk [vmem:[%s9288_s4 + $0x10] sm:$0xff] %vm5481_vm8, %v5413_v10  ;;  %v6683_v18 = vpop.f32.mrb[118].mxu0 }
0x1158   : > { %v5428_v29 = vadd.f32 %v6683_v18, %v5830_v46  ;;  %v5422_v30 = vpop.f32.mrb[119].mxu0 }
0x1159   : > { %v5423_v62 = vadd.f32 %v5830_v46, %v5422_v30 }
0x115a   : > { %5487 = vst.msk [vmem:[%s9288_s4 + $0x28] sm:$0xff] %vm5481_vm8, %v5428_v29 }
0x115b   : > { %5486 = vst.msk [vmem:[%s9288_s4 + $0x20] sm:$0xff] %vm5481_vm8, %v5423_v62  ;;  %v6686_v20 = vpop.f32.mrb[120].mxu0 }
0x115c   : > { %v5438_v14 = vadd.f32 %v6686_v20, %v5830_v46  ;;  %v5432_v1 = vpop.f32.mrb[121].mxu0 }
0x115d   : > { %v5433_v17 = vadd.f32 %v5830_v46, %v5432_v1 }
0x115e   : > { %5489 = vst.msk [vmem:[%s9288_s4 + $0x38] sm:$0xff] %vm5481_vm8, %v5438_v14 }
0x115f   : > { %5488 = vst.msk [vmem:[%s9288_s4 + $0x30] sm:$0xff] %vm5481_vm8, %v5433_v17  ;;  %v6689_v39 = vpop.f32.mrb[122].mxu0 }
0x1160   : > { %v5448_v61 = vadd.f32 %v6689_v39, %v5830_v46  ;;  %v5442_v40 = vpop.f32.mrb[123].mxu0 }
0x1161   : > { %v5443_v0 = vadd.f32 %v5830_v46, %v5442_v40 }
0x1162   : > { %5491 = vst.msk [vmem:[%s9288_s4 + $0x48] sm:$0xff] %vm5481_vm8, %v5448_v61 }
0x1163   : > { %5490 = vst.msk [vmem:[%s9288_s4 + $0x40] sm:$0xff] %vm5481_vm8, %v5443_v0  ;;  %v6692_v12 = vpop.f32.mrb[124].mxu0 }
0x1164   : > { %v5458_v32 = vadd.f32 %v6692_v12, %v5830_v46  ;;  %v5452_v8 = vpop.f32.mrb[125].mxu0 }
0x1165   : > { %v5453_v3 = vadd.f32 %v5830_v46, %v5452_v8 }
0x1166   : > { %5493 = vst.msk [vmem:[%s9288_s4 + $0x58] sm:$0xff] %vm5481_vm8, %v5458_v32 }
0x1167   : > { %5492 = vst.msk [vmem:[%s9288_s4 + $0x50] sm:$0xff] %vm5481_vm8, %v5453_v3  ;;  %v6695_v21 = vpop.f32.mrb[126].mxu0 }
0x1168   : > { %v5468_v2 = vadd.f32 %v6695_v21, %v5830_v46  ;;  %v5462_v63 = vpop.f32.mrb[127].mxu0 }
0x1169   : > { %v5463_v53 = vadd.f32 %v5830_v46, %v5462_v63 }
0x116a   : > { %5495 = vst.msk [vmem:[%s9288_s4 + $0x68] sm:$0xff] %vm5481_vm8, %v5468_v2 }
0x116b   : > { %5494 = vst.msk [vmem:[%s9288_s4 + $0x60] sm:$0xff] %vm5481_vm8, %v5463_v53  ;;  %v6698_v43 = vpop.f32.mrb[128].mxu0 }
0x116c   : > { %v5478_v42 = vadd.f32 %v6698_v43, %v5830_v46  ;;  %v5472_v60 = vpop.f32.mrb[129].mxu0 }
0x116d   : > { %v5473_v28 = vadd.f32 %v5830_v46, %v5472_v60 }
0x116e   : > { %5497 = vst.msk [vmem:[%s9288_s4 + $0x78] sm:$0xff] %vm5481_vm8, %v5478_v42 }
0x116f   : > { %5496 = vst.msk [vmem:[%s9288_s4 + $0x70] sm:$0xff] %vm5481_vm8, %v5473_v28 }
0x1170 PF: > { %p9_p9 = scmp.ge.s32.totalorder %s7397_s13, 4   ;;  %s9335_s9 = smov %s7355_s10 }
0x1171   : > { %s9336_s10 = smov %s7406_s16  ;;  %s9337_s11 = smov %s7397_s13 }
0x1172   :  { %11 = sbr.rel (!%p9_p9) target bundleno = 2 (0x2), region = 101 }

</bundles_post_ra>
